<compile_context>
chip_gen: v6e
topology: v6e:2x2x1
jax: 0.10.0
libtpu: 0.0.40
codegen_flags: <defaults>
</compile_context>

<pallas_src>
import functools

import jax
import jax.numpy as jnp
from jax.experimental import pallas as pl
from jax.experimental.pallas import tpu as pltpu

LANE = 128  # TPU vreg lane width; each GRU gate occupies one full lane block.


# ----------------------------------------------------------------------------
# Fused GRUNet kernel: all layers + FC head in one invocation, all data in VMEM
# ----------------------------------------------------------------------------
def make_grunet_kernel(n_layers, seq_len, batch, hidden, gate_pad):
    T, B, H, G = seq_len, batch, hidden, gate_pad
    L = n_layers

    def kernel(*refs):
        # ---- inputs ----
        x_ref = refs[0]                                    # (T*B, Din)
        wi_refs = [refs[1 + 4 * l] for l in range(L)]      # (Din|G, 3G)
        wh_refs = [refs[2 + 4 * l] for l in range(L)]      # (G, 3G)
        bi_refs = [refs[3 + 4 * l] for l in range(L)]      # (1, 3G)
        bh_refs = [refs[4 + 4 * l] for l in range(L)]      # (1, 3G)
        fcw_ref = refs[1 + 4 * L]                          # (G, DoutP)
        fcb_ref = refs[2 + 4 * L]                          # (1, DoutP)
        h0_ref = refs[3 + 4 * L]                           # (L, B, G)
        # ---- outputs ----
        fc_out_ref = refs[4 + 4 * L]                       # (B, DoutP)
        hN_ref = refs[5 + 4 * L]                           # (L, B, G)

        # Hoisted: bf16 weight casts (one MXU pass per dot) and bias broadcasts
        # (JAX does not CSE broadcast_in_dim across the unrolled recurrence).
        wi_bf = [wi_refs[l][...].astype(jnp.bfloat16) for l in range(L)]
        wh_bf = [wh_refs[l][...].astype(jnp.bfloat16) for l in range(L)]
        bh_b = [jnp.broadcast_to(bh_refs[l][...], (B, 3 * G)) for l in range(L)]
        bi_b = [None] + [jnp.broadcast_to(bi_refs[l][...], (B, 3 * G))
                         for l in range(1, L)]

        # Layer-0 input projection hoisted over the whole sequence: one batched
        # MXU matmul (M = T*B rows), input bias folded in.
        gx0_full = (jnp.dot(x_ref[...].astype(jnp.bfloat16), wi_bf[0],
                            preferred_element_type=jnp.float32)
                    + bi_refs[0][...])                     # (T*B, 3G)  [r|z|n]

        # Recurrent state: f32 copy (carried) + bf16 copy (MXU operand).
        h_f = [h0_ref[l] for l in range(L)]                # (B, G) each
        h_b = [h_f[l].astype(jnp.bfloat16) for l in range(L)]
        gx_in = {}  # (layer, t) -> pending input projection (B, 3G), l >= 1

        # Wave-interleaved schedule: at wave w, layer l runs time step t = w-l.
        # Hidden matmuls of different layers within a wave are independent, so
        # the serial chain is T + L - 1 waves (dot -> EUP -> VPU per wave).
        for w in range(T + L - 1):
            for l in range(L):
                t = w - l
                if not (0 <= t < T):
                    continue
                gx = (gx0_full[t * B:(t + 1) * B, :] if l == 0
                      else gx_in.pop((l, t)))
                # Single fused hidden matmul per step (one MXU push).
                gh = (jnp.dot(h_b[l], wh_bf[l],
                              preferred_element_type=jnp.float32) + bh_b[l])
                # Gate slices are whole 128-lane blocks -> no cross-lane XLU.
                rz = jax.nn.sigmoid(gx[:, :2 * G] + gh[:, :2 * G])
                r = rz[:, :G]
                z = rz[:, G:]
                # b_hn stays inside the r-multiplied term (PyTorch semantics).
                n = jnp.tanh(gx[:, 2 * G:] + r * gh[:, 2 * G:])
                h_new = (1.0 - z) * n + z * h_f[l]
                h_f[l] = h_new
                h_b[l] = h_new.astype(jnp.bfloat16)
                if l + 1 < L:
                    # Next layer's input projection, computed as soon as h_t is
                    # ready; it is off the recurrent dependency chain.
                    gx_in[(l + 1, t)] = (
                        jnp.dot(h_b[l], wi_bf[l + 1],
                                preferred_element_type=jnp.float32)
                        + bi_b[l + 1])

        for l in range(L):
            hN_ref[l] = h_f[l]   # final hidden per layer, written once

        # Fused FC head: out[:, -1] of the top layer == its final hidden h.
        fc_out_ref[...] = (
            jnp.dot(jnp.maximum(h_f[L - 1], 0.0).astype(jnp.bfloat16),
                    fcw_ref[...].astype(jnp.bfloat16),
                    preferred_element_type=jnp.float32)
            + fcb_ref[...])

    return kernel


# ----------------------------------------------------------------------------
# Lane-aligned packing of the logical (PyTorch-layout) parameters
# ----------------------------------------------------------------------------
def _pack_layer(wi, wh, bi, bh, H, G, pad_k):
    """Pad gate-fused GRU weights so each gate occupies a 128-lane block.

    pad_k: pad the K (input) dimension of W_i to G with zero rows; required for
    layers whose input is the previous layer's lane-padded hidden state.
    All padded rows / lanes are zero so padded lanes of h cannot pollute gates.
    """
    d_in = wi.shape[0]
    d_in_p = G if pad_k else d_in
    wi_p = jnp.zeros((d_in_p, 3 * G), jnp.float32)
    wh_p = jnp.zeros((G, 3 * G), jnp.float32)
    bi_p = jnp.zeros((1, 3 * G), jnp.float32)
    bh_p = jnp.zeros((1, 3 * G), jnp.float32)
    for g in range(3):
        wi_p = wi_p.at[:d_in, g * G:g * G + H].set(wi[:, g * H:(g + 1) * H])
        wh_p = wh_p.at[:H, g * G:g * G + H].set(wh[:, g * H:(g + 1) * H])
        bi_p = bi_p.at[:, g * G:g * G + H].set(bi[:, g * H:(g + 1) * H])
        bh_p = bh_p.at[:, g * G:g * G + H].set(bh[:, g * H:(g + 1) * H])
    return wi_p, wh_p, bi_p, bh_p


def _pack_fc(fc_w_t, fc_b, H, G, dout_p):
    Dout = fc_w_t.shape[1]
    w_p = jnp.zeros((G, dout_p), jnp.float32).at[:H, :Dout].set(fc_w_t)
    b_p = jnp.zeros((1, dout_p), jnp.float32).at[:, :Dout].set(fc_b)
    return w_p, b_p


def grunet_forward(params, x, h0):
    """x: (batch, seq, input_dim); h0: (n_layers, batch, hidden).
    Returns (fc_out (batch, output_dim), h_new (n_layers, batch, hidden))."""
    B, T, Din = x.shape
    L, _, H = h0.shape
    Dout = params["fc_w_t"].shape[-1]
    G = LANE
    assert H <= G, "hidden_dim must fit in one lane block for this packing"
    dout_p = ((Dout + LANE - 1) // LANE) * LANE

    # Time-major + flattened to (T*B, Din) for the hoisted layer-0 projection.
    x_flat = jnp.transpose(x, (1, 0, 2)).reshape(T * B, Din)
    # Hidden state carried lane-padded to 128; padded lanes start (and stay) 0.
    h0_p = jnp.pad(h0, ((0, 0), (0, 0), (0, G - H)))

    args = [x_flat]
    for l, p in enumerate(params["gru_layers"]):
        args += list(_pack_layer(p["wi"], p["wh"], p["b_i"], p["b_h"],
                                 H, G, pad_k=(l > 0)))
    fcw_p, fcb_p = _pack_fc(params["fc_w_t"], params["fc_b"], H, G, dout_p)
    args += [fcw_p, fcb_p, h0_p]

    vmem = pl.BlockSpec(memory_space=pltpu.MemorySpace.VMEM)  # whole array in VMEM
    fc_p, hN_p = pl.pallas_call(
        make_grunet_kernel(L, T, B, H, G),
        out_shape=(jax.ShapeDtypeStruct((B, dout_p), jnp.float32),
                   jax.ShapeDtypeStruct((L, B, G), jnp.float32)),
        in_specs=[vmem] * len(args),
        out_specs=(vmem, vmem),
    )(*args)
    return fc_p[:, :Dout], hN_p[:, :, :H]


# ----------------------------------------------------------------------------
# Deterministic parameter init (PyTorch-style uniform(-1/sqrt(H), 1/sqrt(H)))
# Logical layout: W_i (d_in, 3H), W_h (H, 3H), biases (1, 3H); gate order [r|z|n].
# ----------------------------------------------------------------------------
def init_params(key, input_dim, hidden_dim, output_dim, n_layers):
    H = hidden_dim
    k = 1.0 / (hidden_dim ** 0.5)

    def u(kk, shape):
        return jax.random.uniform(kk, shape, jnp.float32, -k, k)

    params = {"gru_layers": []}
    for l in range(n_layers):
        d_in = input_dim if l == 0 else hidden_dim
        key, k_wi, k_wh, k_bi, k_bh = jax.random.split(key, 5)
        params["gru_layers"].append(dict(
            wi=u(k_wi, (d_in, 3 * H)),      # weight_ih_l{k}^T, gates fused
            wh=u(k_wh, (H, 3 * H)),         # weight_hh_l{k}^T, gates fused
            b_i=u(k_bi, (1, 3 * H)),        # bias_ih_l{k}
            b_h=u(k_bh, (1, 3 * H)),        # bias_hh_l{k}
        ))
    key, kw, kb = jax.random.split(key, 3)
    params["fc_w_t"] = u(kw, (hidden_dim, output_dim))
    params["fc_b"] = u(kb, (1, output_dim))
    return params


# ----------------------------------------------------------------------------
# Pure-JAX f32 reference (PyTorch GRU semantics) for correctness check
# ----------------------------------------------------------------------------
def grunet_reference(params, x, h0):
    H = h0.shape[-1]
    x_tm = jnp.transpose(x, (1, 0, 2))       # (T, B, Din)
    layer_in = x_tm
    h_finals = []
    for l, p in enumerate(params["gru_layers"]):
        def step(h_prev, x_t, p=p):
            gx = x_t @ p["wi"] + p["b_i"]
            gh = h_prev @ p["wh"] + p["b_h"]
            r = jax.nn.sigmoid(gx[:, :H] + gh[:, :H])
            z = jax.nn.sigmoid(gx[:, H:2 * H] + gh[:, H:2 * H])
            n = jnp.tanh(gx[:, 2 * H:] + r * gh[:, 2 * H:])
            h_new = (1.0 - z) * n + z * h_prev
            return h_new, h_new

        h_T, out_seq = jax.lax.scan(step, h0[l], layer_in)
        h_finals.append(h_T)
        layer_in = out_seq
    last = jnp.maximum(layer_in[-1], 0.0)
    fc_out = last @ params["fc_w_t"] + params["fc_b"]
    return fc_out, jnp.stack(h_finals, axis=0)


if __name__ == "__main__":
    input_dim, hidden_dim, output_dim, n_layers = 16, 32, 8, 2
    batch, seq = 8, 6

    key = jax.random.PRNGKey(0)
    key, kx, kh, kp = jax.random.split(key, 4)
    x = jax.random.normal(kx, (batch, seq, input_dim), jnp.float32)
    # nn.GRU expects h of shape (n_layers, batch, hidden).
    h0 = 0.1 * jax.random.normal(kh, (n_layers, batch, hidden_dim), jnp.float32)
    params = init_params(kp, input_dim, hidden_dim, output_dim, n_layers)

    fwd = jax.jit(functools.partial(grunet_forward, params))
    out, h_new = fwd(x, h0)
    jax.block_until_ready((out, h_new))

    ref_out, ref_h = grunet_reference(params, x, h0)
    # bf16 MXU operands inside the recurrence -> tolerance loosened vs the
    # f32 reference (per the perf review); still catches structural errors.
    assert jnp.allclose(out, ref_out, atol=5e-2, rtol=5e-2), "fc output mismatch"
    assert jnp.allclose(h_new, ref_h, atol=5e-2, rtol=5e-2), "hidden state mismatch"

    print("KERNEL_OK")
</pallas_src>

<mosaic_0001>
module attributes {stable_mosaic.version = 11 : i64} {
  func.func @kernel(%arg0: memref<48x16xf32, #tpu.memory_space<vmem>>, %arg1: memref<16x384xf32, #tpu.memory_space<vmem>>, %arg2: memref<128x384xf32, #tpu.memory_space<vmem>>, %arg3: memref<1x384xf32, #tpu.memory_space<vmem>>, %arg4: memref<1x384xf32, #tpu.memory_space<vmem>>, %arg5: memref<128x384xf32, #tpu.memory_space<vmem>>, %arg6: memref<128x384xf32, #tpu.memory_space<vmem>>, %arg7: memref<1x384xf32, #tpu.memory_space<vmem>>, %arg8: memref<1x384xf32, #tpu.memory_space<vmem>>, %arg9: memref<128x128xf32, #tpu.memory_space<vmem>>, %arg10: memref<1x128xf32, #tpu.memory_space<vmem>>, %arg11: memref<2x8x128xf32, #tpu.memory_space<vmem>>, %arg12: memref<8x128xf32, #tpu.memory_space<vmem>>, %arg13: memref<2x8x128xf32, #tpu.memory_space<vmem>>) attributes {dimension_semantics = [], scalar_prefetch = 0 : i64, scratch_operands = 0 : i64, tpu.core_type = #tpu.core_type<tc>} {
    %c0 = arith.constant 0 : index
    %c0_0 = arith.constant 0 : index
    %0 = vector.load %arg1[%c0, %c0_0] : memref<16x384xf32, #tpu.memory_space<vmem>>, vector<16x384xf32>
    %1 = arith.truncf %0 : vector<16x384xf32> to vector<16x384xbf16>
    %c0_1 = arith.constant 0 : index
    %c0_2 = arith.constant 0 : index
    %2 = vector.load %arg5[%c0_1, %c0_2] : memref<128x384xf32, #tpu.memory_space<vmem>>, vector<128x384xf32>
    %3 = arith.truncf %2 : vector<128x384xf32> to vector<128x384xbf16>
    %c0_3 = arith.constant 0 : index
    %c0_4 = arith.constant 0 : index
    %4 = vector.load %arg2[%c0_3, %c0_4] : memref<128x384xf32, #tpu.memory_space<vmem>>, vector<128x384xf32>
    %5 = arith.truncf %4 : vector<128x384xf32> to vector<128x384xbf16>
    %c0_5 = arith.constant 0 : index
    %c0_6 = arith.constant 0 : index
    %6 = vector.load %arg6[%c0_5, %c0_6] : memref<128x384xf32, #tpu.memory_space<vmem>>, vector<128x384xf32>
    %7 = arith.truncf %6 : vector<128x384xf32> to vector<128x384xbf16>
    %c0_7 = arith.constant 0 : index
    %c0_8 = arith.constant 0 : index
    %8 = vector.load %arg4[%c0_7, %c0_8] : memref<1x384xf32, #tpu.memory_space<vmem>>, vector<1x384xf32>
    %9 = vector.shape_cast %8 : vector<1x384xf32> to vector<1x384xf32>
    %10 = vector.broadcast %9 : vector<1x384xf32> to vector<8x384xf32>
    %c0_9 = arith.constant 0 : index
    %c0_10 = arith.constant 0 : index
    %11 = vector.load %arg8[%c0_9, %c0_10] : memref<1x384xf32, #tpu.memory_space<vmem>>, vector<1x384xf32>
    %12 = vector.shape_cast %11 : vector<1x384xf32> to vector<1x384xf32>
    %13 = vector.broadcast %12 : vector<1x384xf32> to vector<8x384xf32>
    %c0_11 = arith.constant 0 : index
    %c0_12 = arith.constant 0 : index
    %14 = vector.load %arg7[%c0_11, %c0_12] : memref<1x384xf32, #tpu.memory_space<vmem>>, vector<1x384xf32>
    %15 = vector.shape_cast %14 : vector<1x384xf32> to vector<1x384xf32>
    %16 = vector.broadcast %15 : vector<1x384xf32> to vector<8x384xf32>
    %c0_13 = arith.constant 0 : index
    %c0_14 = arith.constant 0 : index
    %17 = vector.load %arg0[%c0_13, %c0_14] : memref<48x16xf32, #tpu.memory_space<vmem>>, vector<48x16xf32>
    %18 = arith.truncf %17 : vector<48x16xf32> to vector<48x16xbf16>
    %cst = arith.constant dense<0.000000e+00> : vector<48x384xf32>
    %19 = tpu.matmul %18, %1, %cst {dimension_numbers = #tpu.dot_dimension_numbers<[1], [0], [0], [1], [0, 0, 1, 1], [], []>} : vector<48x16xbf16>, vector<16x384xbf16>, vector<48x384xf32> -> vector<48x384xf32>
    %c0_15 = arith.constant 0 : index
    %c0_16 = arith.constant 0 : index
    %20 = vector.load %arg3[%c0_15, %c0_16] : memref<1x384xf32, #tpu.memory_space<vmem>>, vector<1x384xf32>
    %21 = vector.broadcast %20 : vector<1x384xf32> to vector<48x384xf32>
    %22 = arith.addf %19, %21 : vector<48x384xf32>
    %c0_17 = arith.constant 0 : index
    %c0_18 = arith.constant 0 : index
    %c0_19 = arith.constant 0 : index
    %23 = vector.load %arg11[%c0_17, %c0_18, %c0_19] : memref<2x8x128xf32, #tpu.memory_space<vmem>>, vector<1x8x128xf32>
    %24 = vector.shape_cast %23 : vector<1x8x128xf32> to vector<8x128xf32>
    %c1 = arith.constant 1 : index
    %c0_20 = arith.constant 0 : index
    %c0_21 = arith.constant 0 : index
    %25 = vector.load %arg11[%c1, %c0_20, %c0_21] : memref<2x8x128xf32, #tpu.memory_space<vmem>>, vector<1x8x128xf32>
    %26 = vector.shape_cast %25 : vector<1x8x128xf32> to vector<8x128xf32>
    %27 = arith.truncf %24 : vector<8x128xf32> to vector<8x128xbf16>
    %28 = arith.truncf %26 : vector<8x128xf32> to vector<8x128xbf16>
    %29 = vector.extract_strided_slice %22 {offsets = [0, 0], sizes = [8, 384], strides = [1, 1]} : vector<48x384xf32> to vector<8x384xf32>
    %cst_22 = arith.constant dense<0.000000e+00> : vector<8x384xf32>
    %30 = tpu.matmul %27, %5, %cst_22 {dimension_numbers = #tpu.dot_dimension_numbers<[1], [0], [0], [1], [0, 0, 1, 1], [], []>} : vector<8x128xbf16>, vector<128x384xbf16>, vector<8x384xf32> -> vector<8x384xf32>
    %31 = arith.addf %30, %10 : vector<8x384xf32>
    %32 = vector.extract_strided_slice %29 {offsets = [0, 0], sizes = [8, 256], strides = [1, 1]} : vector<8x384xf32> to vector<8x256xf32>
    %33 = vector.extract_strided_slice %31 {offsets = [0, 0], sizes = [8, 256], strides = [1, 1]} : vector<8x384xf32> to vector<8x256xf32>
    %34 = arith.addf %32, %33 : vector<8x256xf32>
    %35 = arith.negf %34 : vector<8x256xf32>
    %36 = math.exp %35 : vector<8x256xf32>
    %cst_23 = arith.constant 1.000000e+00 : f32
    %37 = vector.broadcast %cst_23 : f32 to vector<8x256xf32>
    %38 = arith.addf %37, %36 : vector<8x256xf32>
    %39 = arith.divf %37, %38 : vector<8x256xf32>
    %40 = vector.extract_strided_slice %39 {offsets = [0, 0], sizes = [8, 128], strides = [1, 1]} : vector<8x256xf32> to vector<8x128xf32>
    %41 = vector.extract_strided_slice %39 {offsets = [0, 128], sizes = [8, 128], strides = [1, 1]} : vector<8x256xf32> to vector<8x128xf32>
    %42 = vector.extract_strided_slice %29 {offsets = [0, 256], sizes = [8, 128], strides = [1, 1]} : vector<8x384xf32> to vector<8x128xf32>
    %43 = vector.extract_strided_slice %31 {offsets = [0, 256], sizes = [8, 128], strides = [1, 1]} : vector<8x384xf32> to vector<8x128xf32>
    %44 = arith.mulf %40, %43 : vector<8x128xf32>
    %45 = arith.addf %42, %44 : vector<8x128xf32>
    %46 = math.tanh %45 : vector<8x128xf32>
    %cst_24 = arith.constant 1.000000e+00 : f32
    %47 = vector.broadcast %cst_24 : f32 to vector<8x128xf32>
    %48 = arith.subf %47, %41 : vector<8x128xf32>
    %49 = arith.mulf %48, %46 : vector<8x128xf32>
    %50 = arith.mulf %41, %24 : vector<8x128xf32>
    %51 = arith.addf %49, %50 : vector<8x128xf32>
    %52 = arith.truncf %51 : vector<8x128xf32> to vector<8x128xbf16>
    %cst_25 = arith.constant dense<0.000000e+00> : vector<8x384xf32>
    %53 = tpu.matmul %52, %3, %cst_25 {dimension_numbers = #tpu.dot_dimension_numbers<[1], [0], [0], [1], [0, 0, 1, 1], [], []>} : vector<8x128xbf16>, vector<128x384xbf16>, vector<8x384xf32> -> vector<8x384xf32>
    %54 = arith.addf %53, %16 : vector<8x384xf32>
    %55 = vector.extract_strided_slice %22 {offsets = [8, 0], sizes = [8, 384], strides = [1, 1]} : vector<48x384xf32> to vector<8x384xf32>
    %cst_26 = arith.constant dense<0.000000e+00> : vector<8x384xf32>
    %56 = tpu.matmul %52, %5, %cst_26 {dimension_numbers = #tpu.dot_dimension_numbers<[1], [0], [0], [1], [0, 0, 1, 1], [], []>} : vector<8x128xbf16>, vector<128x384xbf16>, vector<8x384xf32> -> vector<8x384xf32>
    %57 = arith.addf %56, %10 : vector<8x384xf32>
    %58 = vector.extract_strided_slice %55 {offsets = [0, 0], sizes = [8, 256], strides = [1, 1]} : vector<8x384xf32> to vector<8x256xf32>
    %59 = vector.extract_strided_slice %57 {offsets = [0, 0], sizes = [8, 256], strides = [1, 1]} : vector<8x384xf32> to vector<8x256xf32>
    %60 = arith.addf %58, %59 : vector<8x256xf32>
    %61 = arith.negf %60 : vector<8x256xf32>
    %62 = math.exp %61 : vector<8x256xf32>
    %cst_27 = arith.constant 1.000000e+00 : f32
    %63 = vector.broadcast %cst_27 : f32 to vector<8x256xf32>
    %64 = arith.addf %63, %62 : vector<8x256xf32>
    %65 = arith.divf %63, %64 : vector<8x256xf32>
    %66 = vector.extract_strided_slice %65 {offsets = [0, 0], sizes = [8, 128], strides = [1, 1]} : vector<8x256xf32> to vector<8x128xf32>
    %67 = vector.extract_strided_slice %65 {offsets = [0, 128], sizes = [8, 128], strides = [1, 1]} : vector<8x256xf32> to vector<8x128xf32>
    %68 = vector.extract_strided_slice %55 {offsets = [0, 256], sizes = [8, 128], strides = [1, 1]} : vector<8x384xf32> to vector<8x128xf32>
    %69 = vector.extract_strided_slice %57 {offsets = [0, 256], sizes = [8, 128], strides = [1, 1]} : vector<8x384xf32> to vector<8x128xf32>
    %70 = arith.mulf %66, %69 : vector<8x128xf32>
    %71 = arith.addf %68, %70 : vector<8x128xf32>
    %72 = math.tanh %71 : vector<8x128xf32>
    %cst_28 = arith.constant 1.000000e+00 : f32
    %73 = vector.broadcast %cst_28 : f32 to vector<8x128xf32>
    %74 = arith.subf %73, %67 : vector<8x128xf32>
    %75 = arith.mulf %74, %72 : vector<8x128xf32>
    %76 = arith.mulf %67, %51 : vector<8x128xf32>
    %77 = arith.addf %75, %76 : vector<8x128xf32>
    %78 = arith.truncf %77 : vector<8x128xf32> to vector<8x128xbf16>
    %cst_29 = arith.constant dense<0.000000e+00> : vector<8x384xf32>
    %79 = tpu.matmul %78, %3, %cst_29 {dimension_numbers = #tpu.dot_dimension_numbers<[1], [0], [0], [1], [0, 0, 1, 1], [], []>} : vector<8x128xbf16>, vector<128x384xbf16>, vector<8x384xf32> -> vector<8x384xf32>
    %80 = arith.addf %79, %16 : vector<8x384xf32>
    %cst_30 = arith.constant dense<0.000000e+00> : vector<8x384xf32>
    %81 = tpu.matmul %28, %7, %cst_30 {dimension_numbers = #tpu.dot_dimension_numbers<[1], [0], [0], [1], [0, 0, 1, 1], [], []>} : vector<8x128xbf16>, vector<128x384xbf16>, vector<8x384xf32> -> vector<8x384xf32>
    %82 = arith.addf %81, %13 : vector<8x384xf32>
    %83 = vector.extract_strided_slice %54 {offsets = [0, 0], sizes = [8, 256], strides = [1, 1]} : vector<8x384xf32> to vector<8x256xf32>
    %84 = vector.extract_strided_slice %82 {offsets = [0, 0], sizes = [8, 256], strides = [1, 1]} : vector<8x384xf32> to vector<8x256xf32>
    %85 = arith.addf %83, %84 : vector<8x256xf32>
    %86 = arith.negf %85 : vector<8x256xf32>
    %87 = math.exp %86 : vector<8x256xf32>
    %cst_31 = arith.constant 1.000000e+00 : f32
    %88 = vector.broadcast %cst_31 : f32 to vector<8x256xf32>
    %89 = arith.addf %88, %87 : vector<8x256xf32>
    %90 = arith.divf %88, %89 : vector<8x256xf32>
    %91 = vector.extract_strided_slice %90 {offsets = [0, 0], sizes = [8, 128], strides = [1, 1]} : vector<8x256xf32> to vector<8x128xf32>
    %92 = vector.extract_strided_slice %90 {offsets = [0, 128], sizes = [8, 128], strides = [1, 1]} : vector<8x256xf32> to vector<8x128xf32>
    %93 = vector.extract_strided_slice %54 {offsets = [0, 256], sizes = [8, 128], strides = [1, 1]} : vector<8x384xf32> to vector<8x128xf32>
    %94 = vector.extract_strided_slice %82 {offsets = [0, 256], sizes = [8, 128], strides = [1, 1]} : vector<8x384xf32> to vector<8x128xf32>
    %95 = arith.mulf %91, %94 : vector<8x128xf32>
    %96 = arith.addf %93, %95 : vector<8x128xf32>
    %97 = math.tanh %96 : vector<8x128xf32>
    %cst_32 = arith.constant 1.000000e+00 : f32
    %98 = vector.broadcast %cst_32 : f32 to vector<8x128xf32>
    %99 = arith.subf %98, %92 : vector<8x128xf32>
    %100 = arith.mulf %99, %97 : vector<8x128xf32>
    %101 = arith.mulf %92, %26 : vector<8x128xf32>
    %102 = arith.addf %100, %101 : vector<8x128xf32>
    %103 = arith.truncf %102 : vector<8x128xf32> to vector<8x128xbf16>
    %104 = vector.extract_strided_slice %22 {offsets = [16, 0], sizes = [8, 384], strides = [1, 1]} : vector<48x384xf32> to vector<8x384xf32>
    %cst_33 = arith.constant dense<0.000000e+00> : vector<8x384xf32>
    %105 = tpu.matmul %78, %5, %cst_33 {dimension_numbers = #tpu.dot_dimension_numbers<[1], [0], [0], [1], [0, 0, 1, 1], [], []>} : vector<8x128xbf16>, vector<128x384xbf16>, vector<8x384xf32> -> vector<8x384xf32>
    %106 = arith.addf %105, %10 : vector<8x384xf32>
    %107 = vector.extract_strided_slice %104 {offsets = [0, 0], sizes = [8, 256], strides = [1, 1]} : vector<8x384xf32> to vector<8x256xf32>
    %108 = vector.extract_strided_slice %106 {offsets = [0, 0], sizes = [8, 256], strides = [1, 1]} : vector<8x384xf32> to vector<8x256xf32>
    %109 = arith.addf %107, %108 : vector<8x256xf32>
    %110 = arith.negf %109 : vector<8x256xf32>
    %111 = math.exp %110 : vector<8x256xf32>
    %cst_34 = arith.constant 1.000000e+00 : f32
    %112 = vector.broadcast %cst_34 : f32 to vector<8x256xf32>
    %113 = arith.addf %112, %111 : vector<8x256xf32>
    %114 = arith.divf %112, %113 : vector<8x256xf32>
    %115 = vector.extract_strided_slice %114 {offsets = [0, 0], sizes = [8, 128], strides = [1, 1]} : vector<8x256xf32> to vector<8x128xf32>
    %116 = vector.extract_strided_slice %114 {offsets = [0, 128], sizes = [8, 128], strides = [1, 1]} : vector<8x256xf32> to vector<8x128xf32>
    %117 = vector.extract_strided_slice %104 {offsets = [0, 256], sizes = [8, 128], strides = [1, 1]} : vector<8x384xf32> to vector<8x128xf32>
    %118 = vector.extract_strided_slice %106 {offsets = [0, 256], sizes = [8, 128], strides = [1, 1]} : vector<8x384xf32> to vector<8x128xf32>
    %119 = arith.mulf %115, %118 : vector<8x128xf32>
    %120 = arith.addf %117, %119 : vector<8x128xf32>
    %121 = math.tanh %120 : vector<8x128xf32>
    %cst_35 = arith.constant 1.000000e+00 : f32
    %122 = vector.broadcast %cst_35 : f32 to vector<8x128xf32>
    %123 = arith.subf %122, %116 : vector<8x128xf32>
    %124 = arith.mulf %123, %121 : vector<8x128xf32>
    %125 = arith.mulf %116, %77 : vector<8x128xf32>
    %126 = arith.addf %124, %125 : vector<8x128xf32>
    %127 = arith.truncf %126 : vector<8x128xf32> to vector<8x128xbf16>
    %cst_36 = arith.constant dense<0.000000e+00> : vector<8x384xf32>
    %128 = tpu.matmul %127, %3, %cst_36 {dimension_numbers = #tpu.dot_dimension_numbers<[1], [0], [0], [1], [0, 0, 1, 1], [], []>} : vector<8x128xbf16>, vector<128x384xbf16>, vector<8x384xf32> -> vector<8x384xf32>
    %129 = arith.addf %128, %16 : vector<8x384xf32>
    %cst_37 = arith.constant dense<0.000000e+00> : vector<8x384xf32>
    %130 = tpu.matmul %103, %7, %cst_37 {dimension_numbers = #tpu.dot_dimension_numbers<[1], [0], [0], [1], [0, 0, 1, 1], [], []>} : vector<8x128xbf16>, vector<128x384xbf16>, vector<8x384xf32> -> vector<8x384xf32>
    %131 = arith.addf %130, %13 : vector<8x384xf32>
    %132 = vector.extract_strided_slice %80 {offsets = [0, 0], sizes = [8, 256], strides = [1, 1]} : vector<8x384xf32> to vector<8x256xf32>
    %133 = vector.extract_strided_slice %131 {offsets = [0, 0], sizes = [8, 256], strides = [1, 1]} : vector<8x384xf32> to vector<8x256xf32>
    %134 = arith.addf %132, %133 : vector<8x256xf32>
    %135 = arith.negf %134 : vector<8x256xf32>
    %136 = math.exp %135 : vector<8x256xf32>
    %cst_38 = arith.constant 1.000000e+00 : f32
    %137 = vector.broadcast %cst_38 : f32 to vector<8x256xf32>
    %138 = arith.addf %137, %136 : vector<8x256xf32>
    %139 = arith.divf %137, %138 : vector<8x256xf32>
    %140 = vector.extract_strided_slice %139 {offsets = [0, 0], sizes = [8, 128], strides = [1, 1]} : vector<8x256xf32> to vector<8x128xf32>
    %141 = vector.extract_strided_slice %139 {offsets = [0, 128], sizes = [8, 128], strides = [1, 1]} : vector<8x256xf32> to vector<8x128xf32>
    %142 = vector.extract_strided_slice %80 {offsets = [0, 256], sizes = [8, 128], strides = [1, 1]} : vector<8x384xf32> to vector<8x128xf32>
    %143 = vector.extract_strided_slice %131 {offsets = [0, 256], sizes = [8, 128], strides = [1, 1]} : vector<8x384xf32> to vector<8x128xf32>
    %144 = arith.mulf %140, %143 : vector<8x128xf32>
    %145 = arith.addf %142, %144 : vector<8x128xf32>
    %146 = math.tanh %145 : vector<8x128xf32>
    %cst_39 = arith.constant 1.000000e+00 : f32
    %147 = vector.broadcast %cst_39 : f32 to vector<8x128xf32>
    %148 = arith.subf %147, %141 : vector<8x128xf32>
    %149 = arith.mulf %148, %146 : vector<8x128xf32>
    %150 = arith.mulf %141, %102 : vector<8x128xf32>
    %151 = arith.addf %149, %150 : vector<8x128xf32>
    %152 = arith.truncf %151 : vector<8x128xf32> to vector<8x128xbf16>
    %153 = vector.extract_strided_slice %22 {offsets = [24, 0], sizes = [8, 384], strides = [1, 1]} : vector<48x384xf32> to vector<8x384xf32>
    %cst_40 = arith.constant dense<0.000000e+00> : vector<8x384xf32>
    %154 = tpu.matmul %127, %5, %cst_40 {dimension_numbers = #tpu.dot_dimension_numbers<[1], [0], [0], [1], [0, 0, 1, 1], [], []>} : vector<8x128xbf16>, vector<128x384xbf16>, vector<8x384xf32> -> vector<8x384xf32>
    %155 = arith.addf %154, %10 : vector<8x384xf32>
    %156 = vector.extract_strided_slice %153 {offsets = [0, 0], sizes = [8, 256], strides = [1, 1]} : vector<8x384xf32> to vector<8x256xf32>
    %157 = vector.extract_strided_slice %155 {offsets = [0, 0], sizes = [8, 256], strides = [1, 1]} : vector<8x384xf32> to vector<8x256xf32>
    %158 = arith.addf %156, %157 : vector<8x256xf32>
    %159 = arith.negf %158 : vector<8x256xf32>
    %160 = math.exp %159 : vector<8x256xf32>
    %cst_41 = arith.constant 1.000000e+00 : f32
    %161 = vector.broadcast %cst_41 : f32 to vector<8x256xf32>
    %162 = arith.addf %161, %160 : vector<8x256xf32>
    %163 = arith.divf %161, %162 : vector<8x256xf32>
    %164 = vector.extract_strided_slice %163 {offsets = [0, 0], sizes = [8, 128], strides = [1, 1]} : vector<8x256xf32> to vector<8x128xf32>
    %165 = vector.extract_strided_slice %163 {offsets = [0, 128], sizes = [8, 128], strides = [1, 1]} : vector<8x256xf32> to vector<8x128xf32>
    %166 = vector.extract_strided_slice %153 {offsets = [0, 256], sizes = [8, 128], strides = [1, 1]} : vector<8x384xf32> to vector<8x128xf32>
    %167 = vector.extract_strided_slice %155 {offsets = [0, 256], sizes = [8, 128], strides = [1, 1]} : vector<8x384xf32> to vector<8x128xf32>
    %168 = arith.mulf %164, %167 : vector<8x128xf32>
    %169 = arith.addf %166, %168 : vector<8x128xf32>
    %170 = math.tanh %169 : vector<8x128xf32>
    %cst_42 = arith.constant 1.000000e+00 : f32
    %171 = vector.broadcast %cst_42 : f32 to vector<8x128xf32>
    %172 = arith.subf %171, %165 : vector<8x128xf32>
    %173 = arith.mulf %172, %170 : vector<8x128xf32>
    %174 = arith.mulf %165, %126 : vector<8x128xf32>
    %175 = arith.addf %173, %174 : vector<8x128xf32>
    %176 = arith.truncf %175 : vector<8x128xf32> to vector<8x128xbf16>
    %cst_43 = arith.constant dense<0.000000e+00> : vector<8x384xf32>
    %177 = tpu.matmul %176, %3, %cst_43 {dimension_numbers = #tpu.dot_dimension_numbers<[1], [0], [0], [1], [0, 0, 1, 1], [], []>} : vector<8x128xbf16>, vector<128x384xbf16>, vector<8x384xf32> -> vector<8x384xf32>
    %178 = arith.addf %177, %16 : vector<8x384xf32>
    %cst_44 = arith.constant dense<0.000000e+00> : vector<8x384xf32>
    %179 = tpu.matmul %152, %7, %cst_44 {dimension_numbers = #tpu.dot_dimension_numbers<[1], [0], [0], [1], [0, 0, 1, 1], [], []>} : vector<8x128xbf16>, vector<128x384xbf16>, vector<8x384xf32> -> vector<8x384xf32>
    %180 = arith.addf %179, %13 : vector<8x384xf32>
    %181 = vector.extract_strided_slice %129 {offsets = [0, 0], sizes = [8, 256], strides = [1, 1]} : vector<8x384xf32> to vector<8x256xf32>
    %182 = vector.extract_strided_slice %180 {offsets = [0, 0], sizes = [8, 256], strides = [1, 1]} : vector<8x384xf32> to vector<8x256xf32>
    %183 = arith.addf %181, %182 : vector<8x256xf32>
    %184 = arith.negf %183 : vector<8x256xf32>
    %185 = math.exp %184 : vector<8x256xf32>
    %cst_45 = arith.constant 1.000000e+00 : f32
    %186 = vector.broadcast %cst_45 : f32 to vector<8x256xf32>
    %187 = arith.addf %186, %185 : vector<8x256xf32>
    %188 = arith.divf %186, %187 : vector<8x256xf32>
    %189 = vector.extract_strided_slice %188 {offsets = [0, 0], sizes = [8, 128], strides = [1, 1]} : vector<8x256xf32> to vector<8x128xf32>
    %190 = vector.extract_strided_slice %188 {offsets = [0, 128], sizes = [8, 128], strides = [1, 1]} : vector<8x256xf32> to vector<8x128xf32>
    %191 = vector.extract_strided_slice %129 {offsets = [0, 256], sizes = [8, 128], strides = [1, 1]} : vector<8x384xf32> to vector<8x128xf32>
    %192 = vector.extract_strided_slice %180 {offsets = [0, 256], sizes = [8, 128], strides = [1, 1]} : vector<8x384xf32> to vector<8x128xf32>
    %193 = arith.mulf %189, %192 : vector<8x128xf32>
    %194 = arith.addf %191, %193 : vector<8x128xf32>
    %195 = math.tanh %194 : vector<8x128xf32>
    %cst_46 = arith.constant 1.000000e+00 : f32
    %196 = vector.broadcast %cst_46 : f32 to vector<8x128xf32>
    %197 = arith.subf %196, %190 : vector<8x128xf32>
    %198 = arith.mulf %197, %195 : vector<8x128xf32>
    %199 = arith.mulf %190, %151 : vector<8x128xf32>
    %200 = arith.addf %198, %199 : vector<8x128xf32>
    %201 = arith.truncf %200 : vector<8x128xf32> to vector<8x128xbf16>
    %202 = vector.extract_strided_slice %22 {offsets = [32, 0], sizes = [8, 384], strides = [1, 1]} : vector<48x384xf32> to vector<8x384xf32>
    %cst_47 = arith.constant dense<0.000000e+00> : vector<8x384xf32>
    %203 = tpu.matmul %176, %5, %cst_47 {dimension_numbers = #tpu.dot_dimension_numbers<[1], [0], [0], [1], [0, 0, 1, 1], [], []>} : vector<8x128xbf16>, vector<128x384xbf16>, vector<8x384xf32> -> vector<8x384xf32>
    %204 = arith.addf %203, %10 : vector<8x384xf32>
    %205 = vector.extract_strided_slice %202 {offsets = [0, 0], sizes = [8, 256], strides = [1, 1]} : vector<8x384xf32> to vector<8x256xf32>
    %206 = vector.extract_strided_slice %204 {offsets = [0, 0], sizes = [8, 256], strides = [1, 1]} : vector<8x384xf32> to vector<8x256xf32>
    %207 = arith.addf %205, %206 : vector<8x256xf32>
    %208 = arith.negf %207 : vector<8x256xf32>
    %209 = math.exp %208 : vector<8x256xf32>
    %cst_48 = arith.constant 1.000000e+00 : f32
    %210 = vector.broadcast %cst_48 : f32 to vector<8x256xf32>
    %211 = arith.addf %210, %209 : vector<8x256xf32>
    %212 = arith.divf %210, %211 : vector<8x256xf32>
    %213 = vector.extract_strided_slice %212 {offsets = [0, 0], sizes = [8, 128], strides = [1, 1]} : vector<8x256xf32> to vector<8x128xf32>
    %214 = vector.extract_strided_slice %212 {offsets = [0, 128], sizes = [8, 128], strides = [1, 1]} : vector<8x256xf32> to vector<8x128xf32>
    %215 = vector.extract_strided_slice %202 {offsets = [0, 256], sizes = [8, 128], strides = [1, 1]} : vector<8x384xf32> to vector<8x128xf32>
    %216 = vector.extract_strided_slice %204 {offsets = [0, 256], sizes = [8, 128], strides = [1, 1]} : vector<8x384xf32> to vector<8x128xf32>
    %217 = arith.mulf %213, %216 : vector<8x128xf32>
    %218 = arith.addf %215, %217 : vector<8x128xf32>
    %219 = math.tanh %218 : vector<8x128xf32>
    %cst_49 = arith.constant 1.000000e+00 : f32
    %220 = vector.broadcast %cst_49 : f32 to vector<8x128xf32>
    %221 = arith.subf %220, %214 : vector<8x128xf32>
    %222 = arith.mulf %221, %219 : vector<8x128xf32>
    %223 = arith.mulf %214, %175 : vector<8x128xf32>
    %224 = arith.addf %222, %223 : vector<8x128xf32>
    %225 = arith.truncf %224 : vector<8x128xf32> to vector<8x128xbf16>
    %cst_50 = arith.constant dense<0.000000e+00> : vector<8x384xf32>
    %226 = tpu.matmul %225, %3, %cst_50 {dimension_numbers = #tpu.dot_dimension_numbers<[1], [0], [0], [1], [0, 0, 1, 1], [], []>} : vector<8x128xbf16>, vector<128x384xbf16>, vector<8x384xf32> -> vector<8x384xf32>
    %227 = arith.addf %226, %16 : vector<8x384xf32>
    %cst_51 = arith.constant dense<0.000000e+00> : vector<8x384xf32>
    %228 = tpu.matmul %201, %7, %cst_51 {dimension_numbers = #tpu.dot_dimension_numbers<[1], [0], [0], [1], [0, 0, 1, 1], [], []>} : vector<8x128xbf16>, vector<128x384xbf16>, vector<8x384xf32> -> vector<8x384xf32>
    %229 = arith.addf %228, %13 : vector<8x384xf32>
    %230 = vector.extract_strided_slice %178 {offsets = [0, 0], sizes = [8, 256], strides = [1, 1]} : vector<8x384xf32> to vector<8x256xf32>
    %231 = vector.extract_strided_slice %229 {offsets = [0, 0], sizes = [8, 256], strides = [1, 1]} : vector<8x384xf32> to vector<8x256xf32>
    %232 = arith.addf %230, %231 : vector<8x256xf32>
    %233 = arith.negf %232 : vector<8x256xf32>
    %234 = math.exp %233 : vector<8x256xf32>
    %cst_52 = arith.constant 1.000000e+00 : f32
    %235 = vector.broadcast %cst_52 : f32 to vector<8x256xf32>
    %236 = arith.addf %235, %234 : vector<8x256xf32>
    %237 = arith.divf %235, %236 : vector<8x256xf32>
    %238 = vector.extract_strided_slice %237 {offsets = [0, 0], sizes = [8, 128], strides = [1, 1]} : vector<8x256xf32> to vector<8x128xf32>
    %239 = vector.extract_strided_slice %237 {offsets = [0, 128], sizes = [8, 128], strides = [1, 1]} : vector<8x256xf32> to vector<8x128xf32>
    %240 = vector.extract_strided_slice %178 {offsets = [0, 256], sizes = [8, 128], strides = [1, 1]} : vector<8x384xf32> to vector<8x128xf32>
    %241 = vector.extract_strided_slice %229 {offsets = [0, 256], sizes = [8, 128], strides = [1, 1]} : vector<8x384xf32> to vector<8x128xf32>
    %242 = arith.mulf %238, %241 : vector<8x128xf32>
    %243 = arith.addf %240, %242 : vector<8x128xf32>
    %244 = math.tanh %243 : vector<8x128xf32>
    %cst_53 = arith.constant 1.000000e+00 : f32
    %245 = vector.broadcast %cst_53 : f32 to vector<8x128xf32>
    %246 = arith.subf %245, %239 : vector<8x128xf32>
    %247 = arith.mulf %246, %244 : vector<8x128xf32>
    %248 = arith.mulf %239, %200 : vector<8x128xf32>
    %249 = arith.addf %247, %248 : vector<8x128xf32>
    %250 = arith.truncf %249 : vector<8x128xf32> to vector<8x128xbf16>
    %251 = vector.extract_strided_slice %22 {offsets = [40, 0], sizes = [8, 384], strides = [1, 1]} : vector<48x384xf32> to vector<8x384xf32>
    %cst_54 = arith.constant dense<0.000000e+00> : vector<8x384xf32>
    %252 = tpu.matmul %225, %5, %cst_54 {dimension_numbers = #tpu.dot_dimension_numbers<[1], [0], [0], [1], [0, 0, 1, 1], [], []>} : vector<8x128xbf16>, vector<128x384xbf16>, vector<8x384xf32> -> vector<8x384xf32>
    %253 = arith.addf %252, %10 : vector<8x384xf32>
    %254 = vector.extract_strided_slice %251 {offsets = [0, 0], sizes = [8, 256], strides = [1, 1]} : vector<8x384xf32> to vector<8x256xf32>
    %255 = vector.extract_strided_slice %253 {offsets = [0, 0], sizes = [8, 256], strides = [1, 1]} : vector<8x384xf32> to vector<8x256xf32>
    %256 = arith.addf %254, %255 : vector<8x256xf32>
    %257 = arith.negf %256 : vector<8x256xf32>
    %258 = math.exp %257 : vector<8x256xf32>
    %cst_55 = arith.constant 1.000000e+00 : f32
    %259 = vector.broadcast %cst_55 : f32 to vector<8x256xf32>
    %260 = arith.addf %259, %258 : vector<8x256xf32>
    %261 = arith.divf %259, %260 : vector<8x256xf32>
    %262 = vector.extract_strided_slice %261 {offsets = [0, 0], sizes = [8, 128], strides = [1, 1]} : vector<8x256xf32> to vector<8x128xf32>
    %263 = vector.extract_strided_slice %261 {offsets = [0, 128], sizes = [8, 128], strides = [1, 1]} : vector<8x256xf32> to vector<8x128xf32>
    %264 = vector.extract_strided_slice %251 {offsets = [0, 256], sizes = [8, 128], strides = [1, 1]} : vector<8x384xf32> to vector<8x128xf32>
    %265 = vector.extract_strided_slice %253 {offsets = [0, 256], sizes = [8, 128], strides = [1, 1]} : vector<8x384xf32> to vector<8x128xf32>
    %266 = arith.mulf %262, %265 : vector<8x128xf32>
    %267 = arith.addf %264, %266 : vector<8x128xf32>
    %268 = math.tanh %267 : vector<8x128xf32>
    %cst_56 = arith.constant 1.000000e+00 : f32
    %269 = vector.broadcast %cst_56 : f32 to vector<8x128xf32>
    %270 = arith.subf %269, %263 : vector<8x128xf32>
    %271 = arith.mulf %270, %268 : vector<8x128xf32>
    %272 = arith.mulf %263, %224 : vector<8x128xf32>
    %273 = arith.addf %271, %272 : vector<8x128xf32>
    %274 = arith.truncf %273 : vector<8x128xf32> to vector<8x128xbf16>
    %cst_57 = arith.constant dense<0.000000e+00> : vector<8x384xf32>
    %275 = tpu.matmul %274, %3, %cst_57 {dimension_numbers = #tpu.dot_dimension_numbers<[1], [0], [0], [1], [0, 0, 1, 1], [], []>} : vector<8x128xbf16>, vector<128x384xbf16>, vector<8x384xf32> -> vector<8x384xf32>
    %276 = arith.addf %275, %16 : vector<8x384xf32>
    %cst_58 = arith.constant dense<0.000000e+00> : vector<8x384xf32>
    %277 = tpu.matmul %250, %7, %cst_58 {dimension_numbers = #tpu.dot_dimension_numbers<[1], [0], [0], [1], [0, 0, 1, 1], [], []>} : vector<8x128xbf16>, vector<128x384xbf16>, vector<8x384xf32> -> vector<8x384xf32>
    %278 = arith.addf %277, %13 : vector<8x384xf32>
    %279 = vector.extract_strided_slice %227 {offsets = [0, 0], sizes = [8, 256], strides = [1, 1]} : vector<8x384xf32> to vector<8x256xf32>
    %280 = vector.extract_strided_slice %278 {offsets = [0, 0], sizes = [8, 256], strides = [1, 1]} : vector<8x384xf32> to vector<8x256xf32>
    %281 = arith.addf %279, %280 : vector<8x256xf32>
    %282 = arith.negf %281 : vector<8x256xf32>
    %283 = math.exp %282 : vector<8x256xf32>
    %cst_59 = arith.constant 1.000000e+00 : f32
    %284 = vector.broadcast %cst_59 : f32 to vector<8x256xf32>
    %285 = arith.addf %284, %283 : vector<8x256xf32>
    %286 = arith.divf %284, %285 : vector<8x256xf32>
    %287 = vector.extract_strided_slice %286 {offsets = [0, 0], sizes = [8, 128], strides = [1, 1]} : vector<8x256xf32> to vector<8x128xf32>
    %288 = vector.extract_strided_slice %286 {offsets = [0, 128], sizes = [8, 128], strides = [1, 1]} : vector<8x256xf32> to vector<8x128xf32>
    %289 = vector.extract_strided_slice %227 {offsets = [0, 256], sizes = [8, 128], strides = [1, 1]} : vector<8x384xf32> to vector<8x128xf32>
    %290 = vector.extract_strided_slice %278 {offsets = [0, 256], sizes = [8, 128], strides = [1, 1]} : vector<8x384xf32> to vector<8x128xf32>
    %291 = arith.mulf %287, %290 : vector<8x128xf32>
    %292 = arith.addf %289, %291 : vector<8x128xf32>
    %293 = math.tanh %292 : vector<8x128xf32>
    %cst_60 = arith.constant 1.000000e+00 : f32
    %294 = vector.broadcast %cst_60 : f32 to vector<8x128xf32>
    %295 = arith.subf %294, %288 : vector<8x128xf32>
    %296 = arith.mulf %295, %293 : vector<8x128xf32>
    %297 = arith.mulf %288, %249 : vector<8x128xf32>
    %298 = arith.addf %296, %297 : vector<8x128xf32>
    %299 = arith.truncf %298 : vector<8x128xf32> to vector<8x128xbf16>
    %cst_61 = arith.constant dense<0.000000e+00> : vector<8x384xf32>
    %300 = tpu.matmul %299, %7, %cst_61 {dimension_numbers = #tpu.dot_dimension_numbers<[1], [0], [0], [1], [0, 0, 1, 1], [], []>} : vector<8x128xbf16>, vector<128x384xbf16>, vector<8x384xf32> -> vector<8x384xf32>
    %301 = arith.addf %300, %13 : vector<8x384xf32>
    %302 = vector.extract_strided_slice %276 {offsets = [0, 0], sizes = [8, 256], strides = [1, 1]} : vector<8x384xf32> to vector<8x256xf32>
    %303 = vector.extract_strided_slice %301 {offsets = [0, 0], sizes = [8, 256], strides = [1, 1]} : vector<8x384xf32> to vector<8x256xf32>
    %304 = arith.addf %302, %303 : vector<8x256xf32>
    %305 = arith.negf %304 : vector<8x256xf32>
    %306 = math.exp %305 : vector<8x256xf32>
    %cst_62 = arith.constant 1.000000e+00 : f32
    %307 = vector.broadcast %cst_62 : f32 to vector<8x256xf32>
    %308 = arith.addf %307, %306 : vector<8x256xf32>
    %309 = arith.divf %307, %308 : vector<8x256xf32>
    %310 = vector.extract_strided_slice %309 {offsets = [0, 0], sizes = [8, 128], strides = [1, 1]} : vector<8x256xf32> to vector<8x128xf32>
    %311 = vector.extract_strided_slice %309 {offsets = [0, 128], sizes = [8, 128], strides = [1, 1]} : vector<8x256xf32> to vector<8x128xf32>
    %312 = vector.extract_strided_slice %276 {offsets = [0, 256], sizes = [8, 128], strides = [1, 1]} : vector<8x384xf32> to vector<8x128xf32>
    %313 = vector.extract_strided_slice %301 {offsets = [0, 256], sizes = [8, 128], strides = [1, 1]} : vector<8x384xf32> to vector<8x128xf32>
    %314 = arith.mulf %310, %313 : vector<8x128xf32>
    %315 = arith.addf %312, %314 : vector<8x128xf32>
    %316 = math.tanh %315 : vector<8x128xf32>
    %cst_63 = arith.constant 1.000000e+00 : f32
    %317 = vector.broadcast %cst_63 : f32 to vector<8x128xf32>
    %318 = arith.subf %317, %311 : vector<8x128xf32>
    %319 = arith.mulf %318, %316 : vector<8x128xf32>
    %320 = arith.mulf %311, %298 : vector<8x128xf32>
    %321 = arith.addf %319, %320 : vector<8x128xf32>
    %c0_64 = arith.constant 0 : index
    %c0_65 = arith.constant 0 : index
    %c0_66 = arith.constant 0 : index
    %322 = vector.load %arg13[%c0_64, %c0_65, %c0_66] : memref<2x8x128xf32, #tpu.memory_space<vmem>>, vector<1x8x128xf32>
    %323 = vector.shape_cast %322 : vector<1x8x128xf32> to vector<8x128xf32>
    %324 = vector.shape_cast %273 : vector<8x128xf32> to vector<1x8x128xf32>
    tpu.vector_store %arg13[%c0_64, %c0_65, %c0_66], %324 {strides = array<i32>} : memref<2x8x128xf32, #tpu.memory_space<vmem>>, vector<1x8x128xf32>,
    %c1_67 = arith.constant 1 : index
    %c0_68 = arith.constant 0 : index
    %c0_69 = arith.constant 0 : index
    %325 = vector.load %arg13[%c1_67, %c0_68, %c0_69] : memref<2x8x128xf32, #tpu.memory_space<vmem>>, vector<1x8x128xf32>
    %326 = vector.shape_cast %325 : vector<1x8x128xf32> to vector<8x128xf32>
    %327 = vector.shape_cast %321 : vector<8x128xf32> to vector<1x8x128xf32>
    tpu.vector_store %arg13[%c1_67, %c0_68, %c0_69], %327 {strides = array<i32>} : memref<2x8x128xf32, #tpu.memory_space<vmem>>, vector<1x8x128xf32>,
    %cst_70 = arith.constant 0.000000e+00 : f32
    %328 = vector.broadcast %cst_70 : f32 to vector<8x128xf32>
    %329 = arith.maximumf %321, %328 : vector<8x128xf32>
    %330 = arith.truncf %329 : vector<8x128xf32> to vector<8x128xbf16>
    %c0_71 = arith.constant 0 : index
    %c0_72 = arith.constant 0 : index
    %331 = vector.load %arg9[%c0_71, %c0_72] : memref<128x128xf32, #tpu.memory_space<vmem>>, vector<128x128xf32>
    %332 = arith.truncf %331 : vector<128x128xf32> to vector<128x128xbf16>
    %cst_73 = arith.constant dense<0.000000e+00> : vector<8x128xf32>
    %333 = tpu.matmul %330, %332, %cst_73 {dimension_numbers = #tpu.dot_dimension_numbers<[1], [0], [0], [1], [0, 0, 1, 1], [], []>} : vector<8x128xbf16>, vector<128x128xbf16>, vector<8x128xf32> -> vector<8x128xf32>
    %c0_74 = arith.constant 0 : index
    %c0_75 = arith.constant 0 : index
    %334 = vector.load %arg10[%c0_74, %c0_75] : memref<1x128xf32, #tpu.memory_space<vmem>>, vector<1x128xf32>
    %335 = vector.broadcast %334 : vector<1x128xf32> to vector<8x128xf32>
    %336 = arith.addf %333, %335 : vector<8x128xf32>
    %c0_76 = arith.constant 0 : index
    %c0_77 = arith.constant 0 : index
    %337 = vector.load %arg12[%c0_76, %c0_77] : memref<8x128xf32, #tpu.memory_space<vmem>>, vector<8x128xf32>
    tpu.vector_store %arg12[%c0_76, %c0_77], %336 {strides = array<i32>} : memref<8x128xf32, #tpu.memory_space<vmem>>, vector<8x128xf32>,
    return
  }
}

</mosaic_0001>

<bundles_post_ra>
// kernel: grunet_forward.1
= control target key start
LH: loop header
LB: loop body
LE: loop exit
PB: predicated region body
PF: predicated region fallthrough
CT: control target
= control target key end

     0   :  { %19 = vsyncpa [#allocation3], 0  ;;  %v4798_v7 = vmov 0   ;;  %vm348_vm0 = vcmask 130048   ;;  %v4800_v27 = vmov 0.0   ;;  %s4784_s0 = inlined_call_operand.vmem [shape: f32[48,16], index: 0, kind: input, shape index: {}]   ;;  %s4785_s1 = inlined_call_operand.vmem [shape: f32[16,384], index: 1, kind: input, shape index: {}]   ;;  %s4786_s2 = inlined_call_operand.vmem [shape: f32[128,384], index: 2, kind: input, shape index: {}]   ;;  %s4787_s3 = inlined_call_operand.vmem [shape: f32[1,384], index: 3, kind: input, shape index: {}]   ;;  %s4788_s4 = inlined_call_operand.vmem [shape: f32[1,384], index: 4, kind: input, shape index: {}]   ;;  %s4789_s5 = inlined_call_operand.vmem [shape: f32[128,384], index: 5, kind: input, shape index: {}]   ;;  %s4790_s6 = inlined_call_operand.vmem [shape: f32[128,384], index: 6, kind: input, shape index: {}]   ;;  %s4791_s7 = inlined_call_operand.vmem [shape: f32[1,384], index: 7, kind: input, shape index: {}]   ;;  %s4792_s8 = inlined_call_operand.vmem [shape: f32[1,384], index: 8, kind: input, shape index: {}]   ;;  %s4793_s9 = inlined_call_operand.vmem [shape: f32[128,128], index: 9, kind: input, shape index: {}]   ;;  %s4794_s10 = inlined_call_operand.vmem [shape: f32[1,128], index: 10, kind: input, shape index: {}]   ;;  %s4795_s11 = inlined_call_operand.vmem [shape: f32[2,8,128], index: 11, kind: input, shape index: {}]   ;;  %s4796_s12 = inlined_call_operand.hbm [shape: f32[8,128], index: 12, kind: output, shape index: {0}]   ;;  %s4797_s13 = inlined_call_operand.hbm [shape: f32[2,8,128], index: 13, kind: output, shape index: {1}]  }
   0x1   :  { %v170_v0 = vld [vmem:[%s4786_s2 + $0x158] sm:$0xff]  ;;  %v173_v1 = vld [vmem:[%s4786_s2 + $0x170] sm:$0xff]  ;;  %v47_v2 = vld [vmem:[%s4785_s1 + $0x8] sm:$0xff]  ;;  %390 = vmatprep.mubr.bf16.mxu1 %v4798_v7  ;;  %515 = vmatprep.mubr.bf16.mxu0 %v4798_v7 }
   0x2   :  { %v3169_v3 = vpack.c.bf16 %v173_v1, %v170_v0  ;;  %v50_v4 = vld [vmem:[%s4785_s1 + $0x20] sm:$0xff]  ;;  %v169_v5 = vld [vmem:[%s4786_s2 + $0x150] sm:$0xff]  ;;  %v172_v6 = vld [vmem:[%s4786_s2 + $0x168] sm:$0xff] }
   0x3   :  { %v53_v8 = vpack.c.bf16 %v50_v4, %v47_v2  ;;  %v3182_v9 = vpack.c.bf16 %v172_v6, %v169_v5  ;;  %v46_v10 = vld [vmem:[%s4785_s1] sm:$0xff]  ;;  %v49_v11 = vld [vmem:[%s4785_s1 + $0x18] sm:$0xff]  ;;  %v164_v12 = vld [vmem:[%s4786_s2 + $0x128] sm:$0xff] }
   0x4   :  { %4921 = vst [vmem:[#allocation8_spill] sm:$0xff] %v3169_v3  ;;  %483 = vmatprep.subr.bf16.mxu0 %v3169_v3  ;;  %v52_v13 = vpack.c.bf16 %v49_v11, %v46_v10  ;;  %v167_v14 = vld [vmem:[%s4786_s2 + $0x140] sm:$0xff]  ;;  %v323_v16 = vld [vmem:[%s4784_s0 + $0x8] sm:$0xff]  ;;  %v166_v20 = vld [vmem:[%s4786_s2 + $0x138] sm:$0xff] }
   0x5   :  { %v322_v15 = vld [vmem:[%s4784_s0] sm:$0xff]  ;;  %372 = vmatprep.subr.bf16.mxu1 %v53_v8  ;;  %484 = vmatpush1.bf16.msra.mxu0 %v3182_v9  ;;  %v3204_v17 = vpack.c.bf16 %v167_v14, %v164_v12  ;;  %v158_v21 = vld [vmem:[%s4786_s2 + $0xf8] sm:$0xff]  ;;  %v161_v23 = vld [vmem:[%s4786_s2 + $0x110] sm:$0xff] }
   0x6   :  { %v3206_v18 = vpack.c.bf16 %v323_v16, %v322_v15  ;;  %v163_v19 = vld [vmem:[%s4786_s2 + $0x120] sm:$0xff]  ;;  %373 = vmatpush1.bf16.msra.mxu1 %v52_v13  ;;  %v157_v24 = vld [vmem:[%s4786_s2 + $0xf0] sm:$0xff]  ;;  %v160_v25 = vld [vmem:[%s4786_s2 + $0x108] sm:$0xff]  ;;  %v3229_v26 = vpack.c.bf16 %v161_v23, %v158_v21 }
   0x7   :  { %v3217_v22 = vpack.c.bf16 %v166_v20, %v163_v19  ;;  %485 = vmatprep.subr.bf16.mxu0 %v3204_v17  ;;  %2518 = vmatprep.subr.bf16.mxu1 %v4800_v27  ;;  %v48_v28 = vld [vmem:[%s4785_s1 + $0x10] sm:$0xff]  ;;  %v51_v29 = vld [vmem:[%s4785_s1 + $0x28] sm:$0xff]  ;;  %v155_v32 = vld [vmem:[%s4786_s2 + $0xe0] sm:$0xff]  ;;  %v3247_v33 = vpack.c.bf16 %v160_v25, %v157_v24 }
   0x8   :  { %v152_v30 = vld [vmem:[%s4786_s2 + $0xc8] sm:$0xff]  ;;  %v54_v31 = vpack.c.bf16 %v51_v29, %v48_v28  ;;  %v324_v34 = vld [vmem:[%s4784_s0 + $0x10] sm:$0xff]  ;;  %v325_v36 = vld [vmem:[%s4784_s0 + $0x18] sm:$0xff] }
   0x9   :  { %2311 = vmatmul.mubr.msk.bf16.vlgmr.msra.gmra.mxu1 %vm348_vm0, %v3206_v18  ;;  %486 = vmatpush1.bf16.msra.mxu0 %v3217_v22  ;;  %v3253_v35 = vpack.c.bf16 %v155_v32, %v152_v30  ;;  %v151_v37 = vld [vmem:[%s4786_s2 + $0xc0] sm:$0xff]  ;;  %v154_v38 = vld [vmem:[%s4786_s2 + $0xd8] sm:$0xff]  ;;  %v149_v40 = vld [vmem:[%s4786_s2 + $0xb0] sm:$0xff]  ;;  %v3273_v41 = vpack.c.bf16 %v325_v36, %v324_v34 }
   0xa   :  { %487 = vmatprep.subr.bf16.mxu0 %v3229_v26  ;;  %2519 = vmatpush3.bf16.msra.mxu1 %v54_v31  ;;  %v146_v39 = vld [vmem:[%s4786_s2 + $0x98] sm:$0xff]  ;;  %v3275_v42 = vpack.c.bf16 %v154_v38, %v151_v37  ;;  %v145_v44 = vld [vmem:[%s4786_s2 + $0x90] sm:$0xff]  ;;  %v148_v45 = vld [vmem:[%s4786_s2 + $0xa8] sm:$0xff] }
   0xb   :  { %400 = vmatprep.mubr.bf16.mxu1 %v4798_v7  ;;  %2532 = vmatprep.subr.bf16.mxu1 %v4800_v27  ;;  %v3278_v43 = vpack.c.bf16 %v149_v40, %v146_v39  ;;  %v140_v46 = vld [vmem:[%s4786_s2 + $0x68] sm:$0xff]  ;;  %v143_v47 = vld [vmem:[%s4786_s2 + $0x80] sm:$0xff]  ;;  %v3295_v48 = vpack.c.bf16 %v148_v45, %v145_v44  ;;  %v142_v53 = vld [vmem:[%s4786_s2 + $0x78] sm:$0xff] }
   0xc   :  { %v326_v49 = vld [vmem:[%s4784_s0 + $0x20] sm:$0xff]  ;;  %v3302_v50 = vpack.c.bf16 %v143_v47, %v140_v46  ;;  %v327_v51 = vld [vmem:[%s4784_s0 + $0x28] sm:$0xff]  ;;  %v134_v54 = vld [vmem:[%s4786_s2 + $0x38] sm:$0xff] }
   0xd   :  { %488 = vmatpush1.bf16.msra.mxu0 %v3247_v33  ;;  %4922 = vst [vmem:[#allocation9_spill] sm:$0xff] %v3278_v43  ;;  %4923 = vst [vmem:[#allocation10_spill] sm:$0xff] %v3295_v48  ;;  %v139_v52 = vld [vmem:[%s4786_s2 + $0x60] sm:$0xff]  ;;  %v137_v55 = vld [vmem:[%s4786_s2 + $0x50] sm:$0xff]  ;;  %v330_v56 = vpack.c.bf16 %v327_v51, %v326_v49 }
   0xe   :  { %489 = vmatprep.subr.bf16.mxu0 %v3253_v35  ;;  %4924 = vst [vmem:[#allocation11_spill] sm:$0xff] %v3302_v50  ;;  %v3320_v57 = vpack.c.bf16 %v142_v53, %v139_v52 }
  0x10   :  { %4925 = vst [vmem:[#allocation12_spill] sm:$0xff] %v3320_v57 }
  0x11   :  { %2312 = vmatmul.mubr.msk.bf16.gmra.mxu1 %vm348_vm0, %v3273_v41  ;;  %490 = vmatpush1.bf16.msra.mxu0 %v3275_v42 }
  0x12   :  { %491 = vmatprep.subr.bf16.mxu0 %v3278_v43  ;;  %410 = vmatprep.mubr.bf16.mxu1 %v4798_v7 }
  0x15   :  { %492 = vmatpush1.bf16.msra.mxu0 %v3295_v48 }
  0x16   :  { %20 = vsyncpa [#allocation5], 0  ;;  %493 = vmatprep.subr.bf16.mxu0 %v3302_v50  ;;  %v3323_v58 = vpack.c.bf16 %v137_v55, %v134_v54  ;;  %v133_v59 = vld [vmem:[%s4786_s2 + $0x30] sm:$0xff]  ;;  %v136_v60 = vld [vmem:[%s4786_s2 + $0x48] sm:$0xff]  ;;  %vm3085_vm1 = vmmov 0  }
  0x17   :  { %v128_v61 = vld [vmem:[%s4786_s2 + $0x8] sm:$0xff]  ;;  %v131_v62 = vld [vmem:[%s4786_s2 + $0x20] sm:$0xff]  ;;  %v3339_v63 = vpack.c.bf16 %v136_v60, %v133_v59  ;;  %v130_v2 = vld [vmem:[%s4786_s2 + $0x18] sm:$0xff] }
  0x18   :  { %4926 = vst [vmem:[#allocation13_spill] sm:$0xff] %v3323_v58  ;;  %v3344_v0 = vpack.c.bf16 %v131_v62, %v128_v61  ;;  %v127_v1 = vld [vmem:[%s4786_s2] sm:$0xff]  ;;  %v174_v5 = vld [vmem:[%s4786_s2 + $0x178] sm:$0xff]  ;;  %v165_v11 = vld [vmem:[%s4786_s2 + $0x130] sm:$0xff] }
  0x19   :  { %2313 = vmatmul.mubr.msk.bf16.gmra.mxu1 %vm348_vm0, %v330_v56  ;;  %494 = vmatpush1.bf16.msra.mxu0 %v3320_v57  ;;  %4927 = vst [vmem:[#allocation14_spill] sm:$0xff] %v3339_v63  ;;  %v171_v4 = vld [vmem:[%s4786_s2 + $0x160] sm:$0xff]  ;;  %v3359_v6 = vpack.c.bf16 %v130_v2, %v127_v1  ;;  %v168_v12 = vld [vmem:[%s4786_s2 + $0x148] sm:$0xff]  ;;  %v162_v16 = vld [vmem:[%s4786_s2 + $0x118] sm:$0xff] }
  0x1a   :  { %495 = vmatprep.subr.bf16.mxu0 %v3323_v58  ;;  %2520 = vmatprep.mubr.msk.bf16.mxu1 %vm3085_vm1, %v4800_v27  ;;  %4928 = vst [vmem:[#allocation15_spill] sm:$0xff] %v3344_v0  ;;  %v3364_v8 = vld [vmem:[%s4795_s11] sm:$0xff]  ;;  %v3367_v10 = vpack.c.bf16 %v174_v5, %v171_v4  ;;  %v3381_v14 = vpack.c.bf16 %v168_v12, %v165_v11  ;;  %v153_v19 = vld [vmem:[%s4786_s2 + $0xd0] sm:$0xff]  ;;  %v156_v20 = vld [vmem:[%s4786_s2 + $0xe8] sm:$0xff] }
  0x1b   :  { %4929 = vst [vmem:[#allocation16_spill] sm:$0xff] %v3359_v6  ;;  %v481_v13 = vpack.c.bf16 %v3364_v8, %v3364_v8  ;;  %v159_v15 = vld [vmem:[%s4786_s2 + $0x100] sm:$0xff]  ;;  %v3406_v21 = vpack.c.bf16 %v156_v20, %v153_v19  ;;  %v150_v24 = vld [vmem:[%s4786_s2 + $0xb8] sm:$0xff]  ;;  %v141_v28 = vld [vmem:[%s4786_s2 + $0x70] sm:$0xff] }
  0x1c   :  { %v147_v23 = vld [vmem:[%s4786_s2 + $0xa0] sm:$0xff]  ;;  %v144_v29 = vld [vmem:[%s4786_s2 + $0x88] sm:$0xff]  ;;  %v138_v32 = vld [vmem:[%s4786_s2 + $0x58] sm:$0xff] }
  0x1d   :  { %496 = vmatpush1.bf16.msra.mxu0 %v3339_v63  ;;  %4930 = vst [vmem:[#allocation17_spill] sm:$0xff] %v3406_v21  ;;  %v3418_v25 = vpack.c.bf16 %v150_v24, %v147_v23  ;;  %v3429_v30 = vpack.c.bf16 %v144_v29, %v141_v28  ;;  %v135_v31 = vld [vmem:[%s4786_s2 + $0x40] sm:$0xff]  ;;  %v129_v36 = vld [vmem:[%s4786_s2 + $0x10] sm:$0xff]  ;;  %v132_v37 = vld [vmem:[%s4786_s2 + $0x28] sm:$0xff] }
  0x1e   :  { %497 = vmatprep.subr.bf16.mxu0 %v3344_v0  ;;  %v3441_v34 = vpack.c.bf16 %v138_v32, %v135_v31  ;;  %v3451_v38 = vpack.c.bf16 %v132_v37, %v129_v36  ;;  %v98_v39 = vld [vmem:[%s4789_s5 + $0x158] sm:$0xff]  ;;  %v101_v40 = vld [vmem:[%s4789_s5 + $0x170] sm:$0xff]  ;;  %v100_v45 = vld [vmem:[%s4789_s5 + $0x168] sm:$0xff] }
  0x1f   :  { %4931 = vst [vmem:[#allocation18_spill] sm:$0xff] %v3418_v25  ;;  %4932 = vst [vmem:[#allocation19_spill] sm:$0xff] %v3429_v30  ;;  %v97_v44 = vld [vmem:[%s4789_s5 + $0x150] sm:$0xff]  ;;  %v99_v46 = vld [vmem:[%s4789_s5 + $0x160] sm:$0xff] }
  0x20   :  { %4933 = vst [vmem:[#allocation20_spill] sm:$0xff] %v3441_v34  ;;  %4934 = vst [vmem:[#allocation21_spill] sm:$0xff] %v3451_v38  ;;  %v3475_v47 = vpack.c.bf16 %v100_v45, %v97_v44  ;;  %v102_v49 = vld [vmem:[%s4789_s5 + $0x178] sm:$0xff]  ;;  %v92_v52 = vld [vmem:[%s4789_s5 + $0x128] sm:$0xff] }
  0x21   :  { %2521 = vmatmul.mubr.msk.bf16.vlgmr.msra.gmra.mxu1 %vm348_vm0, %v3206_v18  ;;  %498 = vmatpush1.bf16.msra.mxu0 %v3359_v6  ;;  %v3394_v18 = vpack.c.bf16 %v162_v16, %v159_v15  ;;  %v3481_v51 = vpack.c.bf16 %v102_v49, %v99_v46  ;;  %v95_v53 = vld [vmem:[%s4789_s5 + $0x140] sm:$0xff]  ;;  %v93_v59 = vld [vmem:[%s4789_s5 + $0x130] sm:$0xff]  ;;  %v96_v61 = vld [vmem:[%s4789_s5 + $0x148] sm:$0xff] }
  0x22   :  { %2533 = vmatpush3.bf16.msra.mxu1 %v3367_v10  ;;  %2524 = vmatprep.mubr.msk.bf16.mxu1 %vm3085_vm1, %v4800_v27  ;;  %4936 = vst [vmem:[#allocation23_spill] sm:$0xff] %v3475_v47  ;;  %v3491_v54 = vpack.c.bf16 %v95_v53, %v92_v52  ;;  %v91_v55 = vld [vmem:[%s4789_s5 + $0x120] sm:$0xff]  ;;  %v3509_v62 = vpack.c.bf16 %v96_v61, %v93_v59  ;;  %v86_v1 = vld [vmem:[%s4789_s5 + $0xf8] sm:$0xff]  ;;  %v89_v2 = vld [vmem:[%s4789_s5 + $0x110] sm:$0xff] }
  0x23   :  { %2534 = vmatprep.subr.bf16.mxu1 %v4800_v27  ;;  %4937 = vst [vmem:[#allocation24_spill] sm:$0xff] %v3481_v51  ;;  %v3519_v4 = vpack.c.bf16 %v89_v2, %v86_v1  ;;  %v85_v5 = vld [vmem:[%s4789_s5 + $0xf0] sm:$0xff]  ;;  %v88_v11 = vld [vmem:[%s4789_s5 + $0x108] sm:$0xff]  ;;  %v87_v12 = vld [vmem:[%s4789_s5 + $0x100] sm:$0xff] }
  0x24   :  { %516 = vmatmul.mubr.bf16.vlgmr.msra.gmra.mxu0 %v481_v13  ;;  %4938 = vst [vmem:[#allocation25_spill] sm:$0xff] %v3491_v54  ;;  %4940 = vst [vmem:[#allocation27_spill] sm:$0xff] %v3509_v62  ;;  %v90_v15 = vld [vmem:[%s4789_s5 + $0x118] sm:$0xff]  ;;  %v80_v19 = vld [vmem:[%s4789_s5 + $0xc8] sm:$0xff] }
  0x25   :  { %618 = vmatprep.mubr.bf16.mxu0 %v4798_v7  ;;  %4941 = vst [vmem:[#allocation28_spill] sm:$0xff] %v3519_v4  ;;  %v3537_v16 = vpack.c.bf16 %v90_v15, %v87_v12  ;;  %v83_v20 = vld [vmem:[%s4789_s5 + $0xe0] sm:$0xff]  ;;  %v82_v28 = vld [vmem:[%s4789_s5 + $0xd8] sm:$0xff]  ;;  %v81_v29 = vld [vmem:[%s4789_s5 + $0xd0] sm:$0xff] }
  0x26   :  { %2535 = vmatpush3.bf16.msra.mxu1 %v3381_v14  ;;  %v3547_v23 = vpack.c.bf16 %v83_v20, %v80_v19  ;;  %v79_v24 = vld [vmem:[%s4789_s5 + $0xc0] sm:$0xff]  ;;  %v84_v32 = vld [vmem:[%s4789_s5 + $0xe8] sm:$0xff]  ;;  %v74_v37 = vld [vmem:[%s4789_s5 + $0x98] sm:$0xff] }
  0x27   :  { %2536 = vmatprep.subr.bf16.mxu1 %v4800_v27  ;;  %4943 = vst [vmem:[#allocation30_spill] sm:$0xff] %v3537_v16  ;;  %v3559_v31 = vpack.c.bf16 %v82_v28, %v79_v24  ;;  %v3565_v36 = vpack.c.bf16 %v84_v32, %v81_v29  ;;  %v76_v45 = vld [vmem:[%s4789_s5 + $0xa8] sm:$0xff]  ;;  %v75_v46 = vld [vmem:[%s4789_s5 + $0xa0] sm:$0xff]  ;;  %v78_v49 = vld [vmem:[%s4789_s5 + $0xb8] sm:$0xff] }
  0x28   :  { %4944 = vst [vmem:[#allocation31_spill] sm:$0xff] %v3547_v23  ;;  %v3591_v53 = vpack.c.bf16 %v78_v49, %v75_v46  ;;  %v67_v59 = vld [vmem:[%s4789_s5 + $0x60] sm:$0xff]  ;;  %v70_v1 = vld [vmem:[%s4789_s5 + $0x78] sm:$0xff]  ;;  %v69_v2 = vld [vmem:[%s4789_s5 + $0x70] sm:$0xff] }
  0x29   :  { %2525 = vmatmul.mubr.msk.bf16.gmra.mxu1 %vm348_vm0, %v3273_v41  ;;  %v3464_v41 = vpack.c.bf16 %v101_v40, %v98_v39  ;;  %4945 = vst [vmem:[#allocation32_spill] sm:$0xff] %v3559_v31  ;;  %4946 = vst [vmem:[#allocation33_spill] sm:$0xff] %v3565_v36  ;;  %v77_v39 = vld [vmem:[%s4789_s5 + $0xb0] sm:$0xff]  ;;  %v3622_v15 = vpack.c.bf16 %v70_v1, %v67_v59  ;;  %v64_v28 = vld [vmem:[%s4789_s5 + $0x48] sm:$0xff] }
  0x2a   :  { %2537 = vmatpush3.bf16.msra.mxu1 %v3394_v18  ;;  %2528 = vmatprep.mubr.msk.bf16.mxu1 %vm3085_vm1, %v4800_v27  ;;  %v73_v40 = vld [vmem:[%s4789_s5 + $0x90] sm:$0xff]  ;;  %v3577_v44 = vpack.c.bf16 %v77_v39, %v74_v37  ;;  %4949 = vst [vmem:[#allocation36_spill] sm:$0xff] %v3591_v53  ;;  %v63_v29 = vld [vmem:[%s4789_s5 + $0x40] sm:$0xff]  ;;  %v66_v32 = vld [vmem:[%s4789_s5 + $0x58] sm:$0xff] }
  0x2b   :  { %2538 = vmatprep.subr.bf16.mxu1 %v4800_v27  ;;  %4935 = vst [vmem:[#allocation22_spill] sm:$0xff] %v3464_v41  ;;  %586 = vmatprep.subr.bf16.mxu0 %v3464_v41  ;;  %v3589_v52 = vpack.c.bf16 %v76_v45, %v73_v40  ;;  %v65_v12 = vld [vmem:[%s4789_s5 + $0x50] sm:$0xff]  ;;  %4951 = vst [vmem:[#allocation38_spill] sm:$0xff] %v3622_v15  ;;  %v56_v37 = vld [vmem:[%s4789_s5 + $0x8] sm:$0xff]  ;;  %v3654_v45 = vpack.c.bf16 %v66_v32, %v63_v29 }
  0x2c   :  { %587 = vmatpush1.bf16.msra.mxu0 %v3475_v47  ;;  %4947 = vst [vmem:[#allocation34_spill] sm:$0xff] %v3577_v44  ;;  %v61_v24 = vld [vmem:[%s4789_s5 + $0x30] sm:$0xff]  ;;  %v59_v39 = vld [vmem:[%s4789_s5 + $0x20] sm:$0xff]  ;;  %v60_v59 = vld [vmem:[%s4789_s5 + $0x28] sm:$0xff] }
  0x2d   :  { %588 = vmatprep.subr.bf16.mxu0 %v3491_v54  ;;  %4948 = vst [vmem:[#allocation35_spill] sm:$0xff] %v3589_v52  ;;  %v3650_v40 = vpack.c.bf16 %v64_v28, %v61_v24  ;;  %4955 = vst [vmem:[#allocation42_spill] sm:$0xff] %v3654_v45  ;;  %v3656_v46 = vpack.c.bf16 %v59_v39, %v56_v37  ;;  %v55_v49 = vld [vmem:[%s4789_s5] sm:$0xff] }
  0x2e   :  { %2539 = vmatpush3.bf16.msra.mxu1 %v3406_v21  ;;  %v331_v24 = vld [vmem:[%s4787_s3] sm:$0x7] }
  0x2f   :  { %2540 = vmatprep.subr.bf16.mxu1 %v4800_v27  ;;  %4954 = vst [vmem:[#allocation41_spill] sm:$0xff] %v3650_v40  ;;  %4956 = vst [vmem:[#allocation43_spill] sm:$0xff] %v3656_v46 }
  0x31   :  { %2529 = vmatmul.mubr.msk.bf16.gmra.mxu1 %vm348_vm0, %v330_v56  ;;  %v94_v56 = vld [vmem:[%s4789_s5 + $0x138] sm:$0xff] }
  0x32   :  { %2541 = vmatpush3.bf16.msra.mxu1 %v3418_v25  ;;  %2548 = vmatprep.mubr.msk.bf16.mxu1 %vm3085_vm1, %v4800_v27  ;;  %v3503_v60 = vpack.c.bf16 %v94_v56, %v91_v55  ;;  %v68_v55 = vld [vmem:[%s4789_s5 + $0x68] sm:$0xff]  ;;  %v71_v56 = vld [vmem:[%s4789_s5 + $0x80] sm:$0xff] }
  0x33   :  { %2542 = vmatprep.subr.bf16.mxu1 %v4800_v27  ;;  %v3604_v61 = vpack.c.bf16 %v71_v56, %v68_v55  ;;  %v58_v55 = vld [vmem:[%s4789_s5 + $0x18] sm:$0xff]  ;;  %v57_v56 = vld [vmem:[%s4789_s5 + $0x10] sm:$0xff] }
  0x34   :  { %4939 = vst [vmem:[#allocation26_spill] sm:$0xff] %v3503_v60  ;;  %589 = vmatpush1.bf16.msra.mxu0 %v3503_v60  ;;  %v3672_v1 = vpack.c.bf16 %v58_v55, %v55_v49 }
  0x35   :  { %590 = vmatprep.subr.bf16.mxu0 %v3519_v4  ;;  %4950 = vst [vmem:[#allocation37_spill] sm:$0xff] %v3604_v61 }
  0x36   :  { %2543 = vmatpush3.bf16.msra.mxu1 %v3429_v30  ;;  %4957 = vst [vmem:[#allocation44_spill] sm:$0xff] %v3672_v1 }
  0x37   :  { %2544 = vmatprep.subr.bf16.mxu1 %v4800_v27 }
  0x3a   :  { %2545 = vmatpush3.bf16.msra.mxu1 %v3441_v34 }
  0x3b   :  { %2546 = vmatprep.subr.bf16.mxu1 %v4800_v27 }
  0x3e   :  { %2547 = vmatpush3.bf16.msra.mxu1 %v3451_v38 }
  0x3f   :  { %2552 = vmatprep.subr.bf16.mxu1 %v4800_v27 }
  0x41   :  { %2549 = vmatmul.mubr.bf16.vlgmr.msra.gmra.mxu1 %v481_v13  ;;  %v3531_v13 = vpack.c.bf16 %v88_v11, %v85_v5  ;;  %v72_v5 = vld [vmem:[%s4789_s5 + $0x88] sm:$0xff]  ;;  %v62_v11 = vld [vmem:[%s4789_s5 + $0x38] sm:$0xff] }
  0x42   :  { %2568 = vmatprep.mubr.msk.bf16.mxu1 %vm3085_vm1, %v4800_v27  ;;  %2553 = vmatpush3.bf16.msra.mxu1 %v3481_v51  ;;  %v3626_v19 = vpack.c.bf16 %v72_v5, %v69_v2  ;;  %v3628_v20 = vpack.c.bf16 %v65_v12, %v62_v11  ;;  %v3676_v2 = vpack.c.bf16 %v60_v59, %v57_v56  ;;  %v273_v5 = vlaneseq }
  0x43   :  { %2554 = vmatprep.subr.bf16.mxu1 %v4800_v27  ;;  %4942 = vst [vmem:[#allocation29_spill] sm:$0xff] %v3531_v13  ;;  %591 = vmatpush1.bf16.msra.mxu0 %v3531_v13 }
  0x44   :  { %592 = vmatprep.subr.bf16.mxu0 %v3547_v23  ;;  %4952 = vst [vmem:[#allocation39_spill] sm:$0xff] %v3626_v19  ;;  %4953 = vst [vmem:[#allocation40_spill] sm:$0xff] %v3628_v20  ;;  %v274_v11 = vshrl.u32 %v273_v5, 7 }
  0x45   :  { %4958 = vst [vmem:[#allocation45_spill] sm:$0xff] %v3676_v2 }
  0x46   :  { %2555 = vmatpush3.bf16.msra.mxu1 %v3509_v62  ;;  %v3683_v12 = vsub.s32 0, %v274_v11  ;;  %v3688_v28 = vsub.s32 1, %v274_v11 }
  0x47   :  { %2556 = vmatprep.subr.bf16.mxu1 %v4800_v27  ;;  %593 = vmatpush1.bf16.msra.mxu0 %v3559_v31 }
  0x48   :  { %594 = vmatprep.subr.bf16.mxu0 %v3577_v44  ;;  %4959 = vst [vmem:[#allocation46_spill] sm:$0xff] %v3683_v12  ;;  %4960 = vst [vmem:[#allocation47_spill] sm:$0xff] %v3688_v28  ;;  %v336_v32 = vrot.slane %v331_v24, %v3683_v12  ;;  %v340_v39 = vrot.slane %v331_v24, %v3688_v28 }
  0x4a   :  { %2557 = vmatpush3.bf16.msra.mxu1 %v3537_v16 }
  0x4b   :  { %2558 = vmatprep.subr.bf16.mxu1 %v4800_v27  ;;  %595 = vmatpush1.bf16.msra.mxu0 %v3589_v52 }
  0x4c   :  { %596 = vmatprep.subr.bf16.mxu0 %v3604_v61 }
  0x4e   :  { %2559 = vmatpush3.bf16.msra.mxu1 %v3565_v36 }
  0x4f   :  { %2560 = vmatprep.subr.bf16.mxu1 %v4800_v27  ;;  %597 = vmatpush1.bf16.msra.mxu0 %v3622_v15 }
  0x50   :  { %598 = vmatprep.subr.bf16.mxu0 %v3628_v20 }
  0x52   :  { %2561 = vmatpush3.bf16.msra.mxu1 %v3591_v53 }
  0x53   :  { %2562 = vmatprep.subr.bf16.mxu1 %v4800_v27  ;;  %599 = vmatpush1.bf16.msra.mxu0 %v3650_v40 }
  0x54   :  { %600 = vmatprep.subr.bf16.mxu0 %v3656_v46 }
  0x56   :  { %2563 = vmatpush3.bf16.msra.mxu1 %v3626_v19 }
  0x57   :  { %2564 = vmatprep.subr.bf16.mxu1 %v4800_v27  ;;  %601 = vmatpush1.bf16.msra.mxu0 %v3672_v1 }
  0x58   :  { %667 = vmatprep.subr.bf16.mxu0 %v3169_v3 }
  0x5a   :  { %2565 = vmatpush3.bf16.msra.mxu1 %v3654_v45 }
  0x5b   :  { %2566 = vmatprep.subr.bf16.mxu1 %v4800_v27 }
  0x5e   :  { %2567 = vmatpush3.bf16.msra.mxu1 %v3676_v2 }
  0x5f   :  { %2572 = vmatprep.subr.bf16.mxu1 %v4800_v27 }
  0xc9   :  { %v392_v29 = vpop.f32.mrf.mxu1 }
  0xcb   :  { %v394_v37 = vpop.f32.mrf.mxu1 }
  0xcd   :  { %v396_v49 = vpop.f32.mrf.mxu1 }
  0xce   :  { %v3692_v55 = vadd.f32 %v396_v49, %v336_v32 }
  0xcf   :  { %v398_v56 = vpop.f32.mrf.mxu1 }
  0xd0   :  { %4961 = vst [vmem:[#allocation48_spill] sm:$0xff] %v3692_v55  ;;  %v3694_v59 = vadd.f32 %v398_v56, %v340_v39 }
  0xd1   :  { %v402_v5 = vpop.f32.mrf.mxu1 }
  0xd2   :  { %4962 = vst [vmem:[#allocation49_spill] sm:$0xff] %v3694_v59  ;;  %v3696_v7 = vadd.f32 %v402_v5, %v336_v32  ;;  %v3710_v5 = vsub.s32 2, %v274_v11 }
  0xd3   :  { %v404_v27 = vpop.f32.mrf.mxu1 }
  0xd4   :  { %4963 = vst [vmem:[#allocation50_spill] sm:$0xff] %v3696_v7  ;;  %v3698_v3 = vadd.f32 %v404_v27, %v340_v39  ;;  %4970 = vst [vmem:[#allocation57_spill] sm:$0xff] %v3710_v5  ;;  %v271_v27 = vld [vmem:[%s4788_s4] sm:$0x7] }
  0xd5   :  { %v406_v2 = vpop.f32.mrf.mxu1 }
  0xd6   :  { %4964 = vst [vmem:[#allocation51_spill] sm:$0xff] %v3698_v3  ;;  %v3700_v1 = vadd.f32 %v406_v2, %v336_v32 }
  0xd7   :  { %v408_v46 = vpop.f32.mrf.mxu1 }
  0xd8   :  { %4965 = vst [vmem:[#allocation52_spill] sm:$0xff] %v3700_v1  ;;  %v3702_v45 = vadd.f32 %v408_v46, %v340_v39 }
  0xd9   :  { %v412_v40 = vpop.f32.mrf.mxu1 }
  0xda   :  { %4966 = vst [vmem:[#allocation53_spill] sm:$0xff] %v3702_v45  ;;  %v3704_v20 = vadd.f32 %v412_v40, %v336_v32  ;;  %v3718_v45 = vrot.slane %v271_v27, %v3683_v12  ;;  %v344_v40 = vrot.slane %v331_v24, %v3710_v5 }
  0xdb   :  { %v414_v49 = vpop.f32.mrf.mxu1 }
  0xdc   :  { %4967 = vst [vmem:[#allocation54_spill] sm:$0xff] %v3704_v20  ;;  %v3706_v55 = vadd.f32 %v414_v49, %v340_v39  ;;  %4972 = vst [vmem:[#allocation59_spill] sm:$0xff] %v3718_v45  ;;  %v393_v20 = vadd.f32 %v392_v29, %v336_v32  ;;  %v395_v29 = vadd.f32 %v394_v37, %v340_v39 }
  0xdd   :  { %v416_v56 = vpop.f32.mrf.mxu1 }
  0xde   :  { %4968 = vst [vmem:[#allocation55_spill] sm:$0xff] %v3706_v55  ;;  %v3708_v59 = vadd.f32 %v416_v56, %v336_v32 }
  0xdf   :  { %v418_v2 = vpop.f32.mrf.mxu1 }
  0xe0   :  { %4969 = vst [vmem:[#allocation56_spill] sm:$0xff] %v3708_v59  ;;  %v3715_v1 = vadd.f32 %v418_v2, %v340_v39  ;;  %v3723_v59 = vrot.slane %v271_v27, %v3688_v28 }
  0xe1   :  { %v455_v46 = vpop.f32.mrf.mxu1 }
  0xe2   :  { %4971 = vst [vmem:[#allocation58_spill] sm:$0xff] %v3715_v1 }
  0xe3   :  { %v2522_v49 = vpop.f32.mrf.mxu1 }
  0xe4   :  { %v517_v55 = vpop.f32.mrf.mxu0 }
  0xe5   :  { %v518_v56 = vadd.f32 %v517_v55, %v3718_v45  ;;  %v458_v11 = vpop.f32.mrf.mxu1 }
  0xe6   :  { %v3725_v3 = vadd.f32 %v458_v11, %v344_v40  ;;  %v519_v7 = vpop.f32.mrf.mxu0 }
  0xe7   :  { %v564_v2 = vadd.f32 %v518_v56, %v393_v20  ;;  %v2523_v1 = vpop.f32.mrf.mxu1  ;;  %v520_v12 = vadd.f32 %v519_v7, %v3723_v59 }
  0xe8   :  { %4973 = vst [vmem:[#allocation60_spill] sm:$0xff] %v3725_v3  ;;  %v521_v19 = vpop.f32.mrf.mxu0 }
  0xe9   :  { %v2318_v15 = vmul.f32 -1.442695, %v564_v2  ;;  %v463_v61 = vpop.f32.mrf.mxu1  ;;  %v565_v55 = vadd.f32 %v520_v12, %v395_v29 }
  0xea   :  { %v522_v24 = vpop.f32.mrf.mxu0  ;;  %v3728_v49 = vadd.f32 %v463_v61, %v344_v40 }
  0xeb   :  { %2919 = vpow2.f32 %v2318_v15  ;;  %v2526_v32 = vpop.f32.mrf.mxu1  ;;  %v2319_v3 = vmul.f32 -1.442695, %v565_v55  ;;  %v3737_v15 = vrot.slane %v271_v27, %v3710_v5 }
  0xec   :  { %4974 = vst [vmem:[#allocation61_spill] sm:$0xff] %v3728_v49 }
  0xed   :  { %v466_v45 = vpop.f32.mrf.mxu1  ;;  %2921 = vpow2.f32 %v2319_v3  ;;  %v456_v3 = vadd.f32 %v455_v46, %v344_v40  ;;  %v4978_v46 = vmov 0.0  }
  0xee   :  { %v3730_v28 = vadd.f32 %v466_v45, %v344_v40 }
  0xef   :  { %v2527_v11 = vpop.f32.mrf.mxu1 }
  0xf0   :  { %4975 = vst [vmem:[#allocation62_spill] sm:$0xff] %v3730_v28 }
  0xf1   :  { %v471_v53 = vpop.f32.mrf.mxu1 }
  0xf2   :  { %v3732_v20 = vadd.f32 %v471_v53, %v344_v40 }
  0xf3   :  { %v2530_v19 = vpop.f32.mrf.mxu1 }
  0xf4   :  { %4976 = vst [vmem:[#allocation63_spill] sm:$0xff] %v3732_v20 }
  0xf5   :  { %v474_v1 = vpop.f32.mrf.mxu1 }
  0xf6   :  { %v3734_v7 = vadd.f32 %v474_v1, %v344_v40  ;;  %v4979_v40 = vmov 0  }
  0xf7   :  { %v2531_v56 = vpop.f32.mrf.mxu1 }
  0xf8   :  { %4977 = vst [vmem:[#allocation64_spill] sm:$0xff] %v3734_v7  ;;  %v2920_v61 = vpop.eup %2919 }
  0xf9   :  { %v572_v2 = vadd.f32 1.0, %v2920_v61 }
  0xfa   :  { %v2922_v45 = vpop.eup %2921 }
  0xfb   :  { %2923 = vrcp.f32 %v572_v2  ;;  %v573_v39 = vadd.f32 1.0, %v2922_v45 }
  0xfd   :  { %2925 = vrcp.f32 %v573_v39  ;;  %v4983_v39 = vld [vmem:[#allocation39_spill] sm:$0xff] }
 0x101   :  { %v558_v12 = vpop.f32.mrf.mxu1 }
 0x102   :  { %v559_v24 = vadd.f32 %v558_v12, %v3737_v15  ;;  %v4981_v12 = vld [vmem:[#allocation37_spill] sm:$0xff] }
 0x103   :  { %v2550_v37 = vpop.f32.mrf.mxu1 }
 0x104   :  { %v4982_v37 = vld [vmem:[#allocation38_spill] sm:$0xff] }
 0x105   :  { %v561_v53 = vpop.f32.mrf.mxu1 }
 0x106   :  { %v4985_v53 = vld [vmem:[#allocation41_spill] sm:$0xff] }
 0x107   :  { %v2551_v29 = vpop.f32.mrf.mxu1 }
 0x108   :  { %v2924_v32 = vpop.eup %2923  ;;  %v4986_v29 = vld [vmem:[#allocation42_spill] sm:$0xff] }
 0x109   :  { %v578_v55 = vmul.f32 %v2924_v32, %v559_v24  ;;  %v4984_v24 = vld [vmem:[#allocation40_spill] sm:$0xff]  ;;  %v4987_v32 = vld [vmem:[#allocation43_spill] sm:$0xff] }
 0x10a   :  { %v2926_v19 = vpop.eup %2925 }
 0x10b   :  { %v579_v11 = vadd.f32 %v578_v55, %v456_v3  ;;  %v581_v1 = vsub.f32 1.0, %v2926_v19  ;;  %v583_v27 = vmul.f32 %v2926_v19, %v3364_v8  ;;  %v4980_v8 = vld [vmem:[#allocation36_spill] sm:$0xff]  ;;  %v4989_v55 = vld [vmem:[#allocation45_spill] sm:$0xff]  ;;  %v245_v19 = vld [vmem:[%s4790_s6 + $0x170] sm:$0xff] }
 0x10c   :  { %v4988_v3 = vld [vmem:[#allocation44_spill] sm:$0xff] }
 0x10d   :  { %2927 = vtanh.f32 %v579_v11  ;;  %v242_v11 = vld [vmem:[%s4790_s6 + $0x158] sm:$0xff] }
 0x11a   :  { %v2928_v56 = vpop.eup %2927 }
 0x11b   :  { %v582_v61 = vmul.f32 %v2928_v56, %v581_v1  ;;  %v3820_v1 = vpack.c.bf16 %v245_v19, %v242_v11  ;;  %v4995_v19 = vld [vmem:[#allocation48_spill] sm:$0xff] }
 0x11d   :  { %v3741_v2 = vadd.f32 %v583_v27, %v582_v61  ;;  %4990 = vst [vmem:[#allocation65_spill] sm:$0xff] %v3820_v1 }
 0x11f   :  { %v585_v45 = vpack.c.bf16 %v3741_v2, %v3741_v2 }
 0x121   :  { %619 = vmatmul.mubr.bf16.vlgmr.msra.gmra.mxu0 %v585_v45  ;;  %2569 = vmatmul.mubr.bf16.vlgmr.msra.gmra.mxu1 %v585_v45 }
 0x122   :  { %668 = vmatpush1.bf16.msra.mxu0 %v3182_v9  ;;  %2573 = vmatpush3.bf16.msra.mxu1 %v3367_v10 }
 0x123   :  { %669 = vmatprep.subr.bf16.mxu0 %v3204_v17  ;;  %2574 = vmatprep.subr.bf16.mxu1 %v4978_v46 }
 0x124   :  { %699 = vmatprep.mubr.bf16.mxu0 %v4979_v40  ;;  %2588 = vmatprep.mubr.msk.bf16.mxu1 %vm3085_vm1, %v4978_v46 }
 0x126   :  { %670 = vmatpush1.bf16.msra.mxu0 %v3217_v22  ;;  %2575 = vmatpush3.bf16.msra.mxu1 %v3381_v14 }
 0x127   :  { %671 = vmatprep.subr.bf16.mxu0 %v3229_v26  ;;  %2576 = vmatprep.subr.bf16.mxu1 %v4978_v46 }
 0x12a   :  { %672 = vmatpush1.bf16.msra.mxu0 %v3247_v33  ;;  %2577 = vmatpush3.bf16.msra.mxu1 %v3394_v18 }
 0x12b   :  { %673 = vmatprep.subr.bf16.mxu0 %v3253_v35  ;;  %2578 = vmatprep.subr.bf16.mxu1 %v4978_v46 }
 0x12e   :  { %674 = vmatpush1.bf16.msra.mxu0 %v3275_v42  ;;  %2579 = vmatpush3.bf16.msra.mxu1 %v3406_v21 }
 0x12f   :  { %675 = vmatprep.subr.bf16.mxu0 %v3278_v43  ;;  %2580 = vmatprep.subr.bf16.mxu1 %v4978_v46 }
 0x132   :  { %676 = vmatpush1.bf16.msra.mxu0 %v3295_v48  ;;  %2581 = vmatpush3.bf16.msra.mxu1 %v3418_v25 }
 0x133   :  { %677 = vmatprep.subr.bf16.mxu0 %v3302_v50  ;;  %2582 = vmatprep.subr.bf16.mxu1 %v4978_v46 }
 0x136   :  { %678 = vmatpush1.bf16.msra.mxu0 %v3320_v57  ;;  %2583 = vmatpush3.bf16.msra.mxu1 %v3429_v30 }
 0x137   :  { %679 = vmatprep.subr.bf16.mxu0 %v3323_v58  ;;  %2584 = vmatprep.subr.bf16.mxu1 %v4978_v46 }
 0x13a   :  { %680 = vmatpush1.bf16.msra.mxu0 %v3339_v63  ;;  %2585 = vmatpush3.bf16.msra.mxu1 %v3441_v34 }
 0x13b   :  { %681 = vmatprep.subr.bf16.mxu0 %v3344_v0  ;;  %2586 = vmatprep.subr.bf16.mxu1 %v4978_v46 }
 0x13e   :  { %682 = vmatpush1.bf16.msra.mxu0 %v3359_v6  ;;  %2587 = vmatpush3.bf16.msra.mxu1 %v3451_v38 }
 0x13f   :  { %770 = vmatprep.subr.bf16.mxu0 %v3464_v41  ;;  %2592 = vmatprep.subr.bf16.mxu1 %v4978_v46 }
 0x141   :  { %700 = vmatmul.mubr.bf16.vlgmr.msra.gmra.mxu0 %v585_v45  ;;  %2589 = vmatmul.mubr.bf16.vlgmr.msra.gmra.mxu1 %v585_v45 }
 0x142   :  { %771 = vmatpush1.bf16.msra.mxu0 %v3475_v47  ;;  %2593 = vmatpush3.bf16.msra.mxu1 %v3481_v51 }
 0x143   :  { %772 = vmatprep.subr.bf16.mxu0 %v3491_v54  ;;  %2594 = vmatprep.subr.bf16.mxu1 %v4978_v46 }
 0x144   :  { %802 = vmatprep.mubr.bf16.mxu0 %v4979_v40  ;;  %2608 = vmatprep.mubr.msk.bf16.mxu1 %vm3085_vm1, %v4978_v46 }
 0x146   :  { %773 = vmatpush1.bf16.msra.mxu0 %v3503_v60  ;;  %2595 = vmatpush3.bf16.msra.mxu1 %v3509_v62 }
 0x147   :  { %774 = vmatprep.subr.bf16.mxu0 %v3519_v4  ;;  %2596 = vmatprep.subr.bf16.mxu1 %v4978_v46 }
 0x14a   :  { %775 = vmatpush1.bf16.msra.mxu0 %v3531_v13  ;;  %2597 = vmatpush3.bf16.msra.mxu1 %v3537_v16 }
 0x14b   :  { %776 = vmatprep.subr.bf16.mxu0 %v3547_v23  ;;  %2598 = vmatprep.subr.bf16.mxu1 %v4978_v46 }
 0x14e   :  { %777 = vmatpush1.bf16.msra.mxu0 %v3559_v31  ;;  %2599 = vmatpush3.bf16.msra.mxu1 %v3565_v36 }
 0x14f   :  { %778 = vmatprep.subr.bf16.mxu0 %v3577_v44  ;;  %2600 = vmatprep.subr.bf16.mxu1 %v4978_v46 }
 0x152   :  { %779 = vmatpush1.bf16.msra.mxu0 %v3589_v52  ;;  %2601 = vmatpush3.bf16.msra.mxu1 %v4980_v8 }
 0x153   :  { %780 = vmatprep.subr.bf16.mxu0 %v4981_v12  ;;  %2602 = vmatprep.subr.bf16.mxu1 %v4978_v46 }
 0x156   :  { %781 = vmatpush1.bf16.msra.mxu0 %v4982_v37  ;;  %2603 = vmatpush3.bf16.msra.mxu1 %v4983_v39 }
 0x157   :  { %782 = vmatprep.subr.bf16.mxu0 %v4984_v24  ;;  %2604 = vmatprep.subr.bf16.mxu1 %v4978_v46 }
 0x15a   :  { %783 = vmatpush1.bf16.msra.mxu0 %v4985_v53  ;;  %2605 = vmatpush3.bf16.msra.mxu1 %v4986_v29 }
 0x15b   :  { %784 = vmatprep.subr.bf16.mxu0 %v4987_v32  ;;  %2606 = vmatprep.subr.bf16.mxu1 %v4978_v46 }
 0x15e   :  { %785 = vmatpush1.bf16.msra.mxu0 %v4988_v3  ;;  %2607 = vmatpush3.bf16.msra.mxu1 %v4989_v55  ;;  %v4994_v3 = vld [vmem:[#allocation59_spill] sm:$0xff] }
 0x15f   :  { %2612 = vmatprep.subr.bf16.mxu1 %v4978_v46  ;;  %851 = vmatprep.subr.bf16.mxu0 %v3820_v1 }
 0x1e1   :  { %v3823_v56 = vpop.f32.mrf.mxu0  ;;  %v3825_v61 = vpop.f32.mrf.mxu1 }
 0x1e2   :  { %4991 = vst [vmem:[#allocation66_spill] sm:$0xff] %v3823_v56  ;;  %4992 = vst [vmem:[#allocation67_spill] sm:$0xff] %v3825_v61 }
 0x1e3   :  { %v3827_v27 = vpop.f32.mrf.mxu0  ;;  %v2570_v45 = vpop.f32.mrf.mxu1 }
 0x1e4   :  { %4993 = vst [vmem:[#allocation68_spill] sm:$0xff] %v3827_v27 }
 0x1e5   :  { %v624_v7 = vpop.f32.mrf.mxu0  ;;  %v664_v20 = vpop.f32.mrf.mxu1 }
 0x1e6   :  { %v4996_v7 = vld [vmem:[#allocation49_spill] sm:$0xff] }
 0x1e7   :  { %v625_v28 = vpop.f32.mrf.mxu0  ;;  %v2571_v49 = vpop.f32.mrf.mxu1 }
 0x201   :  { %v701_v5 = vpop.f32.mrf.mxu0  ;;  %v742_v55 = vpop.f32.mrf.mxu1 }
 0x202   :  { %v702_v32 = vadd.f32 %v701_v5, %v4994_v3 }
 0x203   :  { %v703_v29 = vpop.f32.mrf.mxu0  ;;  %v2590_v11 = vpop.f32.mrf.mxu1 }
 0x204   :  { %v748_v53 = vadd.f32 %v702_v32, %v4995_v19  ;;  %v704_v61 = vadd.f32 %v703_v29, %v3723_v59  ;;  %v743_v11 = vadd.f32 %v742_v55, %v3737_v15  ;;  %v244_v55 = vld [vmem:[%s4790_s6 + $0x168] sm:$0xff] }
 0x205   :  { %v705_v1 = vpop.f32.mrf.mxu0  ;;  %v745_v24 = vpop.f32.mrf.mxu1 }
 0x206   :  { %v2320_v56 = vmul.f32 -1.442695, %v748_v53  ;;  %v749_v20 = vadd.f32 %v704_v61, %v4996_v7  ;;  %v4997_v24 = vld [vmem:[#allocation60_spill] sm:$0xff]  ;;  %v241_v61 = vld [vmem:[%s4790_s6 + $0x150] sm:$0xff] }
 0x207   :  { %v706_v39 = vpop.f32.mrf.mxu0  ;;  %v2591_v27 = vpop.f32.mrf.mxu1  ;;  %v246_v7 = vld [vmem:[%s4790_s6 + $0x178] sm:$0xff] }
 0x208   :  { %2929 = vpow2.f32 %v2320_v56  ;;  %v2321_v28 = vmul.f32 -1.442695, %v749_v20  ;;  %v236_v20 = vld [vmem:[%s4790_s6 + $0x128] sm:$0xff] }
 0x20a   :  { %2931 = vpow2.f32 %v2321_v28 }
 0x215   :  { %v2930_v49 = vpop.eup %2929 }
 0x216   :  { %v756_v45 = vadd.f32 1.0, %v2930_v49  ;;  %v3856_v49 = vpack.c.bf16 %v244_v55, %v241_v61  ;;  %v232_v55 = vld [vmem:[%s4790_s6 + $0x108] sm:$0xff] }
 0x217   :  { %v2932_v5 = vpop.eup %2931 }
 0x218   :  { %2933 = vrcp.f32 %v756_v45  ;;  %v757_v3 = vadd.f32 1.0, %v2932_v5  ;;  %v235_v5 = vld [vmem:[%s4790_s6 + $0x120] sm:$0xff] }
 0x21a   :  { %2935 = vrcp.f32 %v757_v3  ;;  %v243_v3 = vld [vmem:[%s4790_s6 + $0x160] sm:$0xff] }
 0x21b   :  { %v3858_v45 = vpack.c.bf16 %v246_v7, %v243_v3  ;;  %v231_v3 = vld [vmem:[%s4790_s6 + $0x100] sm:$0xff]  ;;  %v234_v7 = vld [vmem:[%s4790_s6 + $0x118] sm:$0xff] }
 0x225   :  { %v2934_v32 = vpop.eup %2933 }
 0x226   :  { %v762_v1 = vmul.f32 %v2934_v32, %v743_v11 }
 0x227   :  { %v2936_v39 = vpop.eup %2935 }
 0x228   :  { %v763_v53 = vadd.f32 %v762_v1, %v4997_v24  ;;  %v765_v29 = vsub.f32 1.0, %v2936_v39  ;;  %v767_v19 = vmul.f32 %v2936_v39, %v3741_v2  ;;  %v239_v2 = vld [vmem:[%s4790_s6 + $0x140] sm:$0xff]  ;;  %v238_v1 = vld [vmem:[%s4790_s6 + $0x138] sm:$0xff]  ;;  %v237_v24 = vld [vmem:[%s4790_s6 + $0x130] sm:$0xff] }
 0x229   :  { %v3867_v32 = vpack.c.bf16 %v239_v2, %v236_v20  ;;  %v230_v39 = vld [vmem:[%s4790_s6 + $0xf8] sm:$0xff]  ;;  %v224_v20 = vld [vmem:[%s4790_s6 + $0xc8] sm:$0xff]  ;;  %v227_v2 = vld [vmem:[%s4790_s6 + $0xe0] sm:$0xff] }
 0x22a   :  { %2937 = vtanh.f32 %v763_v53  ;;  %v240_v53 = vld [vmem:[%s4790_s6 + $0x148] sm:$0xff] }
 0x22b   :  { %v3890_v61 = vpack.c.bf16 %v240_v53, %v237_v24  ;;  %v223_v24 = vld [vmem:[%s4790_s6 + $0xc0] sm:$0xff]  ;;  %v3928_v53 = vpack.c.bf16 %v227_v2, %v224_v20  ;;  %v217_v2 = vld [vmem:[%s4790_s6 + $0x90] sm:$0xff] }
 0x22d   :  { %5001 = vst [vmem:[#allocation69_spill] sm:$0xff] %v3928_v53 }
 0x237   :  { %v2938_v56 = vpop.eup %2937 }
 0x238   :  { %v766_v27 = vmul.f32 %v2938_v56, %v765_v29  ;;  %v233_v29 = vld [vmem:[%s4790_s6 + $0x110] sm:$0xff]  ;;  %v3888_v56 = vpack.c.bf16 %v238_v1, %v235_v5  ;;  %v3921_v1 = vpack.c.bf16 %v234_v7, %v231_v3 }
 0x239   :  { %v221_v3 = vld [vmem:[%s4790_s6 + $0xb0] sm:$0xff] }
 0x23a   :  { %v3854_v28 = vadd.f32 %v767_v19, %v766_v27  ;;  %v229_v27 = vld [vmem:[%s4790_s6 + $0xf0] sm:$0xff]  ;;  %v3897_v19 = vpack.c.bf16 %v233_v29, %v230_v39  ;;  %5000 = vst [vmem:[#allocation60_spill] sm:$0xff] %v3921_v1  ;;  %v226_v39 = vld [vmem:[%s4790_s6 + $0xd8] sm:$0xff] }
 0x23b   :  { %v3919_v5 = vpack.c.bf16 %v232_v55, %v229_v27  ;;  %v225_v29 = vld [vmem:[%s4790_s6 + $0xd0] sm:$0xff]  ;;  %v228_v27 = vld [vmem:[%s4790_s6 + $0xe8] sm:$0xff]  ;;  %v218_v55 = vld [vmem:[%s4790_s6 + $0x98] sm:$0xff]  ;;  %v3947_v7 = vpack.c.bf16 %v226_v39, %v223_v24 }
 0x23c   :  { %v3865_v11 = vpack.c.bf16 %v3854_v28, %v3854_v28  ;;  %4998 = vst [vmem:[#allocation48_spill] sm:$0xff] %v3897_v19  ;;  %v3949_v20 = vpack.c.bf16 %v228_v27, %v225_v29  ;;  %v219_v24 = vld [vmem:[%s4790_s6 + $0xa0] sm:$0xff]  ;;  %v222_v39 = vld [vmem:[%s4790_s6 + $0xb8] sm:$0xff]  ;;  %v212_v29 = vld [vmem:[%s4790_s6 + $0x68] sm:$0xff] }
 0x23d   :  { %4999 = vst [vmem:[#allocation49_spill] sm:$0xff] %v3919_v5  ;;  %5002 = vst [vmem:[#allocation70_spill] sm:$0xff] %v3947_v7  ;;  %v215_v27 = vld [vmem:[%s4790_s6 + $0x80] sm:$0xff] }
 0x23e   :  { %803 = vmatmul.mubr.bf16.vlgmr.msra.gmra.mxu0 %v3865_v11  ;;  %2609 = vmatmul.mubr.bf16.vlgmr.msra.gmra.mxu1 %v3865_v11  ;;  %5003 = vst [vmem:[#allocation71_spill] sm:$0xff] %v3949_v20 }
 0x23f   :  { %852 = vmatpush1.bf16.msra.mxu0 %v3856_v49  ;;  %2613 = vmatpush3.bf16.msra.mxu1 %v3858_v45 }
 0x240   :  { %853 = vmatprep.subr.bf16.mxu0 %v3867_v32  ;;  %2614 = vmatprep.subr.bf16.mxu1 %v4978_v46 }
 0x241   :  { %883 = vmatprep.mubr.bf16.mxu0 %v4979_v40  ;;  %2628 = vmatprep.mubr.msk.bf16.mxu1 %vm3085_vm1, %v4978_v46 }
 0x243   :  { %854 = vmatpush1.bf16.msra.mxu0 %v3888_v56  ;;  %2615 = vmatpush3.bf16.msra.mxu1 %v3890_v61 }
 0x244   :  { %855 = vmatprep.subr.bf16.mxu0 %v3897_v19  ;;  %2616 = vmatprep.subr.bf16.mxu1 %v4978_v46  ;;  %v3956_v19 = vpack.c.bf16 %v221_v3, %v218_v55  ;;  %v3977_v3 = vpack.c.bf16 %v222_v39, %v219_v24  ;;  %v206_v24 = vld [vmem:[%s4790_s6 + $0x38] sm:$0xff]  ;;  %v209_v39 = vld [vmem:[%s4790_s6 + $0x50] sm:$0xff] }
 0x246   :  { %5004 = vst [vmem:[#allocation72_spill] sm:$0xff] %v3956_v19  ;;  %5006 = vst [vmem:[#allocation74_spill] sm:$0xff] %v3977_v3 }
 0x247   :  { %856 = vmatpush1.bf16.msra.mxu0 %v3919_v5  ;;  %2617 = vmatpush3.bf16.msra.mxu1 %v3921_v1  ;;  %v220_v5 = vld [vmem:[%s4790_s6 + $0xa8] sm:$0xff]  ;;  %v3984_v1 = vpack.c.bf16 %v215_v27, %v212_v29 }
 0x248   :  { %857 = vmatprep.subr.bf16.mxu0 %v3928_v53  ;;  %2618 = vmatprep.subr.bf16.mxu1 %v4978_v46  ;;  %v3975_v55 = vpack.c.bf16 %v220_v5, %v217_v2  ;;  %v211_v53 = vld [vmem:[%s4790_s6 + $0x60] sm:$0xff]  ;;  %v213_v5 = vld [vmem:[%s4790_s6 + $0x70] sm:$0xff]  ;;  %v216_v2 = vld [vmem:[%s4790_s6 + $0x88] sm:$0xff] }
 0x249   :  { %5007 = vst [vmem:[#allocation75_spill] sm:$0xff] %v3984_v1  ;;  %v4005_v27 = vpack.c.bf16 %v216_v2, %v213_v5  ;;  %v200_v5 = vld [vmem:[%s4790_s6 + $0x8] sm:$0xff]  ;;  %v203_v2 = vld [vmem:[%s4790_s6 + $0x20] sm:$0xff] }
 0x24a   :  { %5005 = vst [vmem:[#allocation73_spill] sm:$0xff] %v3975_v55 }
 0x24b   :  { %858 = vmatpush1.bf16.msra.mxu0 %v3947_v7  ;;  %2619 = vmatpush3.bf16.msra.mxu1 %v3949_v20  ;;  %v214_v7 = vld [vmem:[%s4790_s6 + $0x78] sm:$0xff]  ;;  %v4012_v20 = vpack.c.bf16 %v209_v39, %v206_v24 }
 0x24c   :  { %859 = vmatprep.subr.bf16.mxu0 %v3956_v19  ;;  %2620 = vmatprep.subr.bf16.mxu1 %v4978_v46  ;;  %v4003_v29 = vpack.c.bf16 %v214_v7, %v211_v53  ;;  %v205_v19 = vld [vmem:[%s4790_s6 + $0x30] sm:$0xff]  ;;  %v207_v53 = vld [vmem:[%s4790_s6 + $0x40] sm:$0xff]  ;;  %v210_v7 = vld [vmem:[%s4790_s6 + $0x58] sm:$0xff] }
 0x24d   :  { %v4033_v39 = vpack.c.bf16 %v210_v7, %v207_v53 }
 0x24e   :  { %5008 = vst [vmem:[#allocation76_spill] sm:$0xff] %v4003_v29 }
 0x24f   :  { %860 = vmatpush1.bf16.msra.mxu0 %v3975_v55  ;;  %2621 = vmatpush3.bf16.msra.mxu1 %v3977_v3  ;;  %v208_v55 = vld [vmem:[%s4790_s6 + $0x48] sm:$0xff]  ;;  %v4040_v3 = vpack.c.bf16 %v203_v2, %v200_v5 }
 0x250   :  { %861 = vmatprep.subr.bf16.mxu0 %v3984_v1  ;;  %2622 = vmatprep.subr.bf16.mxu1 %v4978_v46  ;;  %v4031_v24 = vpack.c.bf16 %v208_v55, %v205_v19  ;;  %v199_v1 = vld [vmem:[%s4790_s6] sm:$0xff]  ;;  %v201_v19 = vld [vmem:[%s4790_s6 + $0x10] sm:$0xff]  ;;  %v204_v55 = vld [vmem:[%s4790_s6 + $0x28] sm:$0xff] }
 0x251   :  { %v4055_v7 = vpack.c.bf16 %v204_v55, %v201_v19  ;;  %v4060_v5 = vld [vmem:[%s4795_s11 + $0x8] sm:$0xff]  ;;  %v5012_v19 = vld [vmem:[#allocation41_spill] sm:$0xff] }
 0x252   :  { %v482_v2 = vpack.c.bf16 %v4060_v5, %v4060_v5  ;;  %v5013_v55 = vld [vmem:[#allocation42_spill] sm:$0xff] }
 0x253   :  { %862 = vmatpush1.bf16.msra.mxu0 %v4003_v29  ;;  %2623 = vmatpush3.bf16.msra.mxu1 %v4005_v27  ;;  %v202_v29 = vld [vmem:[%s4790_s6 + $0x18] sm:$0xff] }
 0x254   :  { %863 = vmatprep.subr.bf16.mxu0 %v4012_v20  ;;  %2624 = vmatprep.subr.bf16.mxu1 %v4978_v46  ;;  %v4053_v53 = vpack.c.bf16 %v202_v29, %v199_v1  ;;  %v5009_v1 = vld [vmem:[#allocation8_spill] sm:$0xff] }
 0x255   :  { %v5011_v29 = vld [vmem:[#allocation40_spill] sm:$0xff] }
 0x257   :  { %864 = vmatpush1.bf16.msra.mxu0 %v4031_v24  ;;  %2625 = vmatpush3.bf16.msra.mxu1 %v4033_v39 }
 0x258   :  { %865 = vmatprep.subr.bf16.mxu0 %v4040_v3  ;;  %2626 = vmatprep.subr.bf16.mxu1 %v4978_v46 }
 0x25b   :  { %866 = vmatpush1.bf16.msra.mxu0 %v4053_v53  ;;  %2627 = vmatpush3.bf16.msra.mxu1 %v4055_v7 }
 0x25c   :  { %954 = vmatprep.subr.bf16.mxu0 %v5009_v1  ;;  %2632 = vmatprep.subr.bf16.mxu1 %v4978_v46 }
 0x25e   :  { %884 = vmatmul.mubr.bf16.vlgmr.msra.gmra.mxu0 %v482_v2  ;;  %2629 = vmatmul.mubr.bf16.vlgmr.msra.gmra.mxu1 %v482_v2  ;;  %v5014_v2 = vld [vmem:[#allocation43_spill] sm:$0xff] }
 0x25f   :  { %955 = vmatpush1.bf16.msra.mxu0 %v3182_v9  ;;  %2633 = vmatpush3.bf16.msra.mxu1 %v3367_v10 }
 0x260   :  { %956 = vmatprep.subr.bf16.mxu0 %v3204_v17  ;;  %2634 = vmatprep.subr.bf16.mxu1 %v4978_v46 }
 0x261   :  { %986 = vmatprep.mubr.bf16.mxu0 %v4979_v40  ;;  %2648 = vmatprep.mubr.msk.bf16.mxu1 %vm3085_vm1, %v4978_v46 }
 0x263   :  { %957 = vmatpush1.bf16.msra.mxu0 %v3217_v22  ;;  %2635 = vmatpush3.bf16.msra.mxu1 %v3381_v14 }
 0x264   :  { %958 = vmatprep.subr.bf16.mxu0 %v3229_v26  ;;  %2636 = vmatprep.subr.bf16.mxu1 %v4978_v46 }
 0x267   :  { %959 = vmatpush1.bf16.msra.mxu0 %v3247_v33  ;;  %2637 = vmatpush3.bf16.msra.mxu1 %v3394_v18 }
 0x268   :  { %960 = vmatprep.subr.bf16.mxu0 %v3253_v35  ;;  %2638 = vmatprep.subr.bf16.mxu1 %v4978_v46 }
 0x26b   :  { %961 = vmatpush1.bf16.msra.mxu0 %v3275_v42  ;;  %2639 = vmatpush3.bf16.msra.mxu1 %v3406_v21 }
 0x26c   :  { %962 = vmatprep.subr.bf16.mxu0 %v3278_v43  ;;  %2640 = vmatprep.subr.bf16.mxu1 %v4978_v46 }
 0x26f   :  { %963 = vmatpush1.bf16.msra.mxu0 %v3295_v48  ;;  %2641 = vmatpush3.bf16.msra.mxu1 %v3418_v25 }
 0x270   :  { %964 = vmatprep.subr.bf16.mxu0 %v3302_v50  ;;  %2642 = vmatprep.subr.bf16.mxu1 %v4978_v46 }
 0x273   :  { %965 = vmatpush1.bf16.msra.mxu0 %v3320_v57  ;;  %2643 = vmatpush3.bf16.msra.mxu1 %v3429_v30 }
 0x274   :  { %966 = vmatprep.subr.bf16.mxu0 %v3323_v58  ;;  %2644 = vmatprep.subr.bf16.mxu1 %v4978_v46 }
 0x277   :  { %967 = vmatpush1.bf16.msra.mxu0 %v3339_v63  ;;  %2645 = vmatpush3.bf16.msra.mxu1 %v3441_v34 }
 0x278   :  { %968 = vmatprep.subr.bf16.mxu0 %v3344_v0  ;;  %2646 = vmatprep.subr.bf16.mxu1 %v4978_v46 }
 0x27b   :  { %969 = vmatpush1.bf16.msra.mxu0 %v3359_v6  ;;  %2647 = vmatpush3.bf16.msra.mxu1 %v3451_v38 }
 0x27c   :  { %1057 = vmatprep.subr.bf16.mxu0 %v3464_v41  ;;  %2652 = vmatprep.subr.bf16.mxu1 %v4978_v46 }
 0x27e   :  { %987 = vmatmul.mubr.bf16.vlgmr.msra.gmra.mxu0 %v3865_v11  ;;  %2649 = vmatmul.mubr.bf16.vlgmr.msra.gmra.mxu1 %v3865_v11  ;;  %v5010_v11 = vld [vmem:[#allocation39_spill] sm:$0xff] }
 0x27f   :  { %1058 = vmatpush1.bf16.msra.mxu0 %v3475_v47  ;;  %2653 = vmatpush3.bf16.msra.mxu1 %v3481_v51 }
 0x280   :  { %1059 = vmatprep.subr.bf16.mxu0 %v3491_v54  ;;  %2654 = vmatprep.subr.bf16.mxu1 %v4978_v46 }
 0x281   :  { %1089 = vmatprep.mubr.bf16.mxu0 %v4979_v40  ;;  %2668 = vmatprep.mubr.msk.bf16.mxu1 %vm3085_vm1, %v4978_v46 }
 0x283   :  { %1060 = vmatpush1.bf16.msra.mxu0 %v3503_v60  ;;  %2655 = vmatpush3.bf16.msra.mxu1 %v3509_v62 }
 0x284   :  { %1061 = vmatprep.subr.bf16.mxu0 %v3519_v4  ;;  %2656 = vmatprep.subr.bf16.mxu1 %v4978_v46  ;;  %v5027_v4 = vld [vmem:[#allocation68_spill] sm:$0xff] }
 0x287   :  { %1062 = vmatpush1.bf16.msra.mxu0 %v3531_v13  ;;  %2657 = vmatpush3.bf16.msra.mxu1 %v3537_v16 }
 0x288   :  { %1063 = vmatprep.subr.bf16.mxu0 %v3547_v23  ;;  %2658 = vmatprep.subr.bf16.mxu1 %v4978_v46 }
 0x28b   :  { %1064 = vmatpush1.bf16.msra.mxu0 %v3559_v31  ;;  %2659 = vmatpush3.bf16.msra.mxu1 %v3565_v36 }
 0x28c   :  { %1065 = vmatprep.subr.bf16.mxu0 %v3577_v44  ;;  %2660 = vmatprep.subr.bf16.mxu1 %v4978_v46 }
 0x28f   :  { %1066 = vmatpush1.bf16.msra.mxu0 %v3589_v52  ;;  %2661 = vmatpush3.bf16.msra.mxu1 %v4980_v8  ;;  %v5015_v8 = vld [vmem:[#allocation44_spill] sm:$0xff]  ;;  %v5017_v52 = vld [vmem:[#allocation65_spill] sm:$0xff] }
 0x290   :  { %1067 = vmatprep.subr.bf16.mxu0 %v4981_v12  ;;  %2662 = vmatprep.subr.bf16.mxu1 %v4978_v46  ;;  %v5016_v12 = vld [vmem:[#allocation45_spill] sm:$0xff] }
 0x293   :  { %1068 = vmatpush1.bf16.msra.mxu0 %v4982_v37  ;;  %2663 = vmatpush3.bf16.msra.mxu1 %v5010_v11 }
 0x294   :  { %1069 = vmatprep.subr.bf16.mxu0 %v5011_v29  ;;  %2664 = vmatprep.subr.bf16.mxu1 %v4978_v46 }
 0x297   :  { %1070 = vmatpush1.bf16.msra.mxu0 %v5012_v19  ;;  %2665 = vmatpush3.bf16.msra.mxu1 %v5013_v55 }
 0x298   :  { %1071 = vmatprep.subr.bf16.mxu0 %v5014_v2  ;;  %2666 = vmatprep.subr.bf16.mxu1 %v4978_v46 }
 0x29b   :  { %1072 = vmatpush1.bf16.msra.mxu0 %v5015_v8  ;;  %2667 = vmatpush3.bf16.msra.mxu1 %v5016_v12  ;;  %v305_v8 = vld [vmem:[%s4791_s7] sm:$0x7]  ;;  %v5021_v12 = vld [vmem:[#allocation46_spill] sm:$0xff] }
 0x29c   :  { %1138 = vmatprep.subr.bf16.mxu0 %v5017_v52  ;;  %2672 = vmatprep.subr.bf16.mxu1 %v4978_v46  ;;  %v288_v52 = vld [vmem:[%s4792_s8] sm:$0x7]  ;;  %v4155_v31 = vrot.slane %v305_v8, %v5021_v12 }
 0x29e   :  { %5022 = vst [vmem:[#allocation46_spill] sm:$0xff] %v4155_v31 }
 0x2fe   :  { %v4142_v11 = vpop.f32.mrf.mxu0  ;;  %v4144_v29 = vpop.f32.mrf.mxu1 }
 0x2ff   :  { %5018 = vst [vmem:[#allocation8_spill] sm:$0xff] %v4142_v11  ;;  %5019 = vst [vmem:[#allocation77_spill] sm:$0xff] %v4144_v29  ;;  %v4158_v29 = vrot.slane %v288_v52, %v5021_v12 }
 0x300   :  { %v4146_v37 = vpop.f32.mrf.mxu0  ;;  %v2610_v19 = vpop.f32.mrf.mxu1 }
 0x301   :  { %5020 = vst [vmem:[#allocation78_spill] sm:$0xff] %v4146_v37  ;;  %5023 = vst [vmem:[#allocation79_spill] sm:$0xff] %v4158_v29  ;;  %v5024_v37 = vld [vmem:[#allocation47_spill] sm:$0xff] }
 0x302   :  { %v808_v55 = vpop.f32.mrf.mxu0  ;;  %v848_v44 = vpop.f32.mrf.mxu1  ;;  %v4161_v19 = vrot.slane %v305_v8, %v5024_v37 }
 0x303   :  { %v4164_v44 = vrot.slane %v288_v52, %v5024_v37 }
 0x304   :  { %v809_v2 = vpop.f32.mrf.mxu0  ;;  %v2611_v36 = vpop.f32.mrf.mxu1  ;;  %v623_v62 = vadd.f32 %v5027_v4, %v4161_v19 }
 0x305   :  { %5025 = vst [vmem:[#allocation47_spill] sm:$0xff] %v4164_v44  ;;  %v5026_v2 = vld [vmem:[#allocation66_spill] sm:$0xff] }
 0x306   :  { %v621_v11 = vadd.f32 %v5026_v2, %v4155_v31 }
 0x31e   :  { %v885_v36 = vpop.f32.mrf.mxu0  ;;  %v926_v55 = vpop.f32.mrf.mxu1 }
 0x31f   :  { %v886_v23 = vadd.f32 %v885_v36, %v4158_v29  ;;  %v5028_v36 = vld [vmem:[#allocation57_spill] sm:$0xff] }
 0x320   :  { %v887_v16 = vpop.f32.mrf.mxu0  ;;  %v2630_v13 = vpop.f32.mrf.mxu1  ;;  %v4176_v4 = vrot.slane %v305_v8, %v5028_v36 }
 0x321   :  { %v932_v12 = vadd.f32 %v886_v23, %v621_v11  ;;  %v888_v60 = vadd.f32 %v887_v16, %v4164_v44  ;;  %v4173_v13 = vrot.slane %v288_v52, %v5028_v36 }
 0x322   :  { %v889_v54 = vpop.f32.mrf.mxu0  ;;  %v929_v51 = vpop.f32.mrf.mxu1 }
 0x323   :  { %v2322_v47 = vmul.f32 -1.442695, %v932_v12  ;;  %v933_v37 = vadd.f32 %v888_v60, %v623_v62  ;;  %5029 = vst [vmem:[#allocation66_spill] sm:$0xff] %v4173_v13  ;;  %v927_v60 = vadd.f32 %v926_v55, %v4173_v13 }
 0x324   :  { %v890_v41 = vpop.f32.mrf.mxu0  ;;  %v2631_v38 = vpop.f32.mrf.mxu1 }
 0x325   :  { %2939 = vpow2.f32 %v2322_v47  ;;  %v2323_v6 = vmul.f32 -1.442695, %v933_v37  ;;  %v5030_v41 = vld [vmem:[#allocation59_spill] sm:$0xff] }
 0x327   :  { %2941 = vpow2.f32 %v2323_v6  ;;  %v5031_v6 = vld [vmem:[#allocation50_spill] sm:$0xff] }
 0x332   :  { %v2940_v2 = vpop.eup %2939 }
 0x333   :  { %v940_v31 = vadd.f32 1.0, %v2940_v2 }
 0x334   :  { %v2942_v29 = vpop.eup %2941 }
 0x335   :  { %2943 = vrcp.f32 %v940_v31  ;;  %v941_v51 = vadd.f32 1.0, %v2942_v29  ;;  %v5032_v31 = vld [vmem:[#allocation67_spill] sm:$0xff] }
 0x336   :  { %v662_v52 = vadd.f32 %v5032_v31, %v4176_v4 }
 0x337   :  { %2945 = vrcp.f32 %v941_v51 }
 0x33e   :  { %v988_v16 = vpop.f32.mrf.mxu0  ;;  %v1029_v54 = vpop.f32.mrf.mxu1 }
 0x33f   :  { %v989_v38 = vadd.f32 %v988_v16, %v5030_v41  ;;  %v5033_v16 = vld [vmem:[#allocation51_spill] sm:$0xff] }
 0x340   :  { %v990_v47 = vpop.f32.mrf.mxu0  ;;  %v2650_v62 = vpop.f32.mrf.mxu1 }
 0x341   :  { %v1035_v23 = vadd.f32 %v989_v38, %v5031_v6  ;;  %v991_v36 = vadd.f32 %v990_v47, %v3723_v59 }
 0x342   :  { %v2944_v11 = vpop.eup %2943  ;;  %v992_v12 = vpop.f32.mrf.mxu0 }
 0x343   :  { %v1032_v37 = vpop.f32.mrf.mxu1  ;;  %v946_v8 = vmul.f32 %v2944_v11, %v927_v60  ;;  %v2324_v2 = vmul.f32 -1.442695, %v1035_v23  ;;  %v1036_v62 = vadd.f32 %v991_v36, %v5033_v16  ;;  %v1030_v11 = vadd.f32 %v1029_v54, %v3737_v15  ;;  %v5036_v54 = vld [vmem:[#allocation49_spill] sm:$0xff] }
 0x344   :  { %v993_v29 = vpop.f32.mrf.mxu0  ;;  %v2946_v38 = vpop.eup %2945 }
 0x345   :  { %v2651_v44 = vpop.f32.mrf.mxu1  ;;  %v947_v55 = vadd.f32 %v946_v8, %v662_v52  ;;  %2947 = vpow2.f32 %v2324_v2  ;;  %v2325_v13 = vmul.f32 -1.442695, %v1036_v62  ;;  %v949_v31 = vsub.f32 1.0, %v2946_v38  ;;  %v5034_v8 = vld [vmem:[#allocation61_spill] sm:$0xff]  ;;  %v5037_v62 = vld [vmem:[#allocation60_spill] sm:$0xff] }
 0x346   :  { %v951_v60 = vmul.f32 %v2946_v38, %v4060_v5  ;;  %v5038_v38 = vld [vmem:[#allocation69_spill] sm:$0xff] }
 0x347   :  { %2949 = vtanh.f32 %v947_v55 }
 0x348   :  { %2951 = vpow2.f32 %v2325_v13 }
 0x352   :  { %v2948_v6 = vpop.eup %2947 }
 0x353   :  { %v1043_v41 = vadd.f32 1.0, %v2948_v6  ;;  %v5039_v6 = vld [vmem:[#allocation70_spill] sm:$0xff] }
 0x354   :  { %v2950_v12 = vpop.eup %2949 }
 0x355   :  { %2953 = vrcp.f32 %v1043_v41  ;;  %v950_v51 = vmul.f32 %v2950_v12, %v949_v31  ;;  %v2952_v47 = vpop.eup %2951  ;;  %v5040_v31 = vld [vmem:[#allocation71_spill] sm:$0xff]  ;;  %v5041_v12 = vld [vmem:[#allocation72_spill] sm:$0xff] }
 0x356   :  { %v1044_v44 = vadd.f32 1.0, %v2952_v47  ;;  %v5044_v47 = vld [vmem:[#allocation75_spill] sm:$0xff] }
 0x357   :  { %v4186_v23 = vadd.f32 %v951_v60, %v950_v51  ;;  %v5042_v51 = vld [vmem:[#allocation73_spill] sm:$0xff]  ;;  %v5043_v60 = vld [vmem:[#allocation74_spill] sm:$0xff] }
 0x358   :  { %2955 = vrcp.f32 %v1044_v44  ;;  %v5045_v44 = vld [vmem:[#allocation76_spill] sm:$0xff] }
 0x362   :  { %v2954_v52 = vpop.eup %2953 }
 0x363   :  { %v1049_v37 = vmul.f32 %v2954_v52, %v1030_v11  ;;  %v953_v11 = vpack.c.bf16 %v4186_v23, %v4186_v23  ;;  %v5046_v52 = vld [vmem:[#allocation16_spill] sm:$0xff] }
 0x365   :  { %v1050_v13 = vadd.f32 %v1049_v37, %v5034_v8  ;;  %v2956_v2 = vpop.eup %2955  ;;  %v5047_v37 = vld [vmem:[#allocation21_spill] sm:$0xff]  ;;  %v5048_v8 = vld [vmem:[#allocation22_spill] sm:$0xff] }
 0x366   :  { %v1052_v36 = vsub.f32 1.0, %v2956_v2  ;;  %v1054_v41 = vmul.f32 %v2956_v2, %v3854_v28  ;;  %v5035_v28 = vld [vmem:[#allocation48_spill] sm:$0xff] }
 0x367   :  { %2957 = vtanh.f32 %v1050_v13  ;;  %v5049_v13 = vld [vmem:[#allocation23_spill] sm:$0xff]  ;;  %v5050_v2 = vld [vmem:[#allocation24_spill] sm:$0xff] }
 0x374   :  { %v2958_v29 = vpop.eup %2957 }
 0x375   :  { %v1053_v55 = vmul.f32 %v2958_v29, %v1052_v36  ;;  %v5051_v36 = vld [vmem:[#allocation25_spill] sm:$0xff]  ;;  %v5052_v29 = vld [vmem:[#allocation26_spill] sm:$0xff] }
 0x377   :  { %v4191_v16 = vadd.f32 %v1054_v41, %v1053_v55  ;;  %v5053_v55 = vld [vmem:[#allocation27_spill] sm:$0xff]  ;;  %v5054_v41 = vld [vmem:[#allocation28_spill] sm:$0xff] }
 0x379   :  { %v4195_v5 = vpack.c.bf16 %v4191_v16, %v4191_v16 }
 0x37b   :  { %1090 = vmatmul.mubr.bf16.vlgmr.msra.gmra.mxu0 %v4195_v5  ;;  %2669 = vmatmul.mubr.bf16.vlgmr.msra.gmra.mxu1 %v4195_v5 }
 0x37c   :  { %1139 = vmatpush1.bf16.msra.mxu0 %v3856_v49  ;;  %2673 = vmatpush3.bf16.msra.mxu1 %v3858_v45 }
 0x37d   :  { %1140 = vmatprep.subr.bf16.mxu0 %v3867_v32  ;;  %2674 = vmatprep.subr.bf16.mxu1 %v4978_v46 }
 0x37e   :  { %1170 = vmatprep.mubr.bf16.mxu0 %v4979_v40  ;;  %2688 = vmatprep.mubr.msk.bf16.mxu1 %vm3085_vm1, %v4978_v46 }
 0x380   :  { %1141 = vmatpush1.bf16.msra.mxu0 %v3888_v56  ;;  %2675 = vmatpush3.bf16.msra.mxu1 %v3890_v61 }
 0x381   :  { %1142 = vmatprep.subr.bf16.mxu0 %v5035_v28  ;;  %2676 = vmatprep.subr.bf16.mxu1 %v4978_v46 }
 0x384   :  { %1143 = vmatpush1.bf16.msra.mxu0 %v5036_v54  ;;  %2677 = vmatpush3.bf16.msra.mxu1 %v5037_v62 }
 0x385   :  { %1144 = vmatprep.subr.bf16.mxu0 %v5038_v38  ;;  %2678 = vmatprep.subr.bf16.mxu1 %v4978_v46 }
 0x388   :  { %1145 = vmatpush1.bf16.msra.mxu0 %v5039_v6  ;;  %2679 = vmatpush3.bf16.msra.mxu1 %v5040_v31 }
 0x389   :  { %1146 = vmatprep.subr.bf16.mxu0 %v5041_v12  ;;  %2680 = vmatprep.subr.bf16.mxu1 %v4978_v46 }
 0x38c   :  { %1147 = vmatpush1.bf16.msra.mxu0 %v5042_v51  ;;  %2681 = vmatpush3.bf16.msra.mxu1 %v5043_v60 }
 0x38d   :  { %1148 = vmatprep.subr.bf16.mxu0 %v5044_v47  ;;  %2682 = vmatprep.subr.bf16.mxu1 %v4978_v46 }
 0x390   :  { %1149 = vmatpush1.bf16.msra.mxu0 %v5045_v44  ;;  %2683 = vmatpush3.bf16.msra.mxu1 %v4005_v27 }
 0x391   :  { %1150 = vmatprep.subr.bf16.mxu0 %v4012_v20  ;;  %2684 = vmatprep.subr.bf16.mxu1 %v4978_v46 }
 0x394   :  { %1151 = vmatpush1.bf16.msra.mxu0 %v4031_v24  ;;  %2685 = vmatpush3.bf16.msra.mxu1 %v4033_v39 }
 0x395   :  { %1152 = vmatprep.subr.bf16.mxu0 %v4040_v3  ;;  %2686 = vmatprep.subr.bf16.mxu1 %v4978_v46 }
 0x398   :  { %1153 = vmatpush1.bf16.msra.mxu0 %v4053_v53  ;;  %2687 = vmatpush3.bf16.msra.mxu1 %v4055_v7 }
 0x399   :  { %1241 = vmatprep.subr.bf16.mxu0 %v5009_v1  ;;  %2692 = vmatprep.subr.bf16.mxu1 %v4978_v46 }
 0x39b   :  { %1171 = vmatmul.mubr.bf16.vlgmr.msra.gmra.mxu0 %v953_v11  ;;  %2689 = vmatmul.mubr.bf16.vlgmr.msra.gmra.mxu1 %v953_v11  ;;  %v5056_v11 = vld [vmem:[#allocation30_spill] sm:$0xff] }
 0x39c   :  { %1242 = vmatpush1.bf16.msra.mxu0 %v3182_v9  ;;  %2693 = vmatpush3.bf16.msra.mxu1 %v3367_v10 }
 0x39d   :  { %1243 = vmatprep.subr.bf16.mxu0 %v3204_v17  ;;  %2694 = vmatprep.subr.bf16.mxu1 %v4978_v46 }
 0x39e   :  { %1273 = vmatprep.mubr.bf16.mxu0 %v4979_v40  ;;  %2708 = vmatprep.mubr.msk.bf16.mxu1 %vm3085_vm1, %v4978_v46 }
 0x3a0   :  { %1244 = vmatpush1.bf16.msra.mxu0 %v3217_v22  ;;  %2695 = vmatpush3.bf16.msra.mxu1 %v3381_v14 }
 0x3a1   :  { %1245 = vmatprep.subr.bf16.mxu0 %v3229_v26  ;;  %2696 = vmatprep.subr.bf16.mxu1 %v4978_v46 }
 0x3a4   :  { %1246 = vmatpush1.bf16.msra.mxu0 %v3247_v33  ;;  %2697 = vmatpush3.bf16.msra.mxu1 %v3394_v18 }
 0x3a5   :  { %1247 = vmatprep.subr.bf16.mxu0 %v3253_v35  ;;  %2698 = vmatprep.subr.bf16.mxu1 %v4978_v46 }
 0x3a8   :  { %1248 = vmatpush1.bf16.msra.mxu0 %v3275_v42  ;;  %2699 = vmatpush3.bf16.msra.mxu1 %v3406_v21 }
 0x3a9   :  { %1249 = vmatprep.subr.bf16.mxu0 %v3278_v43  ;;  %2700 = vmatprep.subr.bf16.mxu1 %v4978_v46 }
 0x3ac   :  { %1250 = vmatpush1.bf16.msra.mxu0 %v3295_v48  ;;  %2701 = vmatpush3.bf16.msra.mxu1 %v3418_v25  ;;  %v5080_v25 = vld [vmem:[#allocation47_spill] sm:$0xff] }
 0x3ad   :  { %1251 = vmatprep.subr.bf16.mxu0 %v3302_v50  ;;  %2702 = vmatprep.subr.bf16.mxu1 %v4978_v46 }
 0x3b0   :  { %1252 = vmatpush1.bf16.msra.mxu0 %v3320_v57  ;;  %2703 = vmatpush3.bf16.msra.mxu1 %v3429_v30 }
 0x3b1   :  { %1253 = vmatprep.subr.bf16.mxu0 %v3323_v58  ;;  %2704 = vmatprep.subr.bf16.mxu1 %v4978_v46  ;;  %v5078_v58 = vld [vmem:[#allocation79_spill] sm:$0xff] }
 0x3b4   :  { %1254 = vmatpush1.bf16.msra.mxu0 %v3339_v63  ;;  %2705 = vmatpush3.bf16.msra.mxu1 %v3441_v34  ;;  %v5077_v63 = vld [vmem:[#allocation8_spill] sm:$0xff] }
 0x3b5   :  { %1255 = vmatprep.subr.bf16.mxu0 %v3344_v0  ;;  %2706 = vmatprep.subr.bf16.mxu1 %v4978_v46 }
 0x3b8   :  { %1256 = vmatpush1.bf16.msra.mxu0 %v5046_v52  ;;  %2707 = vmatpush3.bf16.msra.mxu1 %v5047_v37 }
 0x3b9   :  { %1344 = vmatprep.subr.bf16.mxu0 %v5048_v8  ;;  %2712 = vmatprep.subr.bf16.mxu1 %v4978_v46  ;;  %v5060_v8 = vld [vmem:[#allocation34_spill] sm:$0xff] }
 0x3bb   :  { %1274 = vmatmul.mubr.bf16.vlgmr.msra.gmra.mxu0 %v4195_v5  ;;  %2709 = vmatmul.mubr.bf16.vlgmr.msra.gmra.mxu1 %v4195_v5  ;;  %v5055_v5 = vld [vmem:[#allocation29_spill] sm:$0xff] }
 0x3bc   :  { %1345 = vmatpush1.bf16.msra.mxu0 %v5049_v13  ;;  %2713 = vmatpush3.bf16.msra.mxu1 %v5050_v2  ;;  %v5058_v2 = vld [vmem:[#allocation32_spill] sm:$0xff]  ;;  %v5059_v13 = vld [vmem:[#allocation33_spill] sm:$0xff] }
 0x3bd   :  { %1346 = vmatprep.subr.bf16.mxu0 %v5051_v36  ;;  %2714 = vmatprep.subr.bf16.mxu1 %v4978_v46  ;;  %v5057_v36 = vld [vmem:[#allocation31_spill] sm:$0xff] }
 0x3be   :  { %1376 = vmatprep.mubr.bf16.mxu0 %v4979_v40  ;;  %2728 = vmatprep.mubr.msk.bf16.mxu1 %vm3085_vm1, %v4978_v46 }
 0x3c0   :  { %1347 = vmatpush1.bf16.msra.mxu0 %v5052_v29  ;;  %2715 = vmatpush3.bf16.msra.mxu1 %v5053_v55  ;;  %v5061_v55 = vld [vmem:[#allocation35_spill] sm:$0xff]  ;;  %v5063_v29 = vld [vmem:[#allocation37_spill] sm:$0xff] }
 0x3c1   :  { %1348 = vmatprep.subr.bf16.mxu0 %v5054_v41  ;;  %2716 = vmatprep.subr.bf16.mxu1 %v4978_v46  ;;  %v5062_v41 = vld [vmem:[#allocation36_spill] sm:$0xff] }
 0x3c4   :  { %1349 = vmatpush1.bf16.msra.mxu0 %v5055_v5  ;;  %2717 = vmatpush3.bf16.msra.mxu1 %v5056_v11  ;;  %v5064_v11 = vld [vmem:[#allocation38_spill] sm:$0xff]  ;;  %v5066_v5 = vld [vmem:[#allocation40_spill] sm:$0xff] }
 0x3c5   :  { %1350 = vmatprep.subr.bf16.mxu0 %v5057_v36  ;;  %2718 = vmatprep.subr.bf16.mxu1 %v4978_v46  ;;  %v5065_v36 = vld [vmem:[#allocation39_spill] sm:$0xff] }
 0x3c8   :  { %1351 = vmatpush1.bf16.msra.mxu0 %v5058_v2  ;;  %2719 = vmatpush3.bf16.msra.mxu1 %v5059_v13  ;;  %v5067_v13 = vld [vmem:[#allocation41_spill] sm:$0xff]  ;;  %v5069_v2 = vld [vmem:[#allocation43_spill] sm:$0xff] }
 0x3c9   :  { %1352 = vmatprep.subr.bf16.mxu0 %v5060_v8  ;;  %2720 = vmatprep.subr.bf16.mxu1 %v4978_v46  ;;  %v5068_v8 = vld [vmem:[#allocation42_spill] sm:$0xff] }
 0x3cc   :  { %1353 = vmatpush1.bf16.msra.mxu0 %v5061_v55  ;;  %2721 = vmatpush3.bf16.msra.mxu1 %v5062_v41  ;;  %v5070_v41 = vld [vmem:[#allocation44_spill] sm:$0xff]  ;;  %v5072_v55 = vld [vmem:[#allocation65_spill] sm:$0xff] }
 0x3cd   :  { %1354 = vmatprep.subr.bf16.mxu0 %v5063_v29  ;;  %2722 = vmatprep.subr.bf16.mxu1 %v4978_v46  ;;  %v5071_v29 = vld [vmem:[#allocation45_spill] sm:$0xff] }
 0x3d0   :  { %1355 = vmatpush1.bf16.msra.mxu0 %v5064_v11  ;;  %2723 = vmatpush3.bf16.msra.mxu1 %v5065_v36 }
 0x3d1   :  { %1356 = vmatprep.subr.bf16.mxu0 %v5066_v5  ;;  %2724 = vmatprep.subr.bf16.mxu1 %v4978_v46 }
 0x3d4   :  { %1357 = vmatpush1.bf16.msra.mxu0 %v5067_v13  ;;  %2725 = vmatpush3.bf16.msra.mxu1 %v5068_v8 }
 0x3d5   :  { %1358 = vmatprep.subr.bf16.mxu0 %v5069_v2  ;;  %2726 = vmatprep.subr.bf16.mxu1 %v4978_v46 }
 0x3d8   :  { %1359 = vmatpush1.bf16.msra.mxu0 %v5070_v41  ;;  %2727 = vmatpush3.bf16.msra.mxu1 %v5071_v29  ;;  %v5076_v41 = vld [vmem:[#allocation46_spill] sm:$0xff] }
 0x3d9   :  { %1425 = vmatprep.subr.bf16.mxu0 %v5072_v55  ;;  %2732 = vmatprep.subr.bf16.mxu1 %v4978_v46  ;;  %v805_v29 = vadd.f32 %v5077_v63, %v5076_v41 }
 0x43b   :  { %v4308_v36 = vpop.f32.mrf.mxu0  ;;  %v4310_v5 = vpop.f32.mrf.mxu1 }
 0x43c   :  { %5073 = vst [vmem:[#allocation68_spill] sm:$0xff] %v4308_v36  ;;  %5074 = vst [vmem:[#allocation57_spill] sm:$0xff] %v4310_v5  ;;  %v5079_v36 = vld [vmem:[#allocation78_spill] sm:$0xff] }
 0x43d   :  { %v4312_v11 = vpop.f32.mrf.mxu0  ;;  %v2670_v13 = vpop.f32.mrf.mxu1  ;;  %v807_v50 = vadd.f32 %v5079_v36, %v4161_v19  ;;  %v5081_v36 = vld [vmem:[#allocation59_spill] sm:$0xff] }
 0x43e   :  { %5075 = vst [vmem:[#allocation50_spill] sm:$0xff] %v4312_v11 }
 0x43f   :  { %v1095_v8 = vpop.f32.mrf.mxu0  ;;  %v1135_v37 = vpop.f32.mrf.mxu1 }
 0x441   :  { %v1096_v2 = vpop.f32.mrf.mxu0  ;;  %v2671_v52 = vpop.f32.mrf.mxu1 }
 0x45b   :  { %v1172_v0 = vpop.f32.mrf.mxu0  ;;  %v1213_v34 = vpop.f32.mrf.mxu1 }
 0x45c   :  { %v1173_v55 = vadd.f32 %v1172_v0, %v5078_v58 }
 0x45d   :  { %v1174_v30 = vpop.f32.mrf.mxu0  ;;  %v2690_v57 = vpop.f32.mrf.mxu1 }
 0x45e   :  { %v1219_v5 = vadd.f32 %v1173_v55, %v805_v29  ;;  %v1175_v11 = vadd.f32 %v1174_v30, %v5080_v25 }
 0x45f   :  { %v1176_v13 = vpop.f32.mrf.mxu0  ;;  %v1216_v8 = vpop.f32.mrf.mxu1 }
 0x460   :  { %v2326_v37 = vmul.f32 -1.442695, %v1219_v5  ;;  %v1220_v2 = vadd.f32 %v1175_v11, %v807_v50  ;;  %v5082_v13 = vld [vmem:[#allocation66_spill] sm:$0xff]  ;;  %v5083_v5 = vld [vmem:[#allocation52_spill] sm:$0xff] }
 0x461   :  { %v1177_v52 = vpop.f32.mrf.mxu0  ;;  %v2691_v48 = vpop.f32.mrf.mxu1  ;;  %v1214_v8 = vadd.f32 %v1213_v34, %v5082_v13 }
 0x462   :  { %2959 = vpow2.f32 %v2326_v37  ;;  %v2327_v43 = vmul.f32 -1.442695, %v1220_v2  ;;  %v5084_v48 = vld [vmem:[#allocation77_spill] sm:$0xff] }
 0x463   :  { %v846_v37 = vadd.f32 %v5084_v48, %v4176_v4 }
 0x464   :  { %2961 = vpow2.f32 %v2327_v43 }
 0x46f   :  { %v2960_v63 = vpop.eup %2959 }
 0x470   :  { %v1227_v41 = vadd.f32 1.0, %v2960_v63 }
 0x471   :  { %v2962_v0 = vpop.eup %2961 }
 0x472   :  { %2963 = vrcp.f32 %v1227_v41  ;;  %v1228_v21 = vadd.f32 1.0, %v2962_v0 }
 0x474   :  { %2965 = vrcp.f32 %v1228_v21 }
 0x47b   :  { %v1275_v57 = vpop.f32.mrf.mxu0  ;;  %v1316_v58 = vpop.f32.mrf.mxu1 }
 0x47c   :  { %v1276_v29 = vadd.f32 %v1275_v57, %v5081_v36 }
 0x47d   :  { %v1277_v55 = vpop.f32.mrf.mxu0  ;;  %v2710_v30 = vpop.f32.mrf.mxu1 }
 0x47e   :  { %v1322_v50 = vadd.f32 %v1276_v29, %v5083_v5  ;;  %v1278_v63 = vadd.f32 %v1277_v55, %v3723_v59  ;;  %v5085_v30 = vld [vmem:[#allocation53_spill] sm:$0xff] }
 0x47f   :  { %v2964_v11 = vpop.eup %2963  ;;  %v1279_v43 = vpop.f32.mrf.mxu0 }
 0x480   :  { %v1319_v2 = vpop.f32.mrf.mxu1  ;;  %v1233_v52 = vmul.f32 %v2964_v11, %v1214_v8  ;;  %v2328_v41 = vmul.f32 -1.442695, %v1322_v50  ;;  %v1323_v34 = vadd.f32 %v1278_v63, %v5085_v30  ;;  %v1317_v11 = vadd.f32 %v1316_v58, %v3737_v15 }
 0x481   :  { %v1280_v0 = vpop.f32.mrf.mxu0  ;;  %v2966_v29 = vpop.eup %2965 }
 0x482   :  { %v2711_v25 = vpop.f32.mrf.mxu1  ;;  %v1234_v57 = vadd.f32 %v1233_v52, %v846_v37  ;;  %2967 = vpow2.f32 %v2328_v41  ;;  %v2329_v13 = vmul.f32 -1.442695, %v1323_v34  ;;  %v1236_v48 = vsub.f32 1.0, %v2966_v29  ;;  %v5086_v52 = vld [vmem:[#allocation62_spill] sm:$0xff]  ;;  %v5088_v34 = vld [vmem:[#allocation9_spill] sm:$0xff] }
 0x483   :  { %v1238_v21 = vmul.f32 %v2966_v29, %v4186_v23  ;;  %v5089_v29 = vld [vmem:[#allocation10_spill] sm:$0xff] }
 0x484   :  { %2969 = vtanh.f32 %v1234_v57 }
 0x485   :  { %2971 = vpow2.f32 %v2329_v13 }
 0x48f   :  { %v2968_v5 = vpop.eup %2967 }
 0x490   :  { %v1330_v36 = vadd.f32 1.0, %v2968_v5  ;;  %v5090_v5 = vld [vmem:[#allocation18_spill] sm:$0xff] }
 0x491   :  { %v2970_v43 = vpop.eup %2969 }
 0x492   :  { %2973 = vrcp.f32 %v1330_v36  ;;  %v1237_v8 = vmul.f32 %v2970_v43, %v1236_v48  ;;  %v2972_v55 = vpop.eup %2971  ;;  %v5091_v48 = vld [vmem:[#allocation11_spill] sm:$0xff]  ;;  %v5092_v43 = vld [vmem:[#allocation12_spill] sm:$0xff] }
 0x493   :  { %v1331_v25 = vadd.f32 1.0, %v2972_v55  ;;  %v5095_v55 = vld [vmem:[#allocation14_spill] sm:$0xff] }
 0x494   :  { %v4328_v50 = vadd.f32 %v1238_v21, %v1237_v8  ;;  %v5093_v8 = vld [vmem:[#allocation19_spill] sm:$0xff]  ;;  %v5094_v21 = vld [vmem:[#allocation13_spill] sm:$0xff] }
 0x495   :  { %2975 = vrcp.f32 %v1331_v25  ;;  %v5096_v25 = vld [vmem:[#allocation20_spill] sm:$0xff] }
 0x496   :  { %v1240_v58 = vpack.c.bf16 %v4328_v50, %v4328_v50 }
 0x49f   :  { %v2974_v37 = vpop.eup %2973 }
 0x4a0   :  { %v1336_v2 = vmul.f32 %v2974_v37, %v1317_v11  ;;  %v5097_v11 = vld [vmem:[#allocation15_spill] sm:$0xff]  ;;  %v5098_v37 = vld [vmem:[#allocation16_spill] sm:$0xff] }
 0x4a2   :  { %v1337_v13 = vadd.f32 %v1336_v2, %v5086_v52  ;;  %v2976_v41 = vpop.eup %2975  ;;  %v5099_v2 = vld [vmem:[#allocation21_spill] sm:$0xff]  ;;  %v5100_v52 = vld [vmem:[#allocation22_spill] sm:$0xff] }
 0x4a3   :  { %v1339_v63 = vsub.f32 1.0, %v2976_v41  ;;  %v1341_v36 = vmul.f32 %v2976_v41, %v4191_v16  ;;  %v5087_v16 = vld [vmem:[#allocation17_spill] sm:$0xff]  ;;  %v5102_v41 = vld [vmem:[#allocation24_spill] sm:$0xff] }
 0x4a4   :  { %2977 = vtanh.f32 %v1337_v13  ;;  %v5101_v13 = vld [vmem:[#allocation23_spill] sm:$0xff] }
 0x4b1   :  { %v2978_v0 = vpop.eup %2977 }
 0x4b2   :  { %v1340_v57 = vmul.f32 %v2978_v0, %v1339_v63  ;;  %v5103_v63 = vld [vmem:[#allocation25_spill] sm:$0xff]  ;;  %v5104_v0 = vld [vmem:[#allocation26_spill] sm:$0xff] }
 0x4b4   :  { %v4333_v30 = vadd.f32 %v1341_v36, %v1340_v57  ;;  %v5105_v57 = vld [vmem:[#allocation27_spill] sm:$0xff]  ;;  %v5106_v36 = vld [vmem:[#allocation28_spill] sm:$0xff] }
 0x4b6   :  { %v4337_v23 = vpack.c.bf16 %v4333_v30, %v4333_v30 }
 0x4b8   :  { %1377 = vmatmul.mubr.bf16.vlgmr.msra.gmra.mxu0 %v4337_v23  ;;  %2729 = vmatmul.mubr.bf16.vlgmr.msra.gmra.mxu1 %v4337_v23 }
 0x4b9   :  { %1426 = vmatpush1.bf16.msra.mxu0 %v3856_v49  ;;  %2733 = vmatpush3.bf16.msra.mxu1 %v3858_v45 }
 0x4ba   :  { %1427 = vmatprep.subr.bf16.mxu0 %v3867_v32  ;;  %2734 = vmatprep.subr.bf16.mxu1 %v4978_v46 }
 0x4bb   :  { %1457 = vmatprep.mubr.bf16.mxu0 %v4979_v40  ;;  %2748 = vmatprep.mubr.msk.bf16.mxu1 %vm3085_vm1, %v4978_v46 }
 0x4bd   :  { %1428 = vmatpush1.bf16.msra.mxu0 %v3888_v56  ;;  %2735 = vmatpush3.bf16.msra.mxu1 %v3890_v61 }
 0x4be   :  { %1429 = vmatprep.subr.bf16.mxu0 %v5035_v28  ;;  %2736 = vmatprep.subr.bf16.mxu1 %v4978_v46 }
 0x4c1   :  { %1430 = vmatpush1.bf16.msra.mxu0 %v5036_v54  ;;  %2737 = vmatpush3.bf16.msra.mxu1 %v5037_v62 }
 0x4c2   :  { %1431 = vmatprep.subr.bf16.mxu0 %v5038_v38  ;;  %2738 = vmatprep.subr.bf16.mxu1 %v4978_v46 }
 0x4c5   :  { %1432 = vmatpush1.bf16.msra.mxu0 %v5039_v6  ;;  %2739 = vmatpush3.bf16.msra.mxu1 %v5040_v31 }
 0x4c6   :  { %1433 = vmatprep.subr.bf16.mxu0 %v5041_v12  ;;  %2740 = vmatprep.subr.bf16.mxu1 %v4978_v46 }
 0x4c9   :  { %1434 = vmatpush1.bf16.msra.mxu0 %v5042_v51  ;;  %2741 = vmatpush3.bf16.msra.mxu1 %v5043_v60 }
 0x4ca   :  { %1435 = vmatprep.subr.bf16.mxu0 %v5044_v47  ;;  %2742 = vmatprep.subr.bf16.mxu1 %v4978_v46 }
 0x4cd   :  { %1436 = vmatpush1.bf16.msra.mxu0 %v5045_v44  ;;  %2743 = vmatpush3.bf16.msra.mxu1 %v4005_v27 }
 0x4ce   :  { %1437 = vmatprep.subr.bf16.mxu0 %v4012_v20  ;;  %2744 = vmatprep.subr.bf16.mxu1 %v4978_v46 }
 0x4d1   :  { %1438 = vmatpush1.bf16.msra.mxu0 %v4031_v24  ;;  %2745 = vmatpush3.bf16.msra.mxu1 %v4033_v39 }
 0x4d2   :  { %1439 = vmatprep.subr.bf16.mxu0 %v4040_v3  ;;  %2746 = vmatprep.subr.bf16.mxu1 %v4978_v46 }
 0x4d5   :  { %1440 = vmatpush1.bf16.msra.mxu0 %v4053_v53  ;;  %2747 = vmatpush3.bf16.msra.mxu1 %v4055_v7 }
 0x4d6   :  { %1528 = vmatprep.subr.bf16.mxu0 %v5009_v1  ;;  %2752 = vmatprep.subr.bf16.mxu1 %v4978_v46 }
 0x4d8   :  { %1458 = vmatmul.mubr.bf16.vlgmr.msra.gmra.mxu0 %v1240_v58  ;;  %2749 = vmatmul.mubr.bf16.vlgmr.msra.gmra.mxu1 %v1240_v58  ;;  %v5108_v58 = vld [vmem:[#allocation30_spill] sm:$0xff] }
 0x4d9   :  { %1529 = vmatpush1.bf16.msra.mxu0 %v3182_v9  ;;  %2753 = vmatpush3.bf16.msra.mxu1 %v3367_v10 }
 0x4da   :  { %1530 = vmatprep.subr.bf16.mxu0 %v3204_v17  ;;  %2754 = vmatprep.subr.bf16.mxu1 %v4978_v46 }
 0x4db   :  { %1560 = vmatprep.mubr.bf16.mxu0 %v4979_v40  ;;  %2768 = vmatprep.mubr.msk.bf16.mxu1 %vm3085_vm1, %v4978_v46 }
 0x4dd   :  { %1531 = vmatpush1.bf16.msra.mxu0 %v3217_v22  ;;  %2755 = vmatpush3.bf16.msra.mxu1 %v3381_v14 }
 0x4de   :  { %1532 = vmatprep.subr.bf16.mxu0 %v3229_v26  ;;  %2756 = vmatprep.subr.bf16.mxu1 %v4978_v46 }
 0x4e1   :  { %1533 = vmatpush1.bf16.msra.mxu0 %v3247_v33  ;;  %2757 = vmatpush3.bf16.msra.mxu1 %v3394_v18 }
 0x4e2   :  { %1534 = vmatprep.subr.bf16.mxu0 %v3253_v35  ;;  %2758 = vmatprep.subr.bf16.mxu1 %v4978_v46 }
 0x4e5   :  { %1535 = vmatpush1.bf16.msra.mxu0 %v3275_v42  ;;  %2759 = vmatpush3.bf16.msra.mxu1 %v5087_v16 }
 0x4e6   :  { %1536 = vmatprep.subr.bf16.mxu0 %v5088_v34  ;;  %2760 = vmatprep.subr.bf16.mxu1 %v4978_v46 }
 0x4e9   :  { %1537 = vmatpush1.bf16.msra.mxu0 %v5089_v29  ;;  %2761 = vmatpush3.bf16.msra.mxu1 %v5090_v5  ;;  %v5132_v5 = vld [vmem:[#allocation47_spill] sm:$0xff] }
 0x4ea   :  { %1538 = vmatprep.subr.bf16.mxu0 %v5091_v48  ;;  %2762 = vmatprep.subr.bf16.mxu1 %v4978_v46 }
 0x4ed   :  { %1539 = vmatpush1.bf16.msra.mxu0 %v5092_v43  ;;  %2763 = vmatpush3.bf16.msra.mxu1 %v5093_v8 }
 0x4ee   :  { %1540 = vmatprep.subr.bf16.mxu0 %v5094_v21  ;;  %2764 = vmatprep.subr.bf16.mxu1 %v4978_v46  ;;  %v5130_v21 = vld [vmem:[#allocation79_spill] sm:$0xff] }
 0x4f1   :  { %1541 = vmatpush1.bf16.msra.mxu0 %v5095_v55  ;;  %2765 = vmatpush3.bf16.msra.mxu1 %v5096_v25  ;;  %v5129_v55 = vld [vmem:[#allocation68_spill] sm:$0xff] }
 0x4f2   :  { %1542 = vmatprep.subr.bf16.mxu0 %v5097_v11  ;;  %2766 = vmatprep.subr.bf16.mxu1 %v4978_v46 }
 0x4f5   :  { %1543 = vmatpush1.bf16.msra.mxu0 %v5098_v37  ;;  %2767 = vmatpush3.bf16.msra.mxu1 %v5099_v2 }
 0x4f6   :  { %1631 = vmatprep.subr.bf16.mxu0 %v5100_v52  ;;  %2772 = vmatprep.subr.bf16.mxu1 %v4978_v46  ;;  %v5112_v52 = vld [vmem:[#allocation34_spill] sm:$0xff] }
 0x4f8   :  { %1561 = vmatmul.mubr.bf16.vlgmr.msra.gmra.mxu0 %v4337_v23  ;;  %2769 = vmatmul.mubr.bf16.vlgmr.msra.gmra.mxu1 %v4337_v23  ;;  %v5107_v23 = vld [vmem:[#allocation29_spill] sm:$0xff] }
 0x4f9   :  { %1632 = vmatpush1.bf16.msra.mxu0 %v5101_v13  ;;  %2773 = vmatpush3.bf16.msra.mxu1 %v5102_v41  ;;  %v5110_v41 = vld [vmem:[#allocation32_spill] sm:$0xff]  ;;  %v5111_v13 = vld [vmem:[#allocation33_spill] sm:$0xff] }
 0x4fa   :  { %1633 = vmatprep.subr.bf16.mxu0 %v5103_v63  ;;  %2774 = vmatprep.subr.bf16.mxu1 %v4978_v46  ;;  %v5109_v63 = vld [vmem:[#allocation31_spill] sm:$0xff] }
 0x4fb   :  { %1663 = vmatprep.mubr.bf16.mxu0 %v4979_v40  ;;  %2788 = vmatprep.mubr.msk.bf16.mxu1 %vm3085_vm1, %v4978_v46 }
 0x4fd   :  { %1634 = vmatpush1.bf16.msra.mxu0 %v5104_v0  ;;  %2775 = vmatpush3.bf16.msra.mxu1 %v5105_v57  ;;  %v5113_v57 = vld [vmem:[#allocation35_spill] sm:$0xff]  ;;  %v5115_v0 = vld [vmem:[#allocation37_spill] sm:$0xff] }
 0x4fe   :  { %1635 = vmatprep.subr.bf16.mxu0 %v5106_v36  ;;  %2776 = vmatprep.subr.bf16.mxu1 %v4978_v46  ;;  %v5114_v36 = vld [vmem:[#allocation36_spill] sm:$0xff] }
 0x501   :  { %1636 = vmatpush1.bf16.msra.mxu0 %v5107_v23  ;;  %2777 = vmatpush3.bf16.msra.mxu1 %v5108_v58  ;;  %v5116_v58 = vld [vmem:[#allocation38_spill] sm:$0xff]  ;;  %v5118_v23 = vld [vmem:[#allocation40_spill] sm:$0xff] }
 0x502   :  { %1637 = vmatprep.subr.bf16.mxu0 %v5109_v63  ;;  %2778 = vmatprep.subr.bf16.mxu1 %v4978_v46  ;;  %v5117_v63 = vld [vmem:[#allocation39_spill] sm:$0xff] }
 0x505   :  { %1638 = vmatpush1.bf16.msra.mxu0 %v5110_v41  ;;  %2779 = vmatpush3.bf16.msra.mxu1 %v5111_v13  ;;  %v5119_v13 = vld [vmem:[#allocation41_spill] sm:$0xff]  ;;  %v5121_v41 = vld [vmem:[#allocation43_spill] sm:$0xff] }
 0x506   :  { %1639 = vmatprep.subr.bf16.mxu0 %v5112_v52  ;;  %2780 = vmatprep.subr.bf16.mxu1 %v4978_v46  ;;  %v5120_v52 = vld [vmem:[#allocation42_spill] sm:$0xff] }
 0x509   :  { %1640 = vmatpush1.bf16.msra.mxu0 %v5113_v57  ;;  %2781 = vmatpush3.bf16.msra.mxu1 %v5114_v36  ;;  %v5122_v36 = vld [vmem:[#allocation44_spill] sm:$0xff]  ;;  %v5124_v57 = vld [vmem:[#allocation65_spill] sm:$0xff] }
 0x50a   :  { %1641 = vmatprep.subr.bf16.mxu0 %v5115_v0  ;;  %2782 = vmatprep.subr.bf16.mxu1 %v4978_v46  ;;  %v5123_v0 = vld [vmem:[#allocation45_spill] sm:$0xff] }
 0x50d   :  { %1642 = vmatpush1.bf16.msra.mxu0 %v5116_v58  ;;  %2783 = vmatpush3.bf16.msra.mxu1 %v5117_v63 }
 0x50e   :  { %1643 = vmatprep.subr.bf16.mxu0 %v5118_v23  ;;  %2784 = vmatprep.subr.bf16.mxu1 %v4978_v46 }
 0x511   :  { %1644 = vmatpush1.bf16.msra.mxu0 %v5119_v13  ;;  %2785 = vmatpush3.bf16.msra.mxu1 %v5120_v52 }
 0x512   :  { %1645 = vmatprep.subr.bf16.mxu0 %v5121_v41  ;;  %2786 = vmatprep.subr.bf16.mxu1 %v4978_v46 }
 0x515   :  { %1646 = vmatpush1.bf16.msra.mxu0 %v5122_v36  ;;  %2787 = vmatpush3.bf16.msra.mxu1 %v5123_v0  ;;  %v5128_v36 = vld [vmem:[#allocation46_spill] sm:$0xff] }
 0x516   :  { %1712 = vmatprep.subr.bf16.mxu0 %v5124_v57  ;;  %2792 = vmatprep.subr.bf16.mxu1 %v4978_v46  ;;  %v1092_v0 = vadd.f32 %v5129_v55, %v5128_v36 }
 0x578   :  { %v4450_v63 = vpop.f32.mrf.mxu0  ;;  %v4452_v23 = vpop.f32.mrf.mxu1 }
 0x579   :  { %5125 = vst [vmem:[#allocation67_spill] sm:$0xff] %v4450_v63  ;;  %5126 = vst [vmem:[#allocation51_spill] sm:$0xff] %v4452_v23  ;;  %v5131_v63 = vld [vmem:[#allocation50_spill] sm:$0xff] }
 0x57a   :  { %v4454_v58 = vpop.f32.mrf.mxu0  ;;  %v2730_v13 = vpop.f32.mrf.mxu1  ;;  %v1094_v48 = vadd.f32 %v5131_v63, %v4161_v19  ;;  %v5133_v63 = vld [vmem:[#allocation59_spill] sm:$0xff] }
 0x57b   :  { %5127 = vst [vmem:[#allocation61_spill] sm:$0xff] %v4454_v58 }
 0x57c   :  { %v1382_v52 = vpop.f32.mrf.mxu0  ;;  %v1422_v2 = vpop.f32.mrf.mxu1 }
 0x57e   :  { %v1383_v41 = vpop.f32.mrf.mxu0  ;;  %v2731_v37 = vpop.f32.mrf.mxu1 }
 0x598   :  { %v1459_v11 = vpop.f32.mrf.mxu0  ;;  %v1500_v25 = vpop.f32.mrf.mxu1 }
 0x599   :  { %v1460_v57 = vadd.f32 %v1459_v11, %v5130_v21 }
 0x59a   :  { %v1461_v8 = vpop.f32.mrf.mxu0  ;;  %v2750_v43 = vpop.f32.mrf.mxu1 }
 0x59b   :  { %v1506_v23 = vadd.f32 %v1460_v57, %v1092_v0  ;;  %v1462_v58 = vadd.f32 %v1461_v8, %v5132_v5 }
 0x59c   :  { %v1463_v13 = vpop.f32.mrf.mxu0  ;;  %v1503_v52 = vpop.f32.mrf.mxu1 }
 0x59d   :  { %v2330_v2 = vmul.f32 -1.442695, %v1506_v23  ;;  %v1507_v41 = vadd.f32 %v1462_v58, %v1094_v48  ;;  %v5134_v13 = vld [vmem:[#allocation66_spill] sm:$0xff] }
 0x59e   :  { %v1464_v37 = vpop.f32.mrf.mxu0  ;;  %v2751_v29 = vpop.f32.mrf.mxu1  ;;  %v1501_v52 = vadd.f32 %v1500_v25, %v5134_v13  ;;  %v5135_v23 = vld [vmem:[#allocation54_spill] sm:$0xff] }
 0x59f   :  { %2979 = vpow2.f32 %v2330_v2  ;;  %v2331_v34 = vmul.f32 -1.442695, %v1507_v41  ;;  %v5136_v29 = vld [vmem:[#allocation57_spill] sm:$0xff] }
 0x5a0   :  { %v1133_v2 = vadd.f32 %v5136_v29, %v4176_v4 }
 0x5a1   :  { %2981 = vpow2.f32 %v2331_v34 }
 0x5ac   :  { %v2980_v55 = vpop.eup %2979 }
 0x5ad   :  { %v1514_v36 = vadd.f32 1.0, %v2980_v55 }
 0x5ae   :  { %v2982_v11 = vpop.eup %2981 }
 0x5af   :  { %2983 = vrcp.f32 %v1514_v36  ;;  %v1515_v16 = vadd.f32 1.0, %v2982_v11 }
 0x5b1   :  { %2985 = vrcp.f32 %v1515_v16 }
 0x5b8   :  { %v1562_v43 = vpop.f32.mrf.mxu0  ;;  %v1603_v21 = vpop.f32.mrf.mxu1 }
 0x5b9   :  { %v1563_v0 = vadd.f32 %v1562_v43, %v5133_v63 }
 0x5ba   :  { %v1564_v57 = vpop.f32.mrf.mxu0  ;;  %v2770_v8 = vpop.f32.mrf.mxu1 }
 0x5bb   :  { %v1609_v48 = vadd.f32 %v1563_v0, %v5135_v23  ;;  %v1565_v55 = vadd.f32 %v1564_v57, %v3723_v59  ;;  %v5137_v8 = vld [vmem:[#allocation55_spill] sm:$0xff] }
 0x5bc   :  { %v2984_v58 = vpop.eup %2983  ;;  %v1566_v34 = vpop.f32.mrf.mxu0 }
 0x5bd   :  { %v1606_v41 = vpop.f32.mrf.mxu1  ;;  %v1520_v37 = vmul.f32 %v2984_v58, %v1501_v52  ;;  %v2332_v36 = vmul.f32 -1.442695, %v1609_v48  ;;  %v1610_v25 = vadd.f32 %v1565_v55, %v5137_v8  ;;  %v1604_v58 = vadd.f32 %v1603_v21, %v3737_v15  ;;  %v5150_v21 = vld [vmem:[#allocation16_spill] sm:$0xff] }
 0x5be   :  { %v1567_v11 = vpop.f32.mrf.mxu0  ;;  %v2986_v0 = vpop.eup %2985 }
 0x5bf   :  { %v2771_v5 = vpop.f32.mrf.mxu1  ;;  %v1521_v43 = vadd.f32 %v1520_v37, %v1133_v2  ;;  %2987 = vpow2.f32 %v2332_v36  ;;  %v2333_v13 = vmul.f32 -1.442695, %v1610_v25  ;;  %v1523_v29 = vsub.f32 1.0, %v2986_v0  ;;  %v5138_v37 = vld [vmem:[#allocation63_spill] sm:$0xff]  ;;  %v5151_v25 = vld [vmem:[#allocation21_spill] sm:$0xff] }
 0x5c0   :  { %v1525_v16 = vmul.f32 %v2986_v0, %v4328_v50  ;;  %v5152_v0 = vld [vmem:[#allocation22_spill] sm:$0xff] }
 0x5c1   :  { %2989 = vtanh.f32 %v1521_v43 }
 0x5c2   :  { %2991 = vpow2.f32 %v2333_v13 }
 0x5cc   :  { %v2988_v23 = vpop.eup %2987 }
 0x5cd   :  { %v1617_v63 = vadd.f32 1.0, %v2988_v23  ;;  %v5153_v23 = vld [vmem:[#allocation23_spill] sm:$0xff] }
 0x5ce   :  { %v2990_v34 = vpop.eup %2989 }
 0x5cf   :  { %2993 = vrcp.f32 %v1617_v63  ;;  %v1524_v52 = vmul.f32 %v2990_v34, %v1523_v29  ;;  %v2992_v57 = vpop.eup %2991  ;;  %v5154_v29 = vld [vmem:[#allocation24_spill] sm:$0xff]  ;;  %v5155_v34 = vld [vmem:[#allocation25_spill] sm:$0xff] }
 0x5d0   :  { %v1618_v5 = vadd.f32 1.0, %v2992_v57  ;;  %v5158_v57 = vld [vmem:[#allocation28_spill] sm:$0xff] }
 0x5d1   :  { %v4470_v48 = vadd.f32 %v1525_v16, %v1524_v52  ;;  %v5156_v52 = vld [vmem:[#allocation26_spill] sm:$0xff]  ;;  %v5157_v16 = vld [vmem:[#allocation27_spill] sm:$0xff] }
 0x5d2   :  { %2995 = vrcp.f32 %v1618_v5  ;;  %v5159_v5 = vld [vmem:[#allocation29_spill] sm:$0xff] }
 0x5dc   :  { %v2994_v2 = vpop.eup %2993 }
 0x5dd   :  { %v1623_v41 = vmul.f32 %v2994_v2, %v1604_v58  ;;  %v5160_v58 = vld [vmem:[#allocation30_spill] sm:$0xff]  ;;  %v5161_v2 = vld [vmem:[#allocation31_spill] sm:$0xff] }
 0x5df   :  { %v1624_v13 = vadd.f32 %v1623_v41, %v5138_v37  ;;  %v2996_v36 = vpop.eup %2995  ;;  %v5162_v41 = vld [vmem:[#allocation32_spill] sm:$0xff]  ;;  %v5163_v37 = vld [vmem:[#allocation33_spill] sm:$0xff] }
 0x5e0   :  { %v1626_v55 = vsub.f32 1.0, %v2996_v36  ;;  %v1628_v63 = vmul.f32 %v2996_v36, %v4333_v30  ;;  %v1527_v30 = vpack.c.bf16 %v4470_v48, %v4470_v48  ;;  %v5165_v36 = vld [vmem:[#allocation35_spill] sm:$0xff] }
 0x5e1   :  { %2997 = vtanh.f32 %v1624_v13  ;;  %v5164_v13 = vld [vmem:[#allocation34_spill] sm:$0xff] }
 0x5ee   :  { %v2998_v11 = vpop.eup %2997 }
 0x5ef   :  { %v1627_v43 = vmul.f32 %v2998_v11, %v1626_v55  ;;  %v5166_v55 = vld [vmem:[#allocation36_spill] sm:$0xff]  ;;  %v5167_v11 = vld [vmem:[#allocation37_spill] sm:$0xff] }
 0x5f1   :  { %v4475_v8 = vadd.f32 %v1628_v63, %v1627_v43  ;;  %v5168_v43 = vld [vmem:[#allocation38_spill] sm:$0xff]  ;;  %v5169_v63 = vld [vmem:[#allocation39_spill] sm:$0xff] }
 0x5f3   :  { %v4479_v50 = vpack.c.bf16 %v4475_v8, %v4475_v8 }
 0x5f5   :  { %1664 = vmatmul.mubr.bf16.vlgmr.msra.gmra.mxu0 %v4479_v50  ;;  %2789 = vmatmul.mubr.bf16.vlgmr.msra.gmra.mxu1 %v4479_v50 }
 0x5f6   :  { %1713 = vmatpush1.bf16.msra.mxu0 %v3856_v49  ;;  %2793 = vmatpush3.bf16.msra.mxu1 %v3858_v45 }
 0x5f7   :  { %1714 = vmatprep.subr.bf16.mxu0 %v3867_v32  ;;  %2794 = vmatprep.subr.bf16.mxu1 %v4978_v46 }
 0x5f8   :  { %1744 = vmatprep.mubr.bf16.mxu0 %v4979_v40  ;;  %2808 = vmatprep.mubr.msk.bf16.mxu1 %vm3085_vm1, %v4978_v46 }
 0x5fa   :  { %1715 = vmatpush1.bf16.msra.mxu0 %v3888_v56  ;;  %2795 = vmatpush3.bf16.msra.mxu1 %v3890_v61 }
 0x5fb   :  { %1716 = vmatprep.subr.bf16.mxu0 %v5035_v28  ;;  %2796 = vmatprep.subr.bf16.mxu1 %v4978_v46 }
 0x5fe   :  { %1717 = vmatpush1.bf16.msra.mxu0 %v5036_v54  ;;  %2797 = vmatpush3.bf16.msra.mxu1 %v5037_v62 }
 0x5ff   :  { %1718 = vmatprep.subr.bf16.mxu0 %v5038_v38  ;;  %2798 = vmatprep.subr.bf16.mxu1 %v4978_v46 }
 0x602   :  { %1719 = vmatpush1.bf16.msra.mxu0 %v5039_v6  ;;  %2799 = vmatpush3.bf16.msra.mxu1 %v5040_v31 }
 0x603   :  { %1720 = vmatprep.subr.bf16.mxu0 %v5041_v12  ;;  %2800 = vmatprep.subr.bf16.mxu1 %v4978_v46 }
 0x606   :  { %1721 = vmatpush1.bf16.msra.mxu0 %v5042_v51  ;;  %2801 = vmatpush3.bf16.msra.mxu1 %v5043_v60 }
 0x607   :  { %1722 = vmatprep.subr.bf16.mxu0 %v5044_v47  ;;  %2802 = vmatprep.subr.bf16.mxu1 %v4978_v46 }
 0x60a   :  { %1723 = vmatpush1.bf16.msra.mxu0 %v5045_v44  ;;  %2803 = vmatpush3.bf16.msra.mxu1 %v4005_v27 }
 0x60b   :  { %1724 = vmatprep.subr.bf16.mxu0 %v4012_v20  ;;  %2804 = vmatprep.subr.bf16.mxu1 %v4978_v46 }
 0x60e   :  { %1725 = vmatpush1.bf16.msra.mxu0 %v4031_v24  ;;  %2805 = vmatpush3.bf16.msra.mxu1 %v4033_v39 }
 0x60f   :  { %1726 = vmatprep.subr.bf16.mxu0 %v4040_v3  ;;  %2806 = vmatprep.subr.bf16.mxu1 %v4978_v46 }
 0x612   :  { %1727 = vmatpush1.bf16.msra.mxu0 %v4053_v53  ;;  %2807 = vmatpush3.bf16.msra.mxu1 %v4055_v7 }
 0x613   :  { %1815 = vmatprep.subr.bf16.mxu0 %v5009_v1  ;;  %2812 = vmatprep.subr.bf16.mxu1 %v4978_v46  ;;  %v5149_v1 = vld [vmem:[#allocation15_spill] sm:$0xff] }
 0x615   :  { %1745 = vmatmul.mubr.bf16.vlgmr.msra.gmra.mxu0 %v1527_v30  ;;  %2809 = vmatmul.mubr.bf16.vlgmr.msra.gmra.mxu1 %v1527_v30  ;;  %v5171_v30 = vld [vmem:[#allocation41_spill] sm:$0xff] }
 0x616   :  { %1816 = vmatpush1.bf16.msra.mxu0 %v3182_v9  ;;  %2813 = vmatpush3.bf16.msra.mxu1 %v3367_v10  ;;  %v5139_v9 = vld [vmem:[#allocation17_spill] sm:$0xff]  ;;  %v5143_v10 = vld [vmem:[#allocation11_spill] sm:$0xff] }
 0x617   :  { %1817 = vmatprep.subr.bf16.mxu0 %v3204_v17  ;;  %2814 = vmatprep.subr.bf16.mxu1 %v4978_v46  ;;  %v5140_v17 = vld [vmem:[#allocation9_spill] sm:$0xff] }
 0x618   :  { %1847 = vmatprep.mubr.bf16.mxu0 %v4979_v40  ;;  %2828 = vmatprep.mubr.msk.bf16.mxu1 %vm3085_vm1, %v4978_v46 }
 0x61a   :  { %1818 = vmatpush1.bf16.msra.mxu0 %v3217_v22  ;;  %2815 = vmatpush3.bf16.msra.mxu1 %v3381_v14  ;;  %v5141_v22 = vld [vmem:[#allocation10_spill] sm:$0xff]  ;;  %v5146_v14 = vld [vmem:[#allocation13_spill] sm:$0xff] }
 0x61b   :  { %1819 = vmatprep.subr.bf16.mxu0 %v3229_v26  ;;  %2816 = vmatprep.subr.bf16.mxu1 %v4978_v46  ;;  %v5142_v26 = vld [vmem:[#allocation18_spill] sm:$0xff] }
 0x61e   :  { %1820 = vmatpush1.bf16.msra.mxu0 %v3247_v33  ;;  %2817 = vmatpush3.bf16.msra.mxu1 %v3394_v18  ;;  %v5144_v33 = vld [vmem:[#allocation12_spill] sm:$0xff] }
 0x61f   :  { %1821 = vmatprep.subr.bf16.mxu0 %v3253_v35  ;;  %2818 = vmatprep.subr.bf16.mxu1 %v4978_v46  ;;  %v5145_v35 = vld [vmem:[#allocation19_spill] sm:$0xff]  ;;  %v5148_v18 = vld [vmem:[#allocation20_spill] sm:$0xff] }
 0x622   :  { %1822 = vmatpush1.bf16.msra.mxu0 %v3275_v42  ;;  %2819 = vmatpush3.bf16.msra.mxu1 %v5139_v9  ;;  %v5147_v42 = vld [vmem:[#allocation14_spill] sm:$0xff] }
 0x623   :  { %1823 = vmatprep.subr.bf16.mxu0 %v5140_v17  ;;  %2820 = vmatprep.subr.bf16.mxu1 %v4978_v46  ;;  %v5172_v9 = vld [vmem:[#allocation42_spill] sm:$0xff]  ;;  %v5173_v17 = vld [vmem:[#allocation43_spill] sm:$0xff] }
 0x626   :  { %1824 = vmatpush1.bf16.msra.mxu0 %v5141_v22  ;;  %2821 = vmatpush3.bf16.msra.mxu1 %v5142_v26  ;;  %v5174_v22 = vld [vmem:[#allocation44_spill] sm:$0xff]  ;;  %v5175_v26 = vld [vmem:[#allocation45_spill] sm:$0xff] }
 0x627   :  { %1825 = vmatprep.subr.bf16.mxu0 %v5143_v10  ;;  %2822 = vmatprep.subr.bf16.mxu1 %v4978_v46  ;;  %v5176_v10 = vld [vmem:[#allocation65_spill] sm:$0xff] }
 0x62a   :  { %1826 = vmatpush1.bf16.msra.mxu0 %v5144_v33  ;;  %2823 = vmatpush3.bf16.msra.mxu1 %v5145_v35 }
 0x62b   :  { %1827 = vmatprep.subr.bf16.mxu0 %v5146_v14  ;;  %2824 = vmatprep.subr.bf16.mxu1 %v4978_v46 }
 0x62e   :  { %1828 = vmatpush1.bf16.msra.mxu0 %v5147_v42  ;;  %2825 = vmatpush3.bf16.msra.mxu1 %v5148_v18 }
 0x62f   :  { %1829 = vmatprep.subr.bf16.mxu0 %v5149_v1  ;;  %2826 = vmatprep.subr.bf16.mxu1 %v4978_v46 }
 0x632   :  { %1830 = vmatpush1.bf16.msra.mxu0 %v5150_v21  ;;  %2827 = vmatpush3.bf16.msra.mxu1 %v5151_v25 }
 0x633   :  { %1918 = vmatprep.subr.bf16.mxu0 %v5152_v0  ;;  %2832 = vmatprep.subr.bf16.mxu1 %v4978_v46 }
 0x635   :  { %1848 = vmatmul.mubr.bf16.vlgmr.msra.gmra.mxu0 %v4479_v50  ;;  %2829 = vmatmul.mubr.bf16.vlgmr.msra.gmra.mxu1 %v4479_v50  ;;  %v5170_v50 = vld [vmem:[#allocation40_spill] sm:$0xff] }
 0x636   :  { %1919 = vmatpush1.bf16.msra.mxu0 %v5153_v23  ;;  %2833 = vmatpush3.bf16.msra.mxu1 %v5154_v29  ;;  %v5177_v29 = vld [vmem:[#allocation46_spill] sm:$0xff] }
 0x637   :  { %1920 = vmatprep.subr.bf16.mxu0 %v5155_v34  ;;  %2834 = vmatprep.subr.bf16.mxu1 %v4978_v46  ;;  %v5178_v34 = vld [vmem:[#allocation67_spill] sm:$0xff] }
 0x638   :  { %1950 = vmatprep.mubr.bf16.mxu0 %v4979_v40  ;;  %2848 = vmatprep.mubr.msk.bf16.mxu1 %vm3085_vm1, %v4978_v46 }
 0x63a   :  { %1921 = vmatpush1.bf16.msra.mxu0 %v5156_v52  ;;  %2835 = vmatpush3.bf16.msra.mxu1 %v5157_v16  ;;  %v1379_v52 = vadd.f32 %v5178_v34, %v5177_v29  ;;  %v5179_v16 = vld [vmem:[#allocation79_spill] sm:$0xff] }
 0x63b   :  { %1922 = vmatprep.subr.bf16.mxu0 %v5158_v57  ;;  %2836 = vmatprep.subr.bf16.mxu1 %v4978_v46 }
 0x63e   :  { %1923 = vmatpush1.bf16.msra.mxu0 %v5159_v5  ;;  %2837 = vmatpush3.bf16.msra.mxu1 %v5160_v58 }
 0x63f   :  { %1924 = vmatprep.subr.bf16.mxu0 %v5161_v2  ;;  %2838 = vmatprep.subr.bf16.mxu1 %v4978_v46  ;;  %v5180_v2 = vld [vmem:[#allocation61_spill] sm:$0xff] }
 0x642   :  { %1925 = vmatpush1.bf16.msra.mxu0 %v5162_v41  ;;  %2839 = vmatpush3.bf16.msra.mxu1 %v5163_v37  ;;  %v1381_v41 = vadd.f32 %v5180_v2, %v4161_v19 }
 0x643   :  { %1926 = vmatprep.subr.bf16.mxu0 %v5164_v13  ;;  %2840 = vmatprep.subr.bf16.mxu1 %v4978_v46  ;;  %v5181_v13 = vld [vmem:[#allocation47_spill] sm:$0xff] }
 0x646   :  { %1927 = vmatpush1.bf16.msra.mxu0 %v5165_v36  ;;  %2841 = vmatpush3.bf16.msra.mxu1 %v5166_v55 }
 0x647   :  { %1928 = vmatprep.subr.bf16.mxu0 %v5167_v11  ;;  %2842 = vmatprep.subr.bf16.mxu1 %v4978_v46 }
 0x64a   :  { %1929 = vmatpush1.bf16.msra.mxu0 %v5168_v43  ;;  %2843 = vmatpush3.bf16.msra.mxu1 %v5169_v63 }
 0x64b   :  { %1930 = vmatprep.subr.bf16.mxu0 %v5170_v50  ;;  %2844 = vmatprep.subr.bf16.mxu1 %v4978_v46 }
 0x64e   :  { %1931 = vmatpush1.bf16.msra.mxu0 %v5171_v30  ;;  %2845 = vmatpush3.bf16.msra.mxu1 %v5172_v9 }
 0x64f   :  { %1932 = vmatprep.subr.bf16.mxu0 %v5173_v17  ;;  %2846 = vmatprep.subr.bf16.mxu1 %v4978_v46 }
 0x652   :  { %1933 = vmatpush1.bf16.msra.mxu0 %v5174_v22  ;;  %2847 = vmatpush3.bf16.msra.mxu1 %v5175_v26 }
 0x653   :  { %1999 = vmatprep.subr.bf16.mxu0 %v5176_v10  ;;  %2852 = vmatprep.subr.bf16.mxu1 %v4978_v46 }
 0x6b5   :  { %v4592_v33 = vpop.f32.mrf.mxu0  ;;  %v4594_v35 = vpop.f32.mrf.mxu1 }
 0x6b7   :  { %v4596_v14 = vpop.f32.mrf.mxu0  ;;  %v2790_v42 = vpop.f32.mrf.mxu1 }
 0x6b9   :  { %v1669_v18 = vpop.f32.mrf.mxu0  ;;  %v1709_v1 = vpop.f32.mrf.mxu1 }
 0x6bb   :  { %v1670_v21 = vpop.f32.mrf.mxu0  ;;  %v2791_v25 = vpop.f32.mrf.mxu1 }
 0x6bc   :  { %v5182_v21 = vld [vmem:[#allocation59_spill] sm:$0xff] }
 0x6d5   :  { %v1746_v0 = vpop.f32.mrf.mxu0  ;;  %v1787_v23 = vpop.f32.mrf.mxu1 }
 0x6d6   :  { %v1747_v57 = vadd.f32 %v1746_v0, %v5179_v16 }
 0x6d7   :  { %v1748_v5 = vpop.f32.mrf.mxu0  ;;  %v2810_v58 = vpop.f32.mrf.mxu1 }
 0x6d8   :  { %v1793_v37 = vadd.f32 %v1747_v57, %v1379_v52  ;;  %v1749_v36 = vadd.f32 %v1748_v5, %v5181_v13  ;;  %v5183_v52 = vld [vmem:[#allocation66_spill] sm:$0xff]  ;;  %v5184_v5 = vld [vmem:[#allocation56_spill] sm:$0xff] }
 0x6d9   :  { %v1750_v55 = vpop.f32.mrf.mxu0  ;;  %v1790_v11 = vpop.f32.mrf.mxu1  ;;  %v1788_v57 = vadd.f32 %v1787_v23, %v5183_v52 }
 0x6da   :  { %v2334_v43 = vmul.f32 -1.442695, %v1793_v37  ;;  %v1794_v63 = vadd.f32 %v1749_v36, %v1381_v41  ;;  %v5185_v41 = vld [vmem:[#allocation51_spill] sm:$0xff] }
 0x6db   :  { %v1751_v50 = vpop.f32.mrf.mxu0  ;;  %v2811_v30 = vpop.f32.mrf.mxu1  ;;  %v1420_v37 = vadd.f32 %v5185_v41, %v4176_v4 }
 0x6dc   :  { %2999 = vpow2.f32 %v2334_v43  ;;  %v2335_v9 = vmul.f32 -1.442695, %v1794_v63 }
 0x6de   :  { %3001 = vpow2.f32 %v2335_v9 }
 0x6e9   :  { %v3000_v17 = vpop.eup %2999 }
 0x6ea   :  { %v1801_v22 = vadd.f32 1.0, %v3000_v17  ;;  %v5186_v17 = vld [vmem:[#allocation58_spill] sm:$0xff] }
 0x6eb   :  { %v3002_v26 = vpop.eup %3001 }
 0x6ec   :  { %3003 = vrcp.f32 %v1801_v22  ;;  %v1802_v1 = vadd.f32 1.0, %v3002_v26 }
 0x6ee   :  { %3005 = vrcp.f32 %v1802_v1 }
 0x6f5   :  { %v1849_v42 = vpop.f32.mrf.mxu0  ;;  %v1890_v18 = vpop.f32.mrf.mxu1 }
 0x6f6   :  { %v1850_v25 = vadd.f32 %v1849_v42, %v5182_v21 }
 0x6f7   :  { %v1851_v0 = vpop.f32.mrf.mxu0  ;;  %v2830_v34 = vpop.f32.mrf.mxu1 }
 0x6f8   :  { %v1896_v58 = vadd.f32 %v1850_v25, %v5184_v5  ;;  %v1852_v63 = vadd.f32 %v1851_v0, %v3723_v59 }
 0x6f9   :  { %v3004_v2 = vpop.eup %3003  ;;  %v1853_v36 = vpop.f32.mrf.mxu0 }
 0x6fa   :  { %v1893_v55 = vpop.f32.mrf.mxu1  ;;  %v1807_v11 = vmul.f32 %v3004_v2, %v1788_v57  ;;  %v2336_v43 = vmul.f32 -1.442695, %v1896_v58  ;;  %v1897_v23 = vadd.f32 %v1852_v63, %v5186_v17  ;;  %v1891_v58 = vadd.f32 %v1890_v18, %v3737_v15 }
 0x6fb   :  { %v1854_v50 = vpop.f32.mrf.mxu0  ;;  %v3006_v26 = vpop.eup %3005 }
 0x6fc   :  { %v2831_v30 = vpop.f32.mrf.mxu1  ;;  %v1808_v9 = vadd.f32 %v1807_v11, %v1420_v37  ;;  %3007 = vpow2.f32 %v2336_v43  ;;  %v2337_v22 = vmul.f32 -1.442695, %v1897_v23  ;;  %v1810_v25 = vsub.f32 1.0, %v3006_v26  ;;  %v5187_v37 = vld [vmem:[#allocation64_spill] sm:$0xff] }
 0x6fd   :  { %v1812_v1 = vmul.f32 %v3006_v26, %v4470_v48  ;;  %v1707_v23 = vadd.f32 %v4594_v35, %v4176_v4  ;;  %v2223_v35 = vld [vmem:[%s4793_s9 + $0x70] sm:$0xff] }
 0x6fe   :  { %3009 = vtanh.f32 %v1808_v9 }
 0x6ff   :  { %3011 = vpow2.f32 %v2337_v22 }
 0x709   :  { %v3008_v42 = vpop.eup %3007 }
 0x70a   :  { %v1904_v21 = vadd.f32 1.0, %v3008_v42 }
 0x70b   :  { %v3010_v34 = vpop.eup %3009 }
 0x70c   :  { %3013 = vrcp.f32 %v1904_v21  ;;  %v1811_v57 = vmul.f32 %v3010_v34, %v1810_v25  ;;  %v3012_v59 = vpop.eup %3011 }
 0x70d   :  { %v1905_v0 = vadd.f32 1.0, %v3012_v59  ;;  %v2224_v59 = vld [vmem:[%s4793_s9 + $0x78] sm:$0xff] }
 0x70e   :  { %v4612_v5 = vadd.f32 %v1812_v1, %v1811_v57 }
 0x70f   :  { %3015 = vrcp.f32 %v1905_v0  ;;  %v2232_v0 = vpack.c.bf16 %v2224_v59, %v2223_v35 }
 0x710   :  { %v1814_v15 = vpack.c.bf16 %v4612_v5, %v4612_v5 }
 0x719   :  { %v3014_v2 = vpop.eup %3013 }
 0x71a   :  { %v1910_v41 = vmul.f32 %v3014_v2, %v1891_v58  ;;  %v2222_v58 = vld [vmem:[%s4793_s9 + $0x68] sm:$0xff] }
 0x71c   :  { %v1911_v36 = vadd.f32 %v1910_v41, %v5187_v37  ;;  %v3016_v55 = vpop.eup %3015  ;;  %v2219_v41 = vld [vmem:[%s4793_s9 + $0x50] sm:$0xff]  ;;  %v2220_v37 = vld [vmem:[%s4793_s9 + $0x58] sm:$0xff] }
 0x71d   :  { %v1913_v11 = vsub.f32 1.0, %v3016_v55  ;;  %v1915_v50 = vmul.f32 %v3016_v55, %v4475_v8  ;;  %v2217_v55 = vld [vmem:[%s4793_s9 + $0x40] sm:$0xff] }
 0x71e   :  { %3017 = vtanh.f32 %v1911_v36  ;;  %v2230_v36 = vpack.c.bf16 %v2220_v37, %v2219_v41 }
 0x72b   :  { %v3018_v43 = vpop.eup %3017 }
 0x72c   :  { %v1914_v63 = vmul.f32 %v3018_v43, %v1913_v11  ;;  %v2218_v11 = vld [vmem:[%s4793_s9 + $0x48] sm:$0xff]  ;;  %v2215_v43 = vld [vmem:[%s4793_s9 + $0x30] sm:$0xff] }
 0x72e   :  { %v1916_v30 = vadd.f32 %v1915_v50, %v1914_v63  ;;  %v2229_v63 = vpack.c.bf16 %v2218_v11, %v2217_v55  ;;  %v2216_v50 = vld [vmem:[%s4793_s9 + $0x38] sm:$0xff] }
 0x730   :  { %v1917_v48 = vpack.c.bf16 %v1916_v30, %v1916_v30  ;;  %2204 = vst [vmem:[#allocation4] sm:$0xff] %v1916_v30  ;;  %v2228_v30 = vpack.c.bf16 %v2216_v50, %v2215_v43 }
 0x732   :  { %1951 = vmatmul.mubr.bf16.vlgmr.msra.gmra.mxu0 %v1917_v48  ;;  %2849 = vmatmul.mubr.bf16.vlgmr.msra.gmra.mxu1 %v1917_v48  ;;  %v2213_v48 = vld [vmem:[%s4793_s9 + $0x20] sm:$0xff] }
 0x733   :  { %2000 = vmatpush1.bf16.msra.mxu0 %v3856_v49  ;;  %2853 = vmatpush3.bf16.msra.mxu1 %v3858_v45 }
 0x734   :  { %2001 = vmatprep.subr.bf16.mxu0 %v3867_v32  ;;  %2854 = vmatprep.subr.bf16.mxu1 %v4978_v46 }
 0x735   :  { %2031 = vmatprep.mubr.bf16.mxu0 %v4979_v40  ;;  %2868 = vmatprep.mubr.msk.bf16.mxu1 %vm3085_vm1, %v4978_v46 }
 0x737   :  { %2002 = vmatpush1.bf16.msra.mxu0 %v3888_v56  ;;  %2855 = vmatpush3.bf16.msra.mxu1 %v3890_v61 }
 0x738   :  { %2003 = vmatprep.subr.bf16.mxu0 %v5035_v28  ;;  %2856 = vmatprep.subr.bf16.mxu1 %v4978_v46 }
 0x73b   :  { %2004 = vmatpush1.bf16.msra.mxu0 %v5036_v54  ;;  %2857 = vmatpush3.bf16.msra.mxu1 %v5037_v62 }
 0x73c   :  { %2005 = vmatprep.subr.bf16.mxu0 %v5038_v38  ;;  %2858 = vmatprep.subr.bf16.mxu1 %v4978_v46 }
 0x73f   :  { %2006 = vmatpush1.bf16.msra.mxu0 %v5039_v6  ;;  %2859 = vmatpush3.bf16.msra.mxu1 %v5040_v31 }
 0x740   :  { %2007 = vmatprep.subr.bf16.mxu0 %v5041_v12  ;;  %2860 = vmatprep.subr.bf16.mxu1 %v4978_v46 }
 0x743   :  { %2008 = vmatpush1.bf16.msra.mxu0 %v5042_v51  ;;  %2861 = vmatpush3.bf16.msra.mxu1 %v5043_v60 }
 0x744   :  { %2009 = vmatprep.subr.bf16.mxu0 %v5044_v47  ;;  %2862 = vmatprep.subr.bf16.mxu1 %v4978_v46 }
 0x747   :  { %2010 = vmatpush1.bf16.msra.mxu0 %v5045_v44  ;;  %2863 = vmatpush3.bf16.msra.mxu1 %v4005_v27 }
 0x748   :  { %2011 = vmatprep.subr.bf16.mxu0 %v4012_v20  ;;  %2864 = vmatprep.subr.bf16.mxu1 %v4978_v46 }
 0x74b   :  { %2012 = vmatpush1.bf16.msra.mxu0 %v4031_v24  ;;  %2865 = vmatpush3.bf16.msra.mxu1 %v4033_v39 }
 0x74c   :  { %2013 = vmatprep.subr.bf16.mxu0 %v4040_v3  ;;  %2866 = vmatprep.subr.bf16.mxu1 %v4978_v46 }
 0x74f   :  { %2014 = vmatpush1.bf16.msra.mxu0 %v4053_v53  ;;  %2867 = vmatpush3.bf16.msra.mxu1 %v4055_v7 }
 0x750   :  { %2102 = vmatprep.subr.bf16.mxu0 %v5176_v10  ;;  %2872 = vmatprep.subr.bf16.mxu1 %v4978_v46 }
 0x752   :  { %2032 = vmatmul.mubr.bf16.vlgmr.msra.gmra.mxu0 %v1814_v15  ;;  %2869 = vmatmul.mubr.bf16.vlgmr.msra.gmra.mxu1 %v1814_v15  ;;  %v2214_v15 = vld [vmem:[%s4793_s9 + $0x28] sm:$0xff] }
 0x753   :  { %2103 = vmatpush1.bf16.msra.mxu0 %v3856_v49  ;;  %2873 = vmatpush3.bf16.msra.mxu1 %v3858_v45 }
 0x754   :  { %2104 = vmatprep.subr.bf16.mxu0 %v3867_v32  ;;  %2874 = vmatprep.subr.bf16.mxu1 %v4978_v46 }
 0x755   :  { %2134 = vmatprep.mubr.bf16.mxu0 %v4979_v40  ;;  %2888 = vmatprep.mubr.msk.bf16.mxu1 %vm3085_vm1, %v4978_v46 }
 0x757   :  { %2105 = vmatpush1.bf16.msra.mxu0 %v3888_v56  ;;  %2875 = vmatpush3.bf16.msra.mxu1 %v3890_v61 }
 0x758   :  { %2106 = vmatprep.subr.bf16.mxu0 %v5035_v28  ;;  %2876 = vmatprep.subr.bf16.mxu1 %v4978_v46 }
 0x75b   :  { %2107 = vmatpush1.bf16.msra.mxu0 %v5036_v54  ;;  %2877 = vmatpush3.bf16.msra.mxu1 %v5037_v62 }
 0x75c   :  { %2108 = vmatprep.subr.bf16.mxu0 %v5038_v38  ;;  %2878 = vmatprep.subr.bf16.mxu1 %v4978_v46 }
 0x75f   :  { %2109 = vmatpush1.bf16.msra.mxu0 %v5039_v6  ;;  %2879 = vmatpush3.bf16.msra.mxu1 %v5040_v31 }
 0x760   :  { %2110 = vmatprep.subr.bf16.mxu0 %v5041_v12  ;;  %2880 = vmatprep.subr.bf16.mxu1 %v4978_v46 }
 0x763   :  { %2111 = vmatpush1.bf16.msra.mxu0 %v5042_v51  ;;  %2881 = vmatpush3.bf16.msra.mxu1 %v5043_v60  ;;  %v1668_v60 = vadd.f32 %v4596_v14, %v4161_v19 }
 0x764   :  { %2112 = vmatprep.subr.bf16.mxu0 %v5044_v47  ;;  %2882 = vmatprep.subr.bf16.mxu1 %v4978_v46 }
 0x767   :  { %2113 = vmatpush1.bf16.msra.mxu0 %v5045_v44  ;;  %2883 = vmatpush3.bf16.msra.mxu1 %v4005_v27 }
 0x768   :  { %2114 = vmatprep.subr.bf16.mxu0 %v4012_v20  ;;  %2884 = vmatprep.subr.bf16.mxu1 %v4978_v46 }
 0x76b   :  { %2115 = vmatpush1.bf16.msra.mxu0 %v4031_v24  ;;  %2885 = vmatpush3.bf16.msra.mxu1 %v4033_v39  ;;  %v1666_v39 = vadd.f32 %v4592_v33, %v5177_v29 }
 0x76c   :  { %2116 = vmatprep.subr.bf16.mxu0 %v4040_v3  ;;  %2886 = vmatprep.subr.bf16.mxu1 %v4978_v46 }
 0x76f   :  { %2117 = vmatpush1.bf16.msra.mxu0 %v4053_v53  ;;  %2887 = vmatpush3.bf16.msra.mxu1 %v4055_v7 }
 0x770   :  { %2892 = vmatprep.subr.bf16.mxu0 %v4978_v46 }
 0x7f2   :  { %v4688_v40 = vpop.f32.mrf.mxu0  ;;  %v4690_v49 = vpop.f32.mrf.mxu1 }
 0x7f4   :  { %v4692_v45 = vpop.f32.mrf.mxu0  ;;  %v2850_v32 = vpop.f32.mrf.mxu1 }
 0x7f5   :  { %v2227_v32 = vpack.c.bf16 %v2214_v15, %v2213_v48 }
 0x7f6   :  { %v1956_v56 = vpop.f32.mrf.mxu0  ;;  %v1996_v61 = vpop.f32.mrf.mxu1 }
 0x7f7   :  { %v2211_v56 = vld [vmem:[%s4793_s9 + $0x10] sm:$0xff]  ;;  %v2212_v61 = vld [vmem:[%s4793_s9 + $0x18] sm:$0xff] }
 0x7f8   :  { %v1957_v20 = vpop.f32.mrf.mxu0  ;;  %v2851_v27 = vpop.f32.mrf.mxu1 }
 0x7f9   :  { %v2226_v20 = vpack.c.bf16 %v2212_v61, %v2211_v56  ;;  %v2209_v27 = vld [vmem:[%s4793_s9] sm:$0xff] }
 0x812   :  { %v2033_v3 = vpop.f32.mrf.mxu0  ;;  %v2074_v24 = vpop.f32.mrf.mxu1 }
 0x813   :  { %v2034_v53 = vadd.f32 %v2033_v3, %v5179_v16  ;;  %v2075_v9 = vadd.f32 %v2074_v24, %v5183_v52  ;;  %v2210_v3 = vld [vmem:[%s4793_s9 + $0x8] sm:$0xff] }
 0x814   :  { %v2035_v7 = vpop.f32.mrf.mxu0  ;;  %v2870_v28 = vpop.f32.mrf.mxu1  ;;  %v2225_v24 = vpack.c.bf16 %v2210_v3, %v2209_v27 }
 0x815   :  { %v2080_v54 = vadd.f32 %v2034_v53, %v1666_v39  ;;  %v2036_v31 = vadd.f32 %v2035_v7, %v5181_v13  ;;  %v1953_v7 = vadd.f32 %v4688_v40, %v5177_v29 }
 0x816   :  { %v2037_v62 = vpop.f32.mrf.mxu0  ;;  %v2077_v38 = vpop.f32.mrf.mxu1 }
 0x817   :  { %v2338_v6 = vmul.f32 -1.442695, %v2080_v54  ;;  %v2081_v47 = vadd.f32 %v2036_v31, %v1668_v60 }
 0x818   :  { %v2038_v12 = vpop.f32.mrf.mxu0  ;;  %v2871_v51 = vpop.f32.mrf.mxu1 }
 0x819   :  { %3019 = vpow2.f32 %v2338_v6  ;;  %v2339_v44 = vmul.f32 -1.442695, %v2081_v47 }
 0x81b   :  { %3021 = vpow2.f32 %v2339_v44 }
 0x826   :  { %v3020_v8 = vpop.eup %3019 }
 0x827   :  { %v2088_v10 = vadd.f32 1.0, %v3020_v8 }
 0x828   :  { %v3022_v33 = vpop.eup %3021 }
 0x829   :  { %3023 = vrcp.f32 %v2088_v10  ;;  %v2089_v18 = vadd.f32 1.0, %v3022_v33 }
 0x82b   :  { %3025 = vrcp.f32 %v2089_v18 }
 0x836   :  { %v3024_v17 = vpop.eup %3023 }
 0x837   :  { %v2094_v22 = vmul.f32 %v3024_v17, %v2075_v9 }
 0x838   :  { %v3026_v14 = vpop.eup %3025 }
 0x839   :  { %v2095_v26 = vadd.f32 %v2094_v22, %v1707_v23  ;;  %v2097_v42 = vsub.f32 1.0, %v3026_v14  ;;  %v2099_v34 = vmul.f32 %v3026_v14, %v4612_v5  ;;  %v2221_v5 = vld [vmem:[%s4793_s9 + $0x60] sm:$0xff]  ;;  %s3086_s9 = smov [#allocation4]  }
 0x83a   :  { %v2231_v2 = vpack.c.bf16 %v2222_v58, %v2221_v5  ;;  %s2296_s27 = sshll.u32 %s3086_s9, 4  ;;  %s2297_s27 = int_to_ptr.vmem [resolvable:$true] %s2296_s27 }
 0x83b   :  { %3027 = vtanh.f32 %v2095_v26  ;;  %s3039_s28 = scalar_lea.vmem %s2297_s27, 256  ;;  %p3044_p1 = scmp.lt.s32.totalorder %s2297_s27, %s2297_s27 }
 0x83c   :  { %p3040_p0 = scmp.ne.s32.totalorder %s2297_s27, %s3039_s28  ;;  %p3045_p2 = scmp.lt.s32.totalorder %s3039_s28, %s3039_s28 }
 0x83e   :  { %p3046_p3 = por %p3045_p2, %p3044_p1 }
 0x840   :  { %p3047_p4 = pnand %p3046_p3, %p3040_p0 }
 0x848   :  { %v3028_v21 = vpop.eup %3027 }
 0x849   :  { %v2098_v25 = vmul.f32 %v3028_v21, %v2097_v42 }
 0x84b   :  { %v4704_v57 = vadd.f32 %v2099_v34, %v2098_v25 }
 0x84d   :  { %v2101_v1 = vpack.c.bf16 %v4704_v57, %v4704_v57 }
 0x84f   :  { %2135 = vmatmul.mubr.bf16.vlgmr.msra.gmra.mxu0 %v2101_v1  ;;  %2889 = vmatmul.mubr.bf16.vlgmr.msra.gmra.mxu1 %v2101_v1 }
 0x850   :  { %2908 = vmatprep.mubr.msk.bf16.mxu0 %vm3085_vm1, %v4978_v46  ;;  %2893 = vmatpush3.bf16.msra.mxu0 %v2232_v0 }
 0x851   :  { %2894 = vmatprep.subr.bf16.mxu0 %v4978_v46 }
 0x854   :  { %2895 = vmatpush3.bf16.msra.mxu0 %v2231_v2 }
 0x855   :  { %2896 = vmatprep.subr.bf16.mxu0 %v4978_v46 }
 0x858   :  { %2897 = vmatpush3.bf16.msra.mxu0 %v2230_v36 }
 0x859   :  { %2898 = vmatprep.subr.bf16.mxu0 %v4978_v46 }
 0x85c   :  { %2899 = vmatpush3.bf16.msra.mxu0 %v2229_v63 }
 0x85d   :  { %2900 = vmatprep.subr.bf16.mxu0 %v4978_v46 }
 0x860   :  { %2901 = vmatpush3.bf16.msra.mxu0 %v2228_v30 }
 0x861   :  { %2902 = vmatprep.subr.bf16.mxu0 %v4978_v46 }
 0x864   :  { %2903 = vmatpush3.bf16.msra.mxu0 %v2227_v32 }
 0x865   :  { %2904 = vmatprep.subr.bf16.mxu0 %v4978_v46 }
 0x868   :  { %2905 = vmatpush3.bf16.msra.mxu0 %v2226_v20 }
 0x869   :  { %2906 = vmatprep.subr.bf16.mxu0 %v4978_v46  ;;  %v1955_v46 = vadd.f32 %v4692_v45, %v4161_v19 }
 0x86c   :  { %2907 = vmatpush3.bf16.msra.mxu0 %v2225_v24 }
 0x90f   :  { %v2136_v39 = vpop.f32.mrf.mxu0  ;;  %v2177_v53 = vpop.f32.mrf.mxu1 }
 0x910   :  { %v2137_v28 = vadd.f32 %v2136_v39, %v5179_v16  ;;  %v2178_v33 = vadd.f32 %v2177_v53, %v5183_v52 }
 0x911   :  { %v2138_v54 = vpop.f32.mrf.mxu0  ;;  %v2890_v62 = vpop.f32.mrf.mxu1 }
 0x912   :  { %v2183_v38 = vadd.f32 %v2137_v28, %v1953_v7  ;;  %v2139_v51 = vadd.f32 %v2138_v54, %v5181_v13  ;;  %v1994_v13 = vadd.f32 %v4690_v49, %v4176_v4 }
 0x913   :  { %v2140_v6 = vpop.f32.mrf.mxu0  ;;  %v2180_v31 = vpop.f32.mrf.mxu1 }
 0x914   :  { %v2340_v12 = vmul.f32 -1.442695, %v2183_v38  ;;  %v2184_v44 = vadd.f32 %v2139_v51, %v1955_v46 }
 0x915   :  { %v2141_v60 = vpop.f32.mrf.mxu0  ;;  %v2891_v47 = vpop.f32.mrf.mxu1 }
 0x916   :  { %3029 = vpow2.f32 %v2340_v12  ;;  %v2341_v8 = vmul.f32 -1.442695, %v2184_v44 }
 0x918   :  { %3031 = vpow2.f32 %v2341_v8 }
 0x923   :  { %v3030_v29 = vpop.eup %3029 }
 0x924   :  { %v2191_v40 = vadd.f32 1.0, %v3030_v29 }
 0x925   :  { %v3032_v16 = vpop.eup %3031 }
 0x926   :  { %3033 = vrcp.f32 %v2191_v40  ;;  %v2192_v10 = vadd.f32 1.0, %v3032_v16 }
 0x928   :  { %3035 = vrcp.f32 %v2192_v10 }
 0x933   :  { %v3034_v18 = vpop.eup %3033 }
 0x934   :  { %v2197_v9 = vmul.f32 %v3034_v18, %v2178_v33 }
 0x935   :  { %v3036_v19 = vpop.eup %3035 }
 0x936   :  { %v2198_v17 = vadd.f32 %v2197_v9, %v1994_v13  ;;  %v2200_v45 = vsub.f32 1.0, %v3036_v19  ;;  %v2202_v26 = vmul.f32 %v3036_v19, %v4704_v57 }
 0x938   :  { %3037 = vtanh.f32 %v2198_v17 }
 0x945   :  { %v3038_v23 = vpop.eup %3037 }
 0x946   :  { %v2201_v22 = vmul.f32 %v3038_v23, %v2200_v45 }
 0x948   :  { %v2203_v14 = vadd.f32 %v2202_v26, %v2201_v22 }
 0x94a   :  { %v2207_v42 = vmax.f32 %v2203_v14, 0.0  ;;  %2206 = vst [vmem:[#allocation4 + $0x8] sm:$0xff] %v2203_v14 }
 0x94c   :  { %v2208_v21 = vpack.c.bf16 %v2207_v42, %v2207_v42 }
 0x94e   :  { %2909 = vmatmul.mubr.bf16.vlgmr.msra.gmra.mxu0 %v2208_v21 }
 0x94f   :  { %3050 = shalt.err (!%p3047_p4)
}
 0x950   :  { %s3087_s29 = smov 128   ;;  %s3088_s30 = smov 8   ;;  %v2342_v4 = vld [vmem:[%s4794_s10] ss:$0 sm:$0xff] }
 0x951   :  { %2302 = dma.vmem_to_hbm [thread:$0]  %s2297_s27, 256, %s4797_s13, [#allocation5], %s3087_s29, %s3087_s29, %s3088_s30  }
 0x952   :  { %s3089_s5 = smov [#allocation2]  }
 0x953   :  { %s2287_s17 = sshll.u32 %s3089_s5, 4  ;;  %s2288_s17 = int_to_ptr.vmem [resolvable:$true] %s2287_s17 }
 0x954   :  { %s3059_s3 = scalar_lea.vmem %s2288_s17, 128  ;;  %p3064_p6 = scmp.lt.s32.totalorder %s2288_s17, %s2288_s17 }
 0x955   :  { %p3060_p5 = scmp.ne.s32.totalorder %s2288_s17, %s3059_s3  ;;  %p3065_p7 = scmp.lt.s32.totalorder %s3059_s3, %s3059_s3 }
 0x957   :  { %p3066_p8 = por %p3065_p7, %p3064_p6 }
 0x959   :  { %p3067_p9 = pnand %p3066_p8, %p3060_p5 }
 0xa0e   :  { %v2274_v52 = vpop.f32.mrf.mxu0 }
 0xa0f   :  { %v2275_v49 = vadd.f32 %v2342_v4, %v2274_v52 }
 0xa10   :  { %v2910_v25 = vpop.f32.mrf.mxu0 }
 0xa11   :  { %2280 = vst [vmem:[#allocation2] sm:$0xff] %v2275_v49 }
 0xa12   :  { %v2277_v34 = vpop.f32.mrf.mxu0 }
 0xa13   :  { %3070 = shalt.err (!%p3067_p9)
}
 0xa14   :  { %2290 = dma.vmem_to_hbm [thread:$0]  %s2288_s17, 128, %s4796_s12, [#allocation3]   ;;  %v2911_v57 = vpop.f32.mrf.mxu0 }
 0xa15   :  { %3079 = dma.done.wait [#allocation3], 128  }
 0xa16   :  { %3080 = vsyncadd [#allocation3], 4294967168 }
 0xa17   :  { %3081 = dma.done.wait [#allocation5], 256  }
 0xa18   :  { %3082 = vsyncadd [#allocation5], 4294967040 }
 0xa19   :  { %2309 = vsyncpa [#allocation3], 1 }
 0xa1a   :  { %2310 = vsyncpa [#allocation5], 1 }

</bundles_post_ra>
